<compile_context>
chip_gen: v7x
topology: tpu7x:2x2x1
jax: 0.10.0
libtpu: 0.0.40
codegen_flags: <defaults>
</compile_context>

<pallas_src>
import functools

import jax
import jax.numpy as jnp
from jax import lax
from jax.experimental import pallas as pl
from jax.experimental.pallas import tpu as pltpu

BN_EPS = 1e-5
_LANE = 128


def autopad(k, p=None):
    if p is None:
        p = k // 2 if isinstance(k, int) else [x // 2 for x in k]
    return p


def _round_up(x, m):
    return ((x + m - 1) // m) * m


def _cdiv(a, b):
    return -(-a // b)


def _round_tile(t, lo=8):
    t = max(lo, int(t))
    if t >= 512:
        return (t // 256) * 256      # whole MXU passes, amortized per-step overhead
    return (t // 8) * 8


# ------------------------------------------------------------------- kernels ----

def _fused_conv_stats_kernel(x0_ref, x1_ref, w_ref, o_ref, stats_ref, *,
                             k, c1, wp, wo, q_valid, tq):
    """Pass 1 (fused, stride-1): in-kernel im2col + MXU matmul + BN statistics.

    x0/x1 are row-tiles j and j+1 of one image's flattened padded slab (Hp*Wp, C1).
    Each spatial tap (kh, kw) is a static row shift d = kh*Wp + kw of that slab, so
    the conv tile is the sum of k*k shifted (TQ, C1) x (C1, C2p) matmuls with f32
    accumulation (contraction dim = C1, lane-dense output).
    """
    j = pl.program_id(1)
    x = jnp.concatenate([x0_ref[0], x1_ref[0]], axis=0)          # (2*TQ, C1)
    acc = jnp.zeros((tq, o_ref.shape[-1]), jnp.float32)
    for kh in range(k):
        for kw in range(k):
            d = kh * wp + kw                                     # static shift <= TQ
            idx = kh * k + kw
            acc = acc + jnp.dot(x[d:d + tq, :],
                                w_ref[idx * c1:(idx + 1) * c1, :],
                                preferred_element_type=jnp.float32)
    # Rows at horizontal / bottom padding positions are not real conv outputs:
    # exclude them from the BatchNorm statistics (they are sliced off at the end;
    # bias=False so they cannot perturb anything else).
    q = j * tq + lax.broadcasted_iota(jnp.int32, (tq, 1), 0)
    valid = jnp.logical_and(q % wp < wo, q < q_valid)
    om = jnp.where(valid, acc, 0.0)
    stats_ref[...] = jnp.concatenate(
        [jnp.sum(om, axis=0, keepdims=True),
         jnp.sum(om * om, axis=0, keepdims=True)], axis=0).reshape(stats_ref.shape)
    o_ref[...] = acc.astype(o_ref.dtype)       # stats from f32, possibly narrow store


def _matmul_stats_kernel(p_ref, w_ref, o_ref, stats_ref, acc_ref):
    """Pass 1 (im2col fallback): K-tiled MXU matmul with a f32 VMEM accumulator."""
    kk = pl.program_id(1)

    @pl.when(kk == 0)
    def _():
        acc_ref[...] = jnp.zeros_like(acc_ref)

    acc_ref[...] += jnp.dot(p_ref[...], w_ref[...],
                            preferred_element_type=jnp.float32)

    @pl.when(kk == pl.num_programs(1) - 1)
    def _():
        o = acc_ref[...]
        o_ref[...] = o.astype(o_ref.dtype)
        stats_ref[...] = jnp.concatenate(
            [jnp.sum(o, axis=0, keepdims=True),
             jnp.sum(o * o, axis=0, keepdims=True)], axis=0
        ).reshape(stats_ref.shape)


def _bn_act_kernel(o_ref, a_ref, b_ref, y_ref, *, apply_silu):
    """Pass 2: folded BatchNorm y = o*a + b (+ optional SiLU), f32 on the VPU/EUP."""
    y = o_ref[...].astype(jnp.float32) * a_ref[...] + b_ref[...]
    if apply_silu:
        y = y * jax.nn.sigmoid(y)
    y_ref[...] = y.astype(y_ref.dtype)


# ------------------------------------------------------------------ planning ----

def _vmem_budget():
    """(compiler vmem_limit_bytes, tile-sizing budget) from the chip's VMEM size."""
    try:
        cap = int(pltpu.get_tpu_info().vmem_capacity_bytes)
    except Exception:
        cap = 64 << 20
    if cap >= (128 << 20):
        return 112 << 20, 96 << 20          # v4 / v5e / v5p / v6e: 128 MiB per core
    if cap >= (64 << 20):
        return 48 << 20, 40 << 20           # v7x: 64 MiB per core
    return (cap * 3) // 4, (cap * 5) // 8   # older parts: stay well under capacity


def _plan_fused(N, Wp, Ho, Wo, C1, C2p, k, in_bytes, co_bytes, sizing):
    """Row tile TQ for the fused stride-1 path, or None if it cannot fit in VMEM."""
    halo = (k - 1) * (Wp + 1)                     # largest flattened tap shift
    c1e = _round_up(C1, _LANE)                    # minor dim is lane-padded in VMEM
    wbytes = 2 * _round_up(k * k * C1, 8) * C2p * in_bytes   # resident weight, once
    per_row = (4 * c1e * in_bytes                 # two shifted input specs, double-buffered
               + 4 * c1e * in_bytes               # concat slab + sliced views (temporaries)
               + 2 * C2p * co_bytes               # conv-out block, double-buffered
               + 2 * C2p * 4)                     # f32 accumulator + masked copy
    budget = sizing - wbytes
    tq_min = max(8, _round_up(halo, 8))
    if budget < tq_min * per_row:
        return None
    tq = min(budget // per_row, _round_up(Ho * Wp, 8), 4096)
    if N == 1 and Ho * Wp > 16:
        # keep >= 2 grid steps so both v7x TensorCores get work
        tq = min(tq, _round_up(_cdiv(Ho * Wp, 2), 8))
    return max(tq_min, _round_tile(tq))


def _plan_im2col(M, K, C2p, in_bytes, co_bytes, sizing):
    """(TM, TK, Kp) for the im2col fallback; prefers TM >= 512, tiles K if needed."""
    row2 = 2 * C2p * (co_bytes + 4)               # pass-2 per-row (in + f32 out, dbl-buf)
    best = None
    for tk in [K] + [t for t in (2048, 1024, 512, 256, 128) if t < K]:
        kp = K if tk == K else _round_up(K, tk)
        wbytes = 2 * _round_up(tk, 8) * C2p * in_bytes          # weight tile, counted once
        tke = _round_up(tk, _LANE)
        row1 = 2 * (tke * in_bytes + C2p * co_bytes) + C2p * 4  # patches+out dbl-buf + acc
        per_row = max(row1, row2)
        budget = sizing - wbytes
        if budget < 8 * per_row:
            continue
        tm = min(budget // per_row, 2048)
        if M >= 16:
            tm = min(tm, _round_up(_cdiv(M, 2), 8))   # >= 2 M-steps for v7x megacore
        tm = _round_tile(tm)
        if tm >= 512:
            return tm, tk, kp
        if best is None or tm > best[0]:
            best = (tm, tk, kp)
    if best is None:
        tk = K if K <= 128 else 128
        best = (8, tk, K if tk == K else _round_up(K, tk))
    return best


# -------------------------------------------------------------------- passes ----

def _conv_pass1_fused(x_pad_nhwc, w2d, *, N, Hp, Wp, Ho, Wo, C1, C2p, k, tq,
                      mxu_dtype, conv_dtype, vmem_limit):
    gh = _cdiv(Ho * Wp, tq)
    qx = max((gh + 1) * tq, Hp * Wp)         # block j+1 of the last tile must exist
    x2 = x_pad_nhwc.reshape(N, Hp * Wp, C1)
    x2 = jnp.pad(x2, ((0, 0), (0, qx - Hp * Wp), (0, 0))).astype(mxu_dtype)
    kflat = k * k * C1
    rows = N * gh * tq

    kern = functools.partial(_fused_conv_stats_kernel, k=k, c1=C1, wp=Wp, wo=Wo,
                             q_valid=Ho * Wp, tq=tq)
    conv_out, stats = pl.pallas_call(
        kern,
        out_shape=(jax.ShapeDtypeStruct((rows, C2p), conv_dtype),
                   jax.ShapeDtypeStruct((N * gh, 2, C2p), jnp.float32)),
        grid=(N, gh),
        in_specs=[
            pl.BlockSpec((1, tq, C1), lambda n, j: (n, j, 0)),       # row tile j
            pl.BlockSpec((1, tq, C1), lambda n, j: (n, j + 1, 0)),   # tile j+1 (halo)
            pl.BlockSpec((kflat, C2p), lambda n, j: (0, 0)),         # resident weight
        ],
        out_specs=(
            pl.BlockSpec((tq, C2p), lambda n, j: (n * gh + j, 0)),
            pl.BlockSpec((1, 2, C2p), lambda n, j: (n * gh + j, 0, 0)),
        ),
        compiler_params=pltpu.CompilerParams(
            dimension_semantics=("parallel", "parallel"),
            vmem_limit_bytes=vmem_limit),
    )(x2, x2, w2d)
    return conv_out, stats, gh


def _conv_pass1_im2col(x_pad_nhwc, w2d, *, N, Ho, Wo, C1, C2p, k, s,
                       mxu_dtype, conv_dtype, sizing, vmem_limit):
    M = N * Ho * Wo
    K = k * k * C1
    in_bytes = jnp.dtype(mxu_dtype).itemsize
    co_bytes = jnp.dtype(conv_dtype).itemsize
    TM, TK, Kp = _plan_im2col(M, K, C2p, in_bytes, co_bytes, sizing)
    Mp = _round_up(M, TM)
    gm, gk = Mp // TM, Kp // TK

    cols = []
    for kh in range(k):
        for kw in range(k):
            cols.append(x_pad_nhwc[:, kh:kh + s * Ho:s, kw:kw + s * Wo:s, :])
    patches = jnp.stack(cols, axis=3).reshape(M, K)       # (kh, kw, c1) column order
    # zero rows/cols contribute nothing to the matmul or the (sum, sum_sq) stats
    patches = jnp.pad(patches, ((0, Mp - M), (0, Kp - K))).astype(mxu_dtype)
    w2dp = jnp.pad(w2d, ((0, Kp - K), (0, 0)))

    conv_out, stats = pl.pallas_call(
        _matmul_stats_kernel,
        out_shape=(jax.ShapeDtypeStruct((Mp, C2p), conv_dtype),
                   jax.ShapeDtypeStruct((gm, 2, C2p), jnp.float32)),
        grid=(gm, gk),
        in_specs=[
            pl.BlockSpec((TM, TK), lambda i, kk: (i, kk)),
            pl.BlockSpec((TK, C2p), lambda i, kk: (kk, 0)),
        ],
        out_specs=(
            pl.BlockSpec((TM, C2p), lambda i, kk: (i, 0)),
            pl.BlockSpec((1, 2, C2p), lambda i, kk: (i, 0, 0)),
        ),
        scratch_shapes=[pltpu.VMEM((TM, C2p), jnp.float32)],
        compiler_params=pltpu.CompilerParams(
            dimension_semantics=("parallel", "arbitrary"),
            vmem_limit_bytes=vmem_limit),
    )(patches, w2dp)
    return conv_out, stats, M, TM


def _bn_act_pass2(conv_out, a, b, *, tile, act, vmem_limit):
    R, C2p = conv_out.shape
    kern = functools.partial(_bn_act_kernel, apply_silu=(act == "silu"))
    # alias the f32 intermediate onto the output buffer when dtypes allow it
    alias = {0: 0} if conv_out.dtype == jnp.dtype(jnp.float32) else {}
    return pl.pallas_call(
        kern,
        out_shape=jax.ShapeDtypeStruct((R, C2p), jnp.float32),
        grid=(R // tile,),
        in_specs=[
            pl.BlockSpec((tile, C2p), lambda i: (i, 0)),
            pl.BlockSpec((1, C2p), lambda i: (0, 0)),
            pl.BlockSpec((1, C2p), lambda i: (0, 0)),
        ],
        out_specs=pl.BlockSpec((tile, C2p), lambda i: (i, 0)),
        input_output_aliases=alias,
        compiler_params=pltpu.CompilerParams(
            dimension_semantics=("parallel",),
            vmem_limit_bytes=vmem_limit),
    )(conv_out, a, b)


# ------------------------------------------------------------------- wrapper ----

def conv_bn_act(x_nchw, weight, gamma, beta, *, k, s, p=None, act=None,
                mxu_dtype=jnp.bfloat16):
    """Forward of Conv(c1, c2, k, s, p, g=1, act, bias=False, bn=True).

    x_nchw: (N, C1, H, W) float32;  weight: (C2, C1, k, k);  gamma/beta: (C2,)
    act: None (Identity, module default) or "silu".
    mxu_dtype: dtype fed to the MXU (default bfloat16; accumulation and BN math
    stay float32).  Pass jnp.float32 for f32 conv numerics.
    """
    if act not in (None, "silu"):
        # TODO(synk): only Identity / SiLU activation modules are implemented.
        raise NotImplementedError(f"act={act!r} not supported")
    pad_ = autopad(k, p)
    N, C1, H, W = x_nchw.shape
    C2 = weight.shape[0]
    Ho = (H + 2 * pad_ - k) // s + 1
    Wo = (W + 2 * pad_ - k) // s + 1
    Hp, Wp = H + 2 * pad_, W + 2 * pad_
    count = N * Ho * Wo
    C2p = _round_up(C2, _LANE)                      # lane-dense output channels
    mxu_dtype = jnp.dtype(mxu_dtype)
    conv_dtype = (jnp.dtype(jnp.float32) if mxu_dtype == jnp.dtype(jnp.float32)
                  else jnp.dtype(jnp.bfloat16))     # narrow pass-1 -> pass-2 intermediate
    in_bytes, co_bytes = mxu_dtype.itemsize, conv_dtype.itemsize
    vmem_limit, sizing = _vmem_budget()

    # host-side glue: NCHW -> zero-padded NHWC (no k^2 im2col blow-up on the fused path)
    x = jnp.transpose(x_nchw, (0, 2, 3, 1))
    x = jnp.pad(x, ((0, 0), (pad_, pad_), (pad_, pad_), (0, 0)))

    # small weight -> (k*k*C1, C2p) in (kh, kw, c1) row order, channels padded to 128
    w2d = jnp.transpose(weight, (2, 3, 1, 0)).reshape(k * k * C1, C2)
    w2d = jnp.pad(w2d, ((0, 0), (0, C2p - C2))).astype(mxu_dtype)

    tq = (_plan_fused(N, Wp, Ho, Wo, C1, C2p, k, in_bytes, co_bytes, sizing)
          if s == 1 else None)
    if tq is not None:
        conv_out, stats, gh = _conv_pass1_fused(
            x, w2d, N=N, Hp=Hp, Wp=Wp, Ho=Ho, Wo=Wo, C1=C1, C2p=C2p, k=k, tq=tq,
            mxu_dtype=mxu_dtype, conv_dtype=conv_dtype, vmem_limit=vmem_limit)
        tile = tq
    else:
        # TODO(synk): strided convs (s > 1) still use host-side im2col; fold the
        # stride into the in-kernel tap gather to cover them in the fused path too.
        conv_out, stats, M, tile = _conv_pass1_im2col(
            x, w2d, N=N, Ho=Ho, Wo=Wo, C1=C1, C2p=C2p, k=k, s=s,
            mxu_dtype=mxu_dtype, conv_dtype=conv_dtype,
            sizing=sizing, vmem_limit=vmem_limit)

    # tiny cross-tile reduction + BN fold (C2p-length vectors, plain JAX)
    # NOTE: E[x^2]-E[x]^2 in f32 can drift for badly-centered activations; the
    # padded rows are stat-neutral only because bias=False (zero patch -> zero conv).
    total = jnp.sum(stats, axis=0)
    mean = total[0] / count
    var = jnp.maximum(total[1] / count - mean * mean, 0.0)   # biased variance (training BN)
    inv_std = lax.rsqrt(var + BN_EPS)
    a_vec = jnp.pad(gamma.astype(jnp.float32), (0, C2p - C2)) * inv_std
    b_vec = jnp.pad(beta.astype(jnp.float32), (0, C2p - C2)) - mean * a_vec

    y2d = _bn_act_pass2(conv_out, a_vec.reshape(1, C2p), b_vec.reshape(1, C2p),
                        tile=tile, act=act, vmem_limit=vmem_limit)

    # glue: strip padding and return NCHW
    if tq is not None:
        out = y2d.reshape(N, -1, C2p)[:, :Ho * Wp, :C2]
        out = out.reshape(N, Ho, Wp, C2)[:, :, :Wo, :]
    else:
        out = y2d[:M, :C2].reshape(N, Ho, Wo, C2)
    return jnp.transpose(out, (0, 3, 1, 2))


# ------------------------------------------------------------------ reference ----

def _reference(x_nchw, weight, gamma, beta, *, k, s, p=None, act=None):
    pad_ = autopad(k, p)
    o = lax.conv_general_dilated(
        x_nchw, weight, window_strides=(s, s),
        padding=((pad_, pad_), (pad_, pad_)),
        dimension_numbers=("NCHW", "OIHW", "NCHW"),
        precision=lax.Precision.HIGHEST)
    mean = jnp.mean(o, axis=(0, 2, 3), keepdims=True)
    var = jnp.mean((o - mean) ** 2, axis=(0, 2, 3), keepdims=True)
    y = (o - mean) * lax.rsqrt(var + BN_EPS)
    y = y * gamma.reshape(1, -1, 1, 1) + beta.reshape(1, -1, 1, 1)
    if act == "silu":
        y = y * jax.nn.sigmoid(y)
    return y


if __name__ == "__main__":
    # Conv(c1=4, c2=8, ...) with bias=False, bn=True
    N, C1, H, W = 2, 4, 16, 16
    C2 = 8

    key = jax.random.PRNGKey(0)
    kx, kw_, kg, kb = jax.random.split(key, 4)
    x = jax.random.normal(kx, (N, C1, H, W), dtype=jnp.float32)
    gamma = 1.0 + 0.1 * jax.random.normal(kg, (C2,), dtype=jnp.float32)
    beta = 0.1 * jax.random.normal(kb, (C2,), dtype=jnp.float32)

    # (k, s, act, mxu_dtype or None -> default bf16, atol)
    cases = [
        (3, 1, None,   jnp.float32, 5e-4),   # fused stride-1 path, f32 MXU numerics
        (3, 1, "silu", None,        8e-2),   # fused path with default bf16 MXU inputs
        (1, 1, "silu", jnp.float32, 5e-4),   # 1x1 conv on the fused path
        (3, 2, "silu", jnp.float32, 5e-4),   # strided conv -> im2col fallback path
    ]
    for kk, ss, act, mdt, atol in cases:
        weight = 0.1 * jax.random.normal(kw_, (C2, C1, kk, kk), dtype=jnp.float32)
        kwargs = dict(k=kk, s=ss, act=act)
        if mdt is not None:
            kwargs["mxu_dtype"] = mdt
        fn = jax.jit(functools.partial(conv_bn_act, **kwargs))
        out = jax.block_until_ready(fn(x, weight, gamma, beta))
        ref = _reference(x, weight, gamma, beta, k=kk, s=ss, act=act)
        assert out.shape == ref.shape, (out.shape, ref.shape)
        err = float(jnp.max(jnp.abs(out - ref)))
        assert err <= atol, ("mismatch", kk, ss, act, err)
    print("KERNEL_OK")
</pallas_src>

<mosaic_0001>
module attributes {stable_mosaic.version = 11 : i64} {
  func.func @_bn_act_kernel(%arg0: i32, %arg1: memref<288x128xf32, #tpu.memory_space<vmem>>, %arg2: memref<1x128xf32, #tpu.memory_space<vmem>>, %arg3: memref<1x128xf32, #tpu.memory_space<vmem>>, %arg4: memref<288x128xf32, #tpu.memory_space<vmem>>) attributes {dimension_semantics = [#tpu.dimension_semantics<parallel>], iteration_bounds = array<i64: 2>, scalar_prefetch = 0 : i64, scratch_operands = 0 : i64, tpu.core_type = #tpu.core_type<tc>, window_params = [{transform_indices = @transform_0, window_bounds = array<i64: 288, 128>}, {pipeline_mode = #tpu.pipeline_mode<synchronous>, transform_indices = @transform_1, window_bounds = array<i64: 1, 128>}, {pipeline_mode = #tpu.pipeline_mode<synchronous>, transform_indices = @transform_2, window_bounds = array<i64: 1, 128>}, {transform_indices = @transform_3, window_bounds = array<i64: 288, 128>}]} {
    %c0 = arith.constant 0 : index
    %c0_0 = arith.constant 0 : index
    %0 = vector.load %arg1[%c0, %c0_0] : memref<288x128xf32, #tpu.memory_space<vmem>>, vector<288x128xf32>
    %c0_1 = arith.constant 0 : index
    %c0_2 = arith.constant 0 : index
    %1 = vector.load %arg2[%c0_1, %c0_2] : memref<1x128xf32, #tpu.memory_space<vmem>>, vector<1x128xf32>
    %2 = vector.broadcast %1 : vector<1x128xf32> to vector<288x128xf32>
    %3 = arith.mulf %0, %2 : vector<288x128xf32>
    %c0_3 = arith.constant 0 : index
    %c0_4 = arith.constant 0 : index
    %4 = vector.load %arg3[%c0_3, %c0_4] : memref<1x128xf32, #tpu.memory_space<vmem>>, vector<1x128xf32>
    %5 = vector.broadcast %4 : vector<1x128xf32> to vector<288x128xf32>
    %6 = arith.addf %3, %5 : vector<288x128xf32>
    %c0_5 = arith.constant 0 : index
    %c0_6 = arith.constant 0 : index
    %7 = vector.load %arg4[%c0_5, %c0_6] : memref<288x128xf32, #tpu.memory_space<vmem>>, vector<288x128xf32>
    tpu.vector_store %arg4[%c0_5, %c0_6], %6 {strides = array<i32>} : memref<288x128xf32, #tpu.memory_space<vmem>>, vector<288x128xf32>,
    return
  }
  func.func @transform_0(%arg0: i32) -> (i32, i32) {
    %c0_i32 = arith.constant 0 : i32
    %c0_i32_0 = arith.constant 0 : i32
    return %arg0, %c0_i32 : i32, i32
  }
  func.func @transform_1(%arg0: i32) -> (i32, i32) {
    %c0_i32 = arith.constant 0 : i32
    %c0_i32_0 = arith.constant 0 : i32
    %c0_i32_1 = arith.constant 0 : i32
    return %c0_i32, %c0_i32_0 : i32, i32
  }
  func.func @transform_2(%arg0: i32) -> (i32, i32) {
    %c0_i32 = arith.constant 0 : i32
    %c0_i32_0 = arith.constant 0 : i32
    %c0_i32_1 = arith.constant 0 : i32
    return %c0_i32, %c0_i32_0 : i32, i32
  }
  func.func @transform_3(%arg0: i32) -> (i32, i32) {
    %c0_i32 = arith.constant 0 : i32
    %c0_i32_0 = arith.constant 0 : i32
    return %arg0, %c0_i32 : i32, i32
  }
}

module attributes {stable_mosaic.version = 11 : i64} {
  func.func @_fused_conv_stats_kernel(%arg0: i32, %arg1: i32, %arg2: memref<1x288x4xf32, #tpu.memory_space<vmem>>, %arg3: memref<1x288x4xf32, #tpu.memory_space<vmem>>, %arg4: memref<36x128xf32, #tpu.memory_space<vmem>>, %arg5: memref<288x128xf32, #tpu.memory_space<vmem>>, %arg6: memref<1x2x128xf32, #tpu.memory_space<vmem>>) attributes {dimension_semantics = [#tpu.dimension_semantics<parallel>, #tpu.dimension_semantics<parallel>], iteration_bounds = array<i64: 2, 1>, scalar_prefetch = 0 : i64, scratch_operands = 0 : i64, tpu.core_type = #tpu.core_type<tc>, window_params = [{transform_indices = @transform_0, window_bounds = array<i64: 1, 288, 4>}, {transform_indices = @transform_1, window_bounds = array<i64: 1, 288, 4>}, {pipeline_mode = #tpu.pipeline_mode<synchronous>, transform_indices = @transform_2, window_bounds = array<i64: 36, 128>}, {transform_indices = @transform_3, window_bounds = array<i64: 288, 128>}, {transform_indices = @transform_4, window_bounds = array<i64: 1, 2, 128>}]} {
    %c0 = arith.constant 0 : index
    %c0_0 = arith.constant 0 : index
    %c0_1 = arith.constant 0 : index
    %0 = vector.load %arg2[%c0, %c0_0, %c0_1] : memref<1x288x4xf32, #tpu.memory_space<vmem>>, vector<1x288x4xf32>
    %1 = vector.shape_cast %0 : vector<1x288x4xf32> to vector<288x4xf32>
    %c0_2 = arith.constant 0 : index
    %c0_3 = arith.constant 0 : index
    %c0_4 = arith.constant 0 : index
    %2 = vector.load %arg3[%c0_2, %c0_3, %c0_4] : memref<1x288x4xf32, #tpu.memory_space<vmem>>, vector<1x288x4xf32>
    %3 = vector.shape_cast %2 : vector<1x288x4xf32> to vector<288x4xf32>
    %4 = tpu.concatenate %1, %3 in 0 : vector<288x4xf32>, vector<288x4xf32> -> vector<576x4xf32>
    %cst = arith.constant 0.000000e+00 : f32
    %5 = vector.broadcast %cst : f32 to vector<288x128xf32>
    %6 = vector.extract_strided_slice %4 {offsets = [0, 0], sizes = [288, 4], strides = [1, 1]} : vector<576x4xf32> to vector<288x4xf32>
    %c0_5 = arith.constant 0 : index
    %c0_6 = arith.constant 0 : index
    %7 = vector.load %arg4[%c0_5, %c0_6] : memref<36x128xf32, #tpu.memory_space<vmem>>, vector<4x128xf32>
    %cst_7 = arith.constant dense<0.000000e+00> : vector<288x128xf32>
    %8 = tpu.matmul %6, %7, %cst_7 {dimension_numbers = #tpu.dot_dimension_numbers<[1], [0], [0], [1], [0, 0, 1, 1], [], []>} : vector<288x4xf32>, vector<4x128xf32>, vector<288x128xf32> -> vector<288x128xf32>
    %9 = arith.addf %5, %8 : vector<288x128xf32>
    %10 = vector.extract_strided_slice %4 {offsets = [1, 0], sizes = [288, 4], strides = [1, 1]} : vector<576x4xf32> to vector<288x4xf32>
    %c4 = arith.constant 4 : index
    %c0_8 = arith.constant 0 : index
    %11 = vector.load %arg4[%c4, %c0_8] : memref<36x128xf32, #tpu.memory_space<vmem>>, vector<4x128xf32>
    %cst_9 = arith.constant dense<0.000000e+00> : vector<288x128xf32>
    %12 = tpu.matmul %10, %11, %cst_9 {dimension_numbers = #tpu.dot_dimension_numbers<[1], [0], [0], [1], [0, 0, 1, 1], [], []>} : vector<288x4xf32>, vector<4x128xf32>, vector<288x128xf32> -> vector<288x128xf32>
    %13 = arith.addf %9, %12 : vector<288x128xf32>
    %14 = vector.extract_strided_slice %4 {offsets = [2, 0], sizes = [288, 4], strides = [1, 1]} : vector<576x4xf32> to vector<288x4xf32>
    %c8 = arith.constant 8 : index
    %c0_10 = arith.constant 0 : index
    %15 = vector.load %arg4[%c8, %c0_10] : memref<36x128xf32, #tpu.memory_space<vmem>>, vector<4x128xf32>
    %cst_11 = arith.constant dense<0.000000e+00> : vector<288x128xf32>
    %16 = tpu.matmul %14, %15, %cst_11 {dimension_numbers = #tpu.dot_dimension_numbers<[1], [0], [0], [1], [0, 0, 1, 1], [], []>} : vector<288x4xf32>, vector<4x128xf32>, vector<288x128xf32> -> vector<288x128xf32>
    %17 = arith.addf %13, %16 : vector<288x128xf32>
    %18 = vector.extract_strided_slice %4 {offsets = [18, 0], sizes = [288, 4], strides = [1, 1]} : vector<576x4xf32> to vector<288x4xf32>
    %c12 = arith.constant 12 : index
    %c0_12 = arith.constant 0 : index
    %19 = vector.load %arg4[%c12, %c0_12] : memref<36x128xf32, #tpu.memory_space<vmem>>, vector<4x128xf32>
    %cst_13 = arith.constant dense<0.000000e+00> : vector<288x128xf32>
    %20 = tpu.matmul %18, %19, %cst_13 {dimension_numbers = #tpu.dot_dimension_numbers<[1], [0], [0], [1], [0, 0, 1, 1], [], []>} : vector<288x4xf32>, vector<4x128xf32>, vector<288x128xf32> -> vector<288x128xf32>
    %21 = arith.addf %17, %20 : vector<288x128xf32>
    %22 = vector.extract_strided_slice %4 {offsets = [19, 0], sizes = [288, 4], strides = [1, 1]} : vector<576x4xf32> to vector<288x4xf32>
    %c16 = arith.constant 16 : index
    %c0_14 = arith.constant 0 : index
    %23 = vector.load %arg4[%c16, %c0_14] : memref<36x128xf32, #tpu.memory_space<vmem>>, vector<4x128xf32>
    %cst_15 = arith.constant dense<0.000000e+00> : vector<288x128xf32>
    %24 = tpu.matmul %22, %23, %cst_15 {dimension_numbers = #tpu.dot_dimension_numbers<[1], [0], [0], [1], [0, 0, 1, 1], [], []>} : vector<288x4xf32>, vector<4x128xf32>, vector<288x128xf32> -> vector<288x128xf32>
    %25 = arith.addf %21, %24 : vector<288x128xf32>
    %26 = vector.extract_strided_slice %4 {offsets = [20, 0], sizes = [288, 4], strides = [1, 1]} : vector<576x4xf32> to vector<288x4xf32>
    %c20 = arith.constant 20 : index
    %c0_16 = arith.constant 0 : index
    %27 = vector.load %arg4[%c20, %c0_16] : memref<36x128xf32, #tpu.memory_space<vmem>>, vector<4x128xf32>
    %cst_17 = arith.constant dense<0.000000e+00> : vector<288x128xf32>
    %28 = tpu.matmul %26, %27, %cst_17 {dimension_numbers = #tpu.dot_dimension_numbers<[1], [0], [0], [1], [0, 0, 1, 1], [], []>} : vector<288x4xf32>, vector<4x128xf32>, vector<288x128xf32> -> vector<288x128xf32>
    %29 = arith.addf %25, %28 : vector<288x128xf32>
    %30 = vector.extract_strided_slice %4 {offsets = [36, 0], sizes = [288, 4], strides = [1, 1]} : vector<576x4xf32> to vector<288x4xf32>
    %c24 = arith.constant 24 : index
    %c0_18 = arith.constant 0 : index
    %31 = vector.load %arg4[%c24, %c0_18] : memref<36x128xf32, #tpu.memory_space<vmem>>, vector<4x128xf32>
    %cst_19 = arith.constant dense<0.000000e+00> : vector<288x128xf32>
    %32 = tpu.matmul %30, %31, %cst_19 {dimension_numbers = #tpu.dot_dimension_numbers<[1], [0], [0], [1], [0, 0, 1, 1], [], []>} : vector<288x4xf32>, vector<4x128xf32>, vector<288x128xf32> -> vector<288x128xf32>
    %33 = arith.addf %29, %32 : vector<288x128xf32>
    %34 = vector.extract_strided_slice %4 {offsets = [37, 0], sizes = [288, 4], strides = [1, 1]} : vector<576x4xf32> to vector<288x4xf32>
    %c28 = arith.constant 28 : index
    %c0_20 = arith.constant 0 : index
    %35 = vector.load %arg4[%c28, %c0_20] : memref<36x128xf32, #tpu.memory_space<vmem>>, vector<4x128xf32>
    %cst_21 = arith.constant dense<0.000000e+00> : vector<288x128xf32>
    %36 = tpu.matmul %34, %35, %cst_21 {dimension_numbers = #tpu.dot_dimension_numbers<[1], [0], [0], [1], [0, 0, 1, 1], [], []>} : vector<288x4xf32>, vector<4x128xf32>, vector<288x128xf32> -> vector<288x128xf32>
    %37 = arith.addf %33, %36 : vector<288x128xf32>
    %38 = vector.extract_strided_slice %4 {offsets = [38, 0], sizes = [288, 4], strides = [1, 1]} : vector<576x4xf32> to vector<288x4xf32>
    %c32 = arith.constant 32 : index
    %c0_22 = arith.constant 0 : index
    %39 = vector.load %arg4[%c32, %c0_22] : memref<36x128xf32, #tpu.memory_space<vmem>>, vector<4x128xf32>
    %cst_23 = arith.constant dense<0.000000e+00> : vector<288x128xf32>
    %40 = tpu.matmul %38, %39, %cst_23 {dimension_numbers = #tpu.dot_dimension_numbers<[1], [0], [0], [1], [0, 0, 1, 1], [], []>} : vector<288x4xf32>, vector<4x128xf32>, vector<288x128xf32> -> vector<288x128xf32>
    %41 = arith.addf %37, %40 : vector<288x128xf32>
    %c288_i32 = arith.constant 288 : i32
    %42 = arith.muli %arg1, %c288_i32 : i32
    %43 = tpu.iota {dimensions = array<i32: 0>} : vector<288x1xi32>
    %44 = vector.broadcast %42 : i32 to vector<288x1xi32>
    %45 = arith.addi %44, %43 : vector<288x1xi32>
    %c18_i32 = arith.constant 18 : i32
    %c0_i32 = arith.constant 0 : i32
    %46 = arith.cmpi eq, %c18_i32, %c0_i32 : i32
    %c1_i32 = arith.constant 1 : i32
    %47 = arith.select %46, %c1_i32, %c18_i32 : i32
    %48 = vector.broadcast %47 : i32 to vector<288x1xi32>
    %49 = arith.remsi %45, %48 : vector<288x1xi32>
    %c0_i32_24 = arith.constant 0 : i32
    %50 = vector.broadcast %c0_i32_24 : i32 to vector<288x1xi32>
    %51 = arith.cmpi ne, %49, %50 : vector<288x1xi32>
    %c0_i32_25 = arith.constant 0 : i32
    %52 = vector.broadcast %c0_i32_25 : i32 to vector<288x1xi32>
    %53 = arith.cmpi slt, %49, %52 : vector<288x1xi32>
    %c0_i32_26 = arith.constant 0 : i32
    %54 = arith.cmpi slt, %47, %c0_i32_26 : i32
    %55 = vector.broadcast %54 : i1 to vector<288x1xi1>
    %56 = vector.broadcast %55 : vector<288x1xi1> to vector<288x1xi1>
    %57 = arith.xori %53, %56 : vector<288x1xi1>
    %58 = arith.andi %57, %51 : vector<288x1xi1>
    %59 = vector.broadcast %47 : i32 to vector<288x1xi32>
    %60 = arith.addi %49, %59 : vector<288x1xi32>
    %61 = arith.select %58, %60, %49 : vector<288x1xi1>, vector<288x1xi32>
    %c16_i32 = arith.constant 16 : i32
    %62 = vector.broadcast %c16_i32 : i32 to vector<288x1xi32>
    %63 = arith.cmpi slt, %61, %62 : vector<288x1xi32>
    %c288_i32_27 = arith.constant 288 : i32
    %64 = vector.broadcast %c288_i32_27 : i32 to vector<288x1xi32>
    %65 = arith.cmpi slt, %45, %64 : vector<288x1xi32>
    %66 = arith.andi %63, %65 : vector<288x1xi1>
    %cst_28 = arith.constant 0.000000e+00 : f32
    %67 = vector.shape_cast %66 : vector<288x1xi1> to vector<288x1xi1>
    %68 = vector.broadcast %67 : vector<288x1xi1> to vector<288x128xi1>
    %69 = vector.broadcast %cst_28 : f32 to vector<288x128xf32>
    %70 = arith.select %68, %41, %69 : vector<288x128xi1>, vector<288x128xf32>
    %cst_29 = arith.constant dense<0.000000e+00> : vector<128xf32>
    %71 = vector.multi_reduction <add>, %70, %cst_29 [0] : vector<288x128xf32> to vector<128xf32>
    %72 = vector.shape_cast %71 : vector<128xf32> to vector<1x128xf32>
    %73 = arith.mulf %70, %70 : vector<288x128xf32>
    %cst_30 = arith.constant dense<0.000000e+00> : vector<128xf32>
    %74 = vector.multi_reduction <add>, %73, %cst_30 [0] : vector<288x128xf32> to vector<128xf32>
    %75 = vector.shape_cast %74 : vector<128xf32> to vector<1x128xf32>
    %76 = tpu.concatenate %72, %75 in 0 : vector<1x128xf32>, vector<1x128xf32> -> vector<2x128xf32>
    %77 = vector.shape_cast %76 : vector<2x128xf32> to vector<1x2x128xf32>
    %c0_31 = arith.constant 0 : index
    %c0_32 = arith.constant 0 : index
    %c0_33 = arith.constant 0 : index
    %78 = vector.load %arg6[%c0_31, %c0_32, %c0_33] : memref<1x2x128xf32, #tpu.memory_space<vmem>>, vector<1x2x128xf32>
    tpu.vector_store %arg6[%c0_31, %c0_32, %c0_33], %77 {strides = array<i32>} : memref<1x2x128xf32, #tpu.memory_space<vmem>>, vector<1x2x128xf32>,
    %c0_34 = arith.constant 0 : index
    %c0_35 = arith.constant 0 : index
    %79 = vector.load %arg5[%c0_34, %c0_35] : memref<288x128xf32, #tpu.memory_space<vmem>>, vector<288x128xf32>
    tpu.vector_store %arg5[%c0_34, %c0_35], %41 {strides = array<i32>} : memref<288x128xf32, #tpu.memory_space<vmem>>, vector<288x128xf32>,
    return
  }
  func.func @transform_0(%arg0: i32, %arg1: i32) -> (i32, i32, i32) {
    %c0_i32 = arith.constant 0 : i32
    %c0_i32_0 = arith.constant 0 : i32
    return %arg0, %arg1, %c0_i32 : i32, i32, i32
  }
  func.func @transform_1(%arg0: i32, %arg1: i32) -> (i32, i32, i32) {
    %c1_i32 = arith.constant 1 : i32
    %0 = arith.addi %arg1, %c1_i32 : i32
    %c0_i32 = arith.constant 0 : i32
    %c0_i32_0 = arith.constant 0 : i32
    return %arg0, %0, %c0_i32 : i32, i32, i32
  }
  func.func @transform_2(%arg0: i32, %arg1: i32) -> (i32, i32) {
    %c0_i32 = arith.constant 0 : i32
    %c0_i32_0 = arith.constant 0 : i32
    %c0_i32_1 = arith.constant 0 : i32
    return %c0_i32, %c0_i32_0 : i32, i32
  }
  func.func @transform_3(%arg0: i32, %arg1: i32) -> (i32, i32) {
    %c1_i32 = arith.constant 1 : i32
    %0 = arith.muli %arg0, %c1_i32 : i32
    %1 = arith.addi %0, %arg1 : i32
    %c0_i32 = arith.constant 0 : i32
    %c0_i32_0 = arith.constant 0 : i32
    return %1, %c0_i32 : i32, i32
  }
  func.func @transform_4(%arg0: i32, %arg1: i32) -> (i32, i32, i32) {
    %c1_i32 = arith.constant 1 : i32
    %0 = arith.muli %arg0, %c1_i32 : i32
    %1 = arith.addi %0, %arg1 : i32
    %c0_i32 = arith.constant 0 : i32
    %c0_i32_0 = arith.constant 0 : i32
    %c0_i32_1 = arith.constant 0 : i32
    return %1, %c0_i32, %c0_i32_0 : i32, i32, i32
  }
}

</mosaic_0001>

<bundles_post_ra>
// kernel: conv_bn_act.3
= control target key start
LH: loop header
LB: loop body
LE: loop exit
PB: predicated region body
PF: predicated region fallthrough
CT: control target
= control target key end

     0   :  { %s435_s12 = smov 0   ;;  %s617_s0 = inlined_call_operand.vmem [shape: f32[576,128], index: 0, kind: input, shape index: {}, may-alias: {0,3}]   ;;  %s618_s1 = inlined_call_operand.vmem [shape: f32[1,128], index: 1, kind: input, shape index: {}]   ;;  %s619_s2 = inlined_call_operand.vmem [shape: f32[1,128], index: 2, kind: input, shape index: {}]   ;;  %s620_s3 = inlined_call_operand.vmem [shape: f32[576,128], index: 3, kind: output, shape index: {}, may-alias: {0,3}]  }
   0x1 LB: > { %s388_s13 = sadd.s32 4294967295, %s413_s12   ;;  %p392_p0 = scmp.ge.s32.totalorder %s413_s12, 1  ;;  %s413_s12 = sphi %s435_s12, %s13_s12  }
   0x2   : > { %p138_p1 = scmp.lt.s32.totalorder %s413_s12, 3 }
   0x4   : > { %p139_p2 = pnand %p392_p0, %p138_p1 }
   0x5   : > { %s162_s14 = smul.u32 (!%p139_p2), 36, %s388_s13  ;;  %v449_v0 = vld [vmem:[%s618_s1] ss:$0 sm:$0xff] (!%p139_p2) }
   0x6   : > { %142 = sbr.rel (%p139_p2) target bundleno = 46 (0x2e), region = 32  ;;  %v461_v1 = vld [vmem:[%s619_s2] ss:$0 sm:$0xff] (!%p139_p2) }
   0x7   : > { %p163_p3 = scmp.lt.s32.totalorder (!%p139_p2), %s162_s14, 71 }
   0xd   : > { %s622_s14 = smov (!%p163_p3, %s162_s14), 71 }
   0xe   : > { %s393_s15 = sshll.u32 %s622_s14, 3 }
   0xf   : > { %s456_s20 = scalar_lea.vmem %s617_s0, %s393_s15  ;;  %s525_s25 = scalar_lea.vmem %s620_s3, %s393_s15 }
  0x10   : > { %v174_v2 = vld [vmem:[%s456_s20] sm:$0xff]  ;;  %v175_v3 = vld [vmem:[%s456_s20 + $0x8] sm:$0xff]  ;;  %v176_v4 = vld [vmem:[%s456_s20 + $0x10] sm:$0xff] }
  0x11   : > { %v177_v5 = vld [vmem:[%s456_s20 + $0x18] sm:$0xff]  ;;  %v178_v6 = vld [vmem:[%s456_s20 + $0x20] sm:$0xff]  ;;  %v179_v7 = vld [vmem:[%s456_s20 + $0x28] sm:$0xff]  ;;  %v217_v8 = vmul.f32 %v449_v0, %v174_v2  ;;  %v218_v9 = vmul.f32 %v449_v0, %v175_v3  ;;  %v219_v10 = vmul.f32 %v449_v0, %v176_v4 }
  0x12   : > { %v180_v11 = vld [vmem:[%s456_s20 + $0x30] sm:$0xff]  ;;  %v181_v12 = vld [vmem:[%s456_s20 + $0x38] sm:$0xff]  ;;  %v182_v13 = vld [vmem:[%s456_s20 + $0x40] sm:$0xff]  ;;  %v220_v14 = vmul.f32 %v449_v0, %v177_v5  ;;  %v221_v15 = vmul.f32 %v449_v0, %v178_v6  ;;  %v222_v16 = vmul.f32 %v449_v0, %v179_v7 }
  0x13   : > { %v183_v17 = vld [vmem:[%s456_s20 + $0x48] sm:$0xff]  ;;  %v184_v18 = vld [vmem:[%s456_s20 + $0x50] sm:$0xff]  ;;  %v185_v19 = vld [vmem:[%s456_s20 + $0x58] sm:$0xff]  ;;  %v260_v20 = vadd.f32 %v461_v1, %v217_v8  ;;  %v261_v21 = vadd.f32 %v461_v1, %v218_v9  ;;  %v262_v22 = vadd.f32 %v461_v1, %v219_v10  ;;  %v223_v23 = vmul.f32 %v449_v0, %v180_v11 }
  0x14   : > { %v186_v24 = vld [vmem:[%s456_s20 + $0x60] sm:$0xff]  ;;  %v187_v25 = vld [vmem:[%s456_s20 + $0x68] sm:$0xff]  ;;  %v188_v26 = vld [vmem:[%s456_s20 + $0x70] sm:$0xff]  ;;  %v263_v27 = vadd.f32 %v461_v1, %v220_v14  ;;  %v264_v28 = vadd.f32 %v461_v1, %v221_v15  ;;  %v265_v29 = vadd.f32 %v461_v1, %v222_v16  ;;  %v224_v30 = vmul.f32 %v449_v0, %v181_v12 }
  0x15   : > { %v189_v31 = vld [vmem:[%s456_s20 + $0x78] sm:$0xff]  ;;  %v190_v32 = vld [vmem:[%s456_s20 + $0x80] sm:$0xff]  ;;  %v191_v33 = vld [vmem:[%s456_s20 + $0x88] sm:$0xff]  ;;  %v266_v34 = vadd.f32 %v461_v1, %v223_v23  ;;  %v225_v35 = vmul.f32 %v449_v0, %v182_v13  ;;  %v226_v36 = vmul.f32 %v449_v0, %v183_v17  ;;  %v227_v37 = vmul.f32 %v449_v0, %v184_v18 }
  0x16   : > { %v192_v38 = vld [vmem:[%s456_s20 + $0x90] sm:$0xff]  ;;  %v193_v39 = vld [vmem:[%s456_s20 + $0x98] sm:$0xff]  ;;  %v194_v40 = vld [vmem:[%s456_s20 + $0xa0] sm:$0xff]  ;;  %v267_v41 = vadd.f32 %v461_v1, %v224_v30  ;;  %v228_v42 = vmul.f32 %v449_v0, %v185_v19  ;;  %v229_v43 = vmul.f32 %v449_v0, %v186_v24  ;;  %v230_v44 = vmul.f32 %v449_v0, %v187_v25 }
  0x17   : > { %v195_v45 = vld [vmem:[%s456_s20 + $0xa8] sm:$0xff]  ;;  %v196_v46 = vld [vmem:[%s456_s20 + $0xb0] sm:$0xff]  ;;  %v197_v47 = vld [vmem:[%s456_s20 + $0xb8] sm:$0xff]  ;;  %v268_v48 = vadd.f32 %v461_v1, %v225_v35  ;;  %v269_v49 = vadd.f32 %v461_v1, %v226_v36  ;;  %v270_v50 = vadd.f32 %v461_v1, %v227_v37  ;;  %v231_v51 = vmul.f32 %v449_v0, %v188_v26 }
  0x18   : > { %v198_v52 = vld [vmem:[%s456_s20 + $0xc0] sm:$0xff]  ;;  %v199_v53 = vld [vmem:[%s456_s20 + $0xc8] sm:$0xff]  ;;  %v200_v54 = vld [vmem:[%s456_s20 + $0xd0] sm:$0xff]  ;;  %v271_v55 = vadd.f32 %v461_v1, %v228_v42  ;;  %v272_v56 = vadd.f32 %v461_v1, %v229_v43  ;;  %v273_v57 = vadd.f32 %v461_v1, %v230_v44  ;;  %v232_v58 = vmul.f32 %v449_v0, %v189_v31 }
  0x19   : > { %v201_v59 = vld [vmem:[%s456_s20 + $0xd8] sm:$0xff]  ;;  %v202_v60 = vld [vmem:[%s456_s20 + $0xe0] sm:$0xff]  ;;  %v203_v61 = vld [vmem:[%s456_s20 + $0xe8] sm:$0xff]  ;;  %v274_v62 = vadd.f32 %v461_v1, %v231_v51  ;;  %v233_v63 = vmul.f32 %v449_v0, %v190_v32  ;;  %v234_v2 = vmul.f32 %v449_v0, %v191_v33  ;;  %v235_v3 = vmul.f32 %v449_v0, %v192_v38 }
  0x1a   : > { %v204_v4 = vld [vmem:[%s456_s20 + $0xf0] sm:$0xff]  ;;  %v205_v5 = vld [vmem:[%s456_s20 + $0xf8] sm:$0xff]  ;;  %v206_v6 = vld [vmem:[%s456_s20 + $0x100] sm:$0xff]  ;;  %v275_v7 = vadd.f32 %v461_v1, %v232_v58  ;;  %v236_v8 = vmul.f32 %v449_v0, %v193_v39  ;;  %v237_v9 = vmul.f32 %v449_v0, %v194_v40  ;;  %v238_v10 = vmul.f32 %v449_v0, %v195_v45 }
  0x1b   : > { %v207_v11 = vld [vmem:[%s456_s20 + $0x108] sm:$0xff]  ;;  %v208_v12 = vld [vmem:[%s456_s20 + $0x110] sm:$0xff]  ;;  %v209_v13 = vld [vmem:[%s456_s20 + $0x118] sm:$0xff]  ;;  %v276_v14 = vadd.f32 %v461_v1, %v233_v63  ;;  %v277_v15 = vadd.f32 %v461_v1, %v234_v2  ;;  %v278_v16 = vadd.f32 %v461_v1, %v235_v3  ;;  %v239_v17 = vmul.f32 %v449_v0, %v196_v46 }
  0x1c   : > { %296 = vst [vmem:[%s525_s25] sm:$0xff] %v260_v20  ;;  %297 = vst [vmem:[%s525_s25 + $0x8] sm:$0xff] %v261_v21  ;;  %v279_v18 = vadd.f32 %v461_v1, %v236_v8  ;;  %v280_v19 = vadd.f32 %v461_v1, %v237_v9  ;;  %v281_v20 = vadd.f32 %v461_v1, %v238_v10 }
  0x1d   : > { %298 = vst [vmem:[%s525_s25 + $0x10] sm:$0xff] %v262_v22  ;;  %299 = vst [vmem:[%s525_s25 + $0x18] sm:$0xff] %v263_v27  ;;  %v240_v21 = vmul.f32 %v449_v0, %v197_v47  ;;  %v282_v22 = vadd.f32 %v461_v1, %v239_v17  ;;  %v241_v23 = vmul.f32 %v449_v0, %v198_v52 }
  0x1e   : > { %300 = vst [vmem:[%s525_s25 + $0x20] sm:$0xff] %v264_v28  ;;  %301 = vst [vmem:[%s525_s25 + $0x28] sm:$0xff] %v265_v29  ;;  %v242_v24 = vmul.f32 %v449_v0, %v199_v53  ;;  %v243_v25 = vmul.f32 %v449_v0, %v200_v54  ;;  %v244_v27 = vmul.f32 %v449_v0, %v201_v59 }
  0x1f   : > { %302 = vst [vmem:[%s525_s25 + $0x30] sm:$0xff] %v266_v34  ;;  %303 = vst [vmem:[%s525_s25 + $0x38] sm:$0xff] %v267_v41  ;;  %v283_v26 = vadd.f32 %v461_v1, %v240_v21  ;;  %v245_v28 = vmul.f32 %v449_v0, %v202_v60  ;;  %v246_v29 = vmul.f32 %v449_v0, %v203_v61 }
  0x20   : > { %304 = vst [vmem:[%s525_s25 + $0x40] sm:$0xff] %v268_v48  ;;  %305 = vst [vmem:[%s525_s25 + $0x48] sm:$0xff] %v269_v49  ;;  %v284_v30 = vadd.f32 %v461_v1, %v241_v23  ;;  %v285_v31 = vadd.f32 %v461_v1, %v242_v24  ;;  %v286_v32 = vadd.f32 %v461_v1, %v243_v25 }
  0x21   : > { %306 = vst [vmem:[%s525_s25 + $0x50] sm:$0xff] %v270_v50  ;;  %307 = vst [vmem:[%s525_s25 + $0x58] sm:$0xff] %v271_v55  ;;  %v247_v33 = vmul.f32 %v449_v0, %v204_v4  ;;  %v287_v34 = vadd.f32 %v461_v1, %v244_v27  ;;  %v288_v35 = vadd.f32 %v461_v1, %v245_v28 }
  0x22   : > { %308 = vst [vmem:[%s525_s25 + $0x60] sm:$0xff] %v272_v56  ;;  %309 = vst [vmem:[%s525_s25 + $0x68] sm:$0xff] %v273_v57  ;;  %v289_v36 = vadd.f32 %v461_v1, %v246_v29  ;;  %v248_v37 = vmul.f32 %v449_v0, %v205_v5  ;;  %v249_v39 = vmul.f32 %v449_v0, %v206_v6 }
  0x23   : > { %310 = vst [vmem:[%s525_s25 + $0x70] sm:$0xff] %v274_v62  ;;  %311 = vst [vmem:[%s525_s25 + $0x78] sm:$0xff] %v275_v7  ;;  %v290_v38 = vadd.f32 %v461_v1, %v247_v33  ;;  %v250_v40 = vmul.f32 %v449_v0, %v207_v11  ;;  %v251_v41 = vmul.f32 %v449_v0, %v208_v12 }
  0x24   : > { %312 = vst [vmem:[%s525_s25 + $0x80] sm:$0xff] %v276_v14  ;;  %313 = vst [vmem:[%s525_s25 + $0x88] sm:$0xff] %v277_v15  ;;  %v291_v42 = vadd.f32 %v461_v1, %v248_v37  ;;  %v252_v43 = vmul.f32 %v449_v0, %v209_v13  ;;  %v292_v44 = vadd.f32 %v461_v1, %v249_v39 }
  0x25   : > { %314 = vst [vmem:[%s525_s25 + $0x90] sm:$0xff] %v278_v16  ;;  %315 = vst [vmem:[%s525_s25 + $0x98] sm:$0xff] %v279_v18  ;;  %v293_v45 = vadd.f32 %v461_v1, %v250_v40  ;;  %v294_v46 = vadd.f32 %v461_v1, %v251_v41 }
  0x26   : > { %316 = vst [vmem:[%s525_s25 + $0xa0] sm:$0xff] %v280_v19  ;;  %317 = vst [vmem:[%s525_s25 + $0xa8] sm:$0xff] %v281_v20  ;;  %v295_v47 = vadd.f32 %v461_v1, %v252_v43 }
  0x27   : > { %318 = vst [vmem:[%s525_s25 + $0xb0] sm:$0xff] %v282_v22  ;;  %319 = vst [vmem:[%s525_s25 + $0xb8] sm:$0xff] %v283_v26 }
  0x28   : > { %320 = vst [vmem:[%s525_s25 + $0xc0] sm:$0xff] %v284_v30  ;;  %321 = vst [vmem:[%s525_s25 + $0xc8] sm:$0xff] %v285_v31 }
  0x29   : > { %322 = vst [vmem:[%s525_s25 + $0xd0] sm:$0xff] %v286_v32  ;;  %323 = vst [vmem:[%s525_s25 + $0xd8] sm:$0xff] %v287_v34 }
  0x2a   : > { %324 = vst [vmem:[%s525_s25 + $0xe0] sm:$0xff] %v288_v35  ;;  %325 = vst [vmem:[%s525_s25 + $0xe8] sm:$0xff] %v289_v36 }
  0x2b   : > { %326 = vst [vmem:[%s525_s25 + $0xf0] sm:$0xff] %v290_v38  ;;  %327 = vst [vmem:[%s525_s25 + $0xf8] sm:$0xff] %v291_v42 }
  0x2c   : > { %328 = vst [vmem:[%s525_s25 + $0x100] sm:$0xff] %v292_v44  ;;  %329 = vst [vmem:[%s525_s25 + $0x108] sm:$0xff] %v293_v45 }
  0x2d   : > { %330 = vst [vmem:[%s525_s25 + $0x110] sm:$0xff] %v294_v46  ;;  %331 = vst [vmem:[%s525_s25 + $0x118] sm:$0xff] %v295_v47 }
  0x2e PF: > { %s13_s12 = sadd.s32 1, %s413_s12  }
  0x2f   : > { %p10_p4 = scmp.ge.s32.totalorder %s13_s12, 4  }
  0x31   :  { %12 = sbr.rel (!%p10_p4) target bundleno = 1 (0x1), region = 62 }

// kernel: conv_bn_act.2
= control target key start
LH: loop header
LB: loop body
LE: loop exit
PB: predicated region body
PF: predicated region fallthrough
CT: control target
= control target key end

     0   :  { %s6636_s15 = smov 0   ;;  %s6638_s16 = smov 0   ;;  %s9373_s0 = inlined_call_operand.vmem [shape: f32[2,576,4], index: 0, kind: input, shape index: {}, may-alias: {0,1}]   ;;  %s9374_s1 = inlined_call_operand.vmem [shape: f32[2,576,4], index: 1, kind: input, shape index: {}, may-alias: {0,1}]   ;;  %s9375_s2 = inlined_call_operand.vmem [shape: f32[36,128], index: 2, kind: input, shape index: {}]   ;;  %s9376_s3 = inlined_call_operand.vmem [shape: f32[576,128], index: 3, kind: output, shape index: {0}]   ;;  %s9377_s4 = inlined_call_operand.vmem [shape: f32[2,2,128], index: 4, kind: output, shape index: {1}]  }
   0x1   :  { %s6640_s17 = smov 0  }
   0x2 LB: > { %s27_s18 = sadd.s32 1, %s6605_s16  ;;  %p4985_p0 = scmp.ge.s32.totalorder %s6609_s17, 1  ;;  %s6609_s17 = sphi %s6640_s17, %s15_s17   ;;  %s6605_s16 = sphi %s6638_s16, %s9772_s16   ;;  %s6601_s15 = sphi %s6636_s15, %s9771_s15  }
   0x3   : > { %p29_p1 = scmp.ge.s32.totalorder %s27_s18, 2  ;;  %p209_p2 = scmp.lt.s32.totalorder %s6609_s17, 3 }
   0x5   : > { %s9774_s18 = smov (%p29_p1, %s27_s18), 0  ;;  %p210_p3 = pnand %p4985_p0, %p209_p2 }
   0x7   : > { %213 = sbr.rel (%p210_p3) target bundleno = 596 (0x254), region = 32 }
   0xe   : > { %v333_v0 = vld [vmem:[%s9375_s2 + $0x4] sm:$0xf]  ;;  %vm518_vm0 = vcmask 1043456   ;;  %v6662_v1 = vld [vmem:[%s9375_s2 + $0x10] sm:$0xf]  ;;  %p256_p4 = scmp.lt.s32.totalorder %s6601_s15, 1 }
   0xf   : > { %9442 = vst [vmem:[#allocation2_spill] sm:$0xff] %v6662_v1  ;;  %5660 = vmatprep.subr.msk.mxu1 %vm518_vm0, %v333_v0  ;;  %5884 = vmatprep.subr.msk.mxu0 %vm518_vm0, %v6662_v1  ;;  %v332_v2 = vld [vmem:[%s9375_s2] sm:$0xf]  ;;  %v2244_v3 = vld [vmem:[%s9375_s2 + $0x14] sm:$0xf]  ;;  %vm371_vm1 = vcmask 1046528  }
  0x10   : > { %5661 = vmatpush3.msk.msra.mxu1 %vm518_vm0, %v333_v0  ;;  %5885 = vmatpush3.msk.msra.mxu0 %vm518_vm0, %v6662_v1  ;;  %s6675_s25 = scalar_select %p256_p4, %s6601_s15, 1  ;;  %vm445_vm2 = vcmask 31744   ;;  %vm1814_vm3 = vcmask 1044480   ;;  %v6748_v34 = vld [vmem:[%s9375_s2 + $0x18] sm:$0xf]  ;;  %vm1088_vm4 = vcmask 1045504  }
  0x11   : > { %5716 = vmatprep.subr.msk.mxu1 %vm518_vm0, %v332_v2  ;;  %5940 = vmatprep.subr.msk.mxu0 %vm518_vm0, %v2244_v3  ;;  %v6765_v42 = vld [vmem:[%s9375_s2 + $0x8] sm:$0xf]  ;;  %vm2970_vm5 = vcmask 1042432   ;;  %vm3401_vm6 = vcmask 1041408   ;;  %s278_s27 = smul.u32 36, %s6601_s15 }
  0x12   : > { %s6454_s28 = smul.u32 576, %s6675_s25  ;;  %s4989_s6 = sshll.u32 %s6675_s25, 1 }
  0x13   : > { %p8460_p5 = scmp.lt.s32.totalorder %s278_s27, 71  ;;  %s289_s9 = scalar_lea.vmem %s9377_s4, %s4989_s6 }
  0x14   : > { %s6688_s5 = scalar_lea.vmem %s9373_s0, %s6454_s28  ;;  %s5326_s12 = sadd.s32 288, %s6454_s28 }
  0x15   : > { %v6691_v4 = vld [vmem:[%s6688_s5] sm:$0xff]  ;;  %v6694_v5 = vld [vmem:[%s6688_s5 + $0x8] sm:$0xff]  ;;  %v6697_v6 = vld [vmem:[%s6688_s5 + $0x10] sm:$0xff]  ;;  %s7050_s19 = scalar_lea.vmem %s9374_s1, %s5326_s12  ;;  %s9776_s27 = smov (!%p8460_p5, %s278_s27), 71 }
  0x16   : > { %v372_v7 = vrot.slane %v6691_v4, 1  ;;  %v373_v8 = vrot.slane %v6694_v5, 1  ;;  %v6702_v9 = vld [vmem:[%s6688_s5 + $0x18] sm:$0xff]  ;;  %v1815_v10 = vrot.slane %v6697_v6, 3  ;;  %v375_v11 = vrot.slane %v6697_v6, 1  ;;  %v6707_v12 = vld [vmem:[%s6688_s5 + $0x20] sm:$0xff] }
  0x17   : > { %v1816_v13 = vrot.slane %v6702_v9, 3  ;;  %v1818_v14 = vrot.slane %v6707_v12, 3  ;;  %v377_v15 = vrot.slane %v6702_v9, 1  ;;  %v6713_v16 = vld [vmem:[%s6688_s5 + $0x28] sm:$0xff]  ;;  %v379_v17 = vrot.slane %v6707_v12, 1  ;;  %v6717_v18 = vld [vmem:[%s6688_s5 + $0x30] sm:$0xff] }
  0x18   : > { %v374_v19 = vsel %vm371_vm1, %v372_v7, %v373_v8  ;;  %v376_v20 = vsel %vm371_vm1, %v373_v8, %v375_v11  ;;  %v1820_v21 = vrot.slane %v6713_v16, 3  ;;  %v1822_v22 = vrot.slane %v6717_v18, 3  ;;  %v6724_v23 = vld [vmem:[%s6688_s5 + $0x38] sm:$0xff]  ;;  %v6731_v27 = vld [vmem:[%s6688_s5 + $0x40] sm:$0xff]  ;;  %v6739_v31 = vld [vmem:[%s6688_s5 + $0x48] sm:$0xff]  ;;  %s4988_s15 = sshll.u32 %s9776_s27, 3 }
  0x19   : > { %5662 = vmatprep.mubr.msk.f32.mxu1 %vm445_vm2, %v374_v19  ;;  %v1817_v24 = vsel %vm1814_vm3, %v1815_v10, %v1816_v13  ;;  %v1819_v25 = vsel %vm1814_vm3, %v1816_v13, %v1818_v14  ;;  %v378_v26 = vsel %vm371_vm1, %v375_v11, %v377_v15  ;;  %v381_v29 = vrot.slane %v6713_v16, 1  ;;  %v6760_v41 = vld [vmem:[%s6688_s5 + $0x50] sm:$0xff]  ;;  %v6769_v43 = vld [vmem:[%s6688_s5 + $0x58] sm:$0xff]  ;;  %v6787_v52 = vld [vmem:[%s6688_s5 + $0x60] sm:$0xff] }
  0x1a   : > { %5886 = vmatprep.mubr.msk.f32.mxu0 %vm445_vm2, %v1817_v24  ;;  %5663 = vmatmul.mubr.msk.f32.vlgmr.msra.gmra.mrb[0].mxu1 %vm445_vm2, %v376_v20  ;;  %v1821_v28 = vsel %vm1814_vm3, %v1818_v14, %v1820_v21  ;;  %v1824_v30 = vrot.slane %v6724_v23, 3  ;;  %v380_v32 = vsel %vm371_vm1, %v377_v15, %v379_v17  ;;  %v383_v33 = vrot.slane %v6717_v18, 1  ;;  %9443 = vst [vmem:[#allocation3_spill] sm:$0xff] %v6760_v41  ;;  %v6791_v53 = vld [vmem:[%s6688_s5 + $0x68] sm:$0xff]  ;;  %v6805_v62 = vld [vmem:[%s6688_s5 + $0x70] sm:$0xff]  ;;  %v6809_v63 = vld [vmem:[%s6688_s5 + $0x78] sm:$0xff] }
  0x1b   : > { %5717 = vmatpush3.msk.msra.mxu1 %vm518_vm0, %v332_v2  ;;  %5887 = vmatmul.mubr.msk.f32.vlgmr.msra.gmra.mrb[0].mxu0 %vm445_vm2, %v1819_v25  ;;  %v1823_v35 = vsel %vm1814_vm3, %v1820_v21, %v1822_v22  ;;  %v382_v36 = vsel %vm371_vm1, %v379_v17, %v381_v29  ;;  %v1826_v37 = vrot.slane %v6731_v27, 3  ;;  %v385_v38 = vrot.slane %v6724_v23, 1  ;;  %9444 = vst [vmem:[#allocation4_spill] sm:$0xff] %v6769_v43  ;;  %v6823_v14 = vld [vmem:[%s6688_s5 + $0x80] sm:$0xff]  ;;  %v6827_v15 = vld [vmem:[%s6688_s5 + $0x88] sm:$0xff] }
  0x1c   : > { %5941 = vmatpush3.msk.msra.mxu0 %vm518_vm0, %v2244_v3  ;;  %5665 = vmatprep.mubr.msk.f32.mxu1 %vm445_vm2, %v378_v26  ;;  %v1825_v39 = vsel %vm1814_vm3, %v1822_v22, %v1824_v30  ;;  %v1828_v40 = vrot.slane %v6739_v31, 3  ;;  %v384_v44 = vsel %vm371_vm1, %v381_v29, %v383_v33  ;;  %v387_v45 = vrot.slane %v6731_v27, 1  ;;  %v6845_v29 = vld [vmem:[%s6688_s5 + $0x98] sm:$0xff] }
  0x1d   : > { %5889 = vmatprep.mubr.msk.f32.mxu0 %vm445_vm2, %v1821_v28  ;;  %5996 = vmatprep.subr.msk.mxu0 %vm518_vm0, %v6748_v34  ;;  %v1827_v46 = vsel %vm1814_vm3, %v1824_v30, %v1826_v37  ;;  %v386_v47 = vsel %vm371_vm1, %v383_v33, %v385_v38  ;;  %v1830_v48 = vrot.slane %v6760_v41, 3  ;;  %v389_v49 = vrot.slane %v6739_v31, 1  ;;  %v6841_v28 = vld [vmem:[%s6688_s5 + $0x90] sm:$0xff] }
  0x1e   : > { %5666 = vmatmul.mubr.msk.f32.gmra.mrb[2].mxu1 %vm445_vm2, %v380_v32  ;;  %5772 = vmatprep.subr.msk.mxu1 %vm518_vm0, %v6765_v42  ;;  %v1829_v50 = vsel %vm1814_vm3, %v1826_v37, %v1828_v40  ;;  %v1832_v51 = vrot.slane %v6769_v43, 3  ;;  %v388_v54 = vsel %vm371_vm1, %v385_v38, %v387_v45  ;;  %v391_v55 = vrot.slane %v6760_v41, 1 }
  0x1f   : > { %5890 = vmatmul.mubr.msk.f32.gmra.mrb[2].mxu0 %vm445_vm2, %v1823_v35  ;;  %5668 = vmatprep.mubr.msk.f32.mxu1 %vm445_vm2, %v382_v36  ;;  %v1831_v56 = vsel %vm1814_vm3, %v1828_v40, %v1830_v48  ;;  %v390_v57 = vsel %vm371_vm1, %v387_v45, %v389_v49  ;;  %v1834_v58 = vrot.slane %v6787_v52, 3  ;;  %v393_v59 = vrot.slane %v6769_v43, 1  ;;  %v6859_v40 = vld [vmem:[%s6688_s5 + $0xa0] sm:$0xff] }
  0x20   : > { %5892 = vmatprep.mubr.msk.f32.mxu0 %vm445_vm2, %v1825_v39  ;;  %v1833_v60 = vsel %vm1814_vm3, %v1830_v48, %v1832_v51  ;;  %v1836_v61 = vrot.slane %v6791_v53, 3  ;;  %v392_v0 = vsel %vm371_vm1, %v389_v49, %v391_v55  ;;  %v395_v2 = vrot.slane %v6787_v52, 1 }
  0x21   : > { %v1835_v3 = vsel %vm1814_vm3, %v1832_v51, %v1834_v58  ;;  %v394_v7 = vsel %vm371_vm1, %v391_v55, %v393_v59  ;;  %v1838_v8 = vrot.slane %v6805_v62, 3  ;;  %v397_v10 = vrot.slane %v6791_v53, 1  ;;  %v6875_v55 = vld [vmem:[%s6688_s5 + $0xa8] sm:$0xff] }
  0x22   : > { %5669 = vmatmul.mubr.msk.f32.gmra.mrb[4].mxu1 %vm445_vm2, %v384_v44  ;;  %v1837_v11 = vsel %vm1814_vm3, %v1834_v58, %v1836_v61  ;;  %v1840_v13 = vrot.slane %v6809_v63, 3  ;;  %v396_v17 = vsel %vm371_vm1, %v393_v59, %v395_v2  ;;  %v399_v19 = vrot.slane %v6805_v62, 1 }
  0x23   : > { %5893 = vmatmul.mubr.msk.f32.gmra.mrb[4].mxu0 %vm445_vm2, %v1827_v46  ;;  %5671 = vmatprep.mubr.msk.f32.mxu1 %vm445_vm2, %v386_v47  ;;  %v1839_v20 = vsel %vm1814_vm3, %v1836_v61, %v1838_v8  ;;  %v398_v21 = vsel %vm371_vm1, %v395_v2, %v397_v10  ;;  %v1842_v22 = vrot.slane %v6823_v14, 3  ;;  %v401_v24 = vrot.slane %v6809_v63, 1 }
  0x24   : > { %5895 = vmatprep.mubr.msk.f32.mxu0 %vm445_vm2, %v1829_v50  ;;  %v1841_v25 = vsel %vm1814_vm3, %v1838_v8, %v1840_v13  ;;  %v1844_v26 = vrot.slane %v6827_v15, 3  ;;  %v400_v30 = vsel %vm371_vm1, %v397_v10, %v399_v19  ;;  %v403_v32 = vrot.slane %v6823_v14, 1 }
  0x25   : > { %v1843_v33 = vsel %vm1814_vm3, %v1840_v13, %v1842_v22  ;;  %v402_v35 = vsel %vm371_vm1, %v399_v19, %v401_v24  ;;  %v1846_v36 = vrot.slane %v6841_v28, 3  ;;  %v405_v37 = vrot.slane %v6827_v15, 1 }
  0x26   : > { %5672 = vmatmul.mubr.msk.f32.gmra.mrb[6].mxu1 %vm445_vm2, %v388_v54  ;;  %v1845_v38 = vsel %vm1814_vm3, %v1842_v22, %v1844_v26  ;;  %v1848_v39 = vrot.slane %v6845_v29, 3  ;;  %v404_v44 = vsel %vm371_vm1, %v401_v24, %v403_v32  ;;  %v407_v45 = vrot.slane %v6841_v28, 1  ;;  %v6915_v24 = vld [vmem:[%s6688_s5 + $0xc8] sm:$0xff] }
  0x27   : > { %5896 = vmatmul.mubr.msk.f32.gmra.mrb[6].mxu0 %vm445_vm2, %v1831_v56  ;;  %5674 = vmatprep.mubr.msk.f32.mxu1 %vm445_vm2, %v390_v57  ;;  %v1847_v46 = vsel %vm1814_vm3, %v1844_v26, %v1846_v36  ;;  %v406_v47 = vsel %vm371_vm1, %v403_v32, %v405_v37  ;;  %v9378_v48 = vrot.slane %v6859_v40, 3  ;;  %v409_v49 = vrot.slane %v6845_v29, 1 }
  0x28   : > { %5898 = vmatprep.mubr.msk.f32.mxu0 %vm445_vm2, %v1833_v60  ;;  %v1849_v50 = vsel %vm1814_vm3, %v1846_v36, %v1848_v39  ;;  %v2245_v51 = vrot.slane %v6697_v6, 4  ;;  %v2246_v54 = vrot.slane %v6702_v9, 4  ;;  %v408_v56 = vsel %vm371_vm1, %v405_v37, %v407_v45  ;;  %v6938_v37 = vld [vmem:[%s6688_s5 + $0xd0] sm:$0xff] }
  0x29   : > { %v411_v57 = vrot.slane %v6859_v40, 1  ;;  %v1851_v58 = vsel %vm1814_vm3, %v1848_v39, %v9378_v48  ;;  %v410_v59 = vsel %vm371_vm1, %v407_v45, %v409_v49  ;;  %v2248_v60 = vrot.slane %v6707_v12, 4  ;;  %v6945_v39 = vld [vmem:[%s6688_s5 + $0xd8] sm:$0xff]  ;;  %v7067_v48 = vld [vmem:[%s7050_s19] sm:$0xff] }
  0x2a   : > { %5675 = vmatmul.mubr.msk.f32.gmra.mrb[8].mxu1 %vm445_vm2, %v392_v0  ;;  %v413_v61 = vrot.slane %v6875_v55, 1  ;;  %v6890_v0 = vld [vmem:[%s6688_s5 + $0xb0] sm:$0xff]  ;;  %v2247_v2 = vsel %vm518_vm0, %v2245_v51, %v2246_v54  ;;  %v2254_v22 = vrot.slane %v6724_v23, 4  ;;  %v421_v36 = vrot.slane %v6915_v24, 1  ;;  %v6964_v51 = vld [vmem:[%s6688_s5 + $0xe0] sm:$0xff] }
  0x2b   : > { %5899 = vmatmul.mubr.msk.f32.gmra.mrb[8].mxu0 %vm445_vm2, %v1835_v3  ;;  %5677 = vmatprep.mubr.msk.f32.mxu1 %vm445_vm2, %v394_v7  ;;  %v2250_v3 = vrot.slane %v6713_v16, 4  ;;  %v6895_v7 = vld [vmem:[%s6688_s5 + $0xb8] sm:$0xff]  ;;  %v412_v8 = vsel %vm371_vm1, %v409_v49, %v411_v57  ;;  %v415_v10 = vrot.slane %v6890_v0, 1  ;;  %v423_v45 = vrot.slane %v6938_v37, 1 }
  0x2c   : > { %5901 = vmatprep.mubr.msk.f32.mxu0 %vm445_vm2, %v1837_v11  ;;  %v2249_v11 = vsel %vm518_vm0, %v2246_v54, %v2248_v60  ;;  %v414_v13 = vsel %vm371_vm1, %v411_v57, %v413_v61  ;;  %v417_v19 = vrot.slane %v6895_v7, 1  ;;  %v2260_v49 = vrot.slane %v6760_v41, 4  ;;  %v6971_v57 = vld [vmem:[%s6688_s5 + $0xe8] sm:$0xff] }
  0x2d   : > { %v416_v26 = vsel %vm371_vm1, %v413_v61, %v415_v10 }
  0x2e   : > { %5678 = vmatmul.mubr.msk.f32.gmra.mrb[10].mxu1 %vm445_vm2, %v396_v17  ;;  %v2252_v17 = vrot.slane %v6717_v18, 4 }
  0x2f   : > { %5902 = vmatmul.mubr.msk.f32.gmra.mrb[10].mxu0 %vm445_vm2, %v1839_v20  ;;  %5680 = vmatprep.mubr.msk.f32.mxu1 %vm445_vm2, %v398_v21  ;;  %v6908_v20 = vld [vmem:[%s6688_s5 + $0xc0] sm:$0xff]  ;;  %v6911_v21 = vsel %vm518_vm0, %v2248_v60, %v2250_v3 }
  0x30   : > { %5904 = vmatprep.mubr.msk.f32.mxu0 %vm445_vm2, %v1841_v25  ;;  %v6921_v25 = vld [vmem:[%s9375_s2 + $0x1c] sm:$0xf]  ;;  %v6932_v32 = vsel %vm518_vm0, %v2250_v3, %v2252_v17  ;;  %v429_v3 = vrot.slane %v6971_v57, 1 }
  0x32   : > { %5681 = vmatmul.mubr.msk.f32.gmra.mrb[12].mxu1 %vm445_vm2, %v400_v30  ;;  %v419_v30 = vrot.slane %v6908_v20, 1 }
  0x33   : > { %5905 = vmatmul.mubr.msk.f32.gmra.mrb[12].mxu0 %vm445_vm2, %v1843_v33  ;;  %5683 = vmatprep.mubr.msk.f32.mxu1 %vm445_vm2, %v402_v35  ;;  %v418_v33 = vsel %vm371_vm1, %v415_v10, %v417_v19  ;;  %v2256_v35 = vrot.slane %v6731_v27, 4 }
  0x34   : > { %5907 = vmatprep.mubr.msk.f32.mxu0 %vm445_vm2, %v1845_v38  ;;  %v6941_v38 = vsel %vm518_vm0, %v2252_v17, %v2254_v22 }
  0x36   : > { %5684 = vmatmul.mubr.msk.f32.gmra.mrb[14].mxu1 %vm445_vm2, %v404_v44  ;;  %v420_v44 = vsel %vm371_vm1, %v417_v19, %v419_v30 }
  0x37   : > { %5908 = vmatmul.mubr.msk.f32.gmra.mrb[14].mxu0 %vm445_vm2, %v1847_v46  ;;  %5686 = vmatprep.mubr.msk.f32.mxu1 %vm445_vm2, %v406_v47  ;;  %v6958_v46 = vsel %vm518_vm0, %v2254_v22, %v2256_v35  ;;  %v422_v47 = vsel %vm371_vm1, %v419_v30, %v421_v36  ;;  %v2268_v30 = vrot.slane %v6805_v62, 4 }
  0x38   : > { %5910 = vmatprep.mubr.msk.f32.mxu0 %vm445_vm2, %v1849_v50  ;;  %v425_v50 = vrot.slane %v6945_v39, 1 }
  0x3a   : > { %5687 = vmatmul.mubr.msk.f32.gmra.mrb[16].mxu1 %vm445_vm2, %v408_v56  ;;  %v2262_v56 = vrot.slane %v6769_v43, 4  ;;  %v426_v61 = vsel %vm371_vm1, %v423_v45, %v425_v50 }
  0x3b   : > { %5911 = vmatmul.mubr.msk.f32.gmra.mrb[16].mxu0 %vm445_vm2, %v1851_v58  ;;  %5689 = vmatprep.mubr.msk.f32.mxu1 %vm445_vm2, %v410_v59  ;;  %v424_v58 = vsel %vm371_vm1, %v421_v36, %v423_v45  ;;  %v427_v59 = vrot.slane %v6964_v51, 1 }
  0x3c   : > { %5942 = vmatprep.mubr.msk.f32.mxu0 %vm445_vm2, %v2247_v2  ;;  %v2264_v2 = vrot.slane %v6787_v52, 4  ;;  %v6991_v10 = vsel %vm518_vm0, %v2260_v49, %v2262_v56 }
  0x3d   : > { %v428_v17 = vsel %vm371_vm1, %v425_v50, %v427_v59 }
  0x3e   : > { %5690 = vmatmul.mubr.msk.f32.gmra.mrb[18].mxu1 %vm445_vm2, %v412_v8  ;;  %v6988_v8 = vld [vmem:[%s6688_s5 + $0xf0] sm:$0xff]  ;;  %v7006_v22 = vsel %vm518_vm0, %v2262_v56, %v2264_v2  ;;  %v2272_v56 = vrot.slane %v6823_v14, 4 }
  0x3f   : > { %5943 = vmatmul.mubr.msk.f32.vlgmr.msra.gmra.mrb[0].mxu0 %vm445_vm2, %v2249_v11  ;;  %5692 = vmatprep.mubr.msk.f32.mxu1 %vm445_vm2, %v414_v13  ;;  %v2266_v11 = vrot.slane %v6791_v53, 4  ;;  %v6995_v13 = vld [vmem:[%s6688_s5 + $0xf8] sm:$0xff]  ;;  %v431_v19 = vrot.slane %v6988_v8, 1 }
  0x40   : > { %5997 = vmatpush3.msk.msra.mxu0 %vm518_vm0, %v6748_v34  ;;  %5945 = vmatprep.mubr.msk.f32.mxu0 %vm445_vm2, %v6911_v21  ;;  %v2258_v34 = vrot.slane %v6739_v31, 4 }
  0x41   : > { %6052 = vmatprep.subr.msk.mxu0 %vm518_vm0, %v6921_v25  ;;  %v7015_v36 = vsel %vm518_vm0, %v2264_v2, %v2266_v11  ;;  %v432_v45 = vsel %vm371_vm1, %v429_v3, %v431_v19  ;;  %v2274_v2 = vrot.slane %v6827_v15, 4 }
  0x42   : > { %5693 = vmatmul.mubr.msk.f32.gmra.mrb[20].mxu1 %vm445_vm2, %v416_v26  ;;  %v6967_v54 = vsel %vm518_vm0, %v2256_v35, %v2258_v34  ;;  %v6982_v60 = vsel %vm518_vm0, %v2258_v34, %v2260_v49  ;;  %v430_v26 = vsel %vm371_vm1, %v427_v59, %v429_v3  ;;  %v7012_v35 = vld [vmem:[%s6688_s5 + $0x100] sm:$0xff]  ;;  %v2270_v34 = vrot.slane %v6809_v63, 4  ;;  %v7038_v59 = vld [vmem:[%s6688_s5 + $0x110] sm:$0xff]  ;;  %v7045_v3 = vld [vmem:[%s6688_s5 + $0x118] sm:$0xff] }
  0x43   : > { %5946 = vmatmul.mubr.msk.f32.gmra.mrb[2].mxu0 %vm445_vm2, %v6932_v32  ;;  %5695 = vmatprep.mubr.msk.f32.mxu1 %vm445_vm2, %v418_v33  ;;  %v433_v33 = vrot.slane %v6995_v13, 1  ;;  %v7032_v49 = vsel %vm518_vm0, %v2266_v11, %v2268_v30 }
  0x44   : > { %5948 = vmatprep.mubr.msk.f32.mxu0 %vm445_vm2, %v6941_v38 }
  0x45   : > { %v434_v50 = vsel %vm371_vm1, %v431_v19, %v433_v33  ;;  %v7061_v19 = vsel %vm518_vm0, %v2270_v34, %v2272_v56 }
  0x46   : > { %5696 = vmatmul.mubr.msk.f32.gmra.mrb[22].mxu1 %vm445_vm2, %v420_v44  ;;  %v7019_v44 = vld [vmem:[%s6688_s5 + $0x108] sm:$0xff]  ;;  %9446 = vst [vmem:[#allocation6_spill] sm:$0xff] %v7061_v19 }
  0x47   : > { %5949 = vmatmul.mubr.msk.f32.gmra.mrb[4].mxu0 %vm445_vm2, %v6958_v46  ;;  %5698 = vmatprep.mubr.msk.f32.mxu1 %vm445_vm2, %v422_v47  ;;  %v435_v47 = vrot.slane %v7012_v35, 1 }
  0x48   : > { %5951 = vmatprep.mubr.msk.f32.mxu0 %vm445_vm2, %v6967_v54 }
  0x49   : > { %v436_v11 = vsel %vm371_vm1, %v433_v33, %v435_v47  ;;  %v2278_v33 = vrot.slane %v6845_v29, 4 }
  0x4a   : > { %5699 = vmatmul.mubr.msk.f32.gmra.mrb[24].mxu1 %vm445_vm2, %v424_v58  ;;  %v437_v58 = vrot.slane %v7019_v44, 1 }
  0x4b   : > { %5952 = vmatmul.mubr.msk.f32.gmra.mrb[6].mxu0 %vm445_vm2, %v6982_v60  ;;  %5701 = vmatprep.mubr.msk.f32.mxu1 %vm445_vm2, %v426_v61  ;;  %v7041_v61 = vsel %vm518_vm0, %v2268_v30, %v2270_v34  ;;  %v2276_v30 = vrot.slane %v6841_v28, 4 }
  0x4c   : > { %5954 = vmatprep.mubr.msk.f32.mxu0 %vm445_vm2, %v6991_v10  ;;  %9445 = vst [vmem:[#allocation5_spill] sm:$0xff] %v7041_v61 }
  0x4d   : > { %v7082_v1 = vsel %vm518_vm0, %v2274_v2, %v2276_v30 }
  0x4e   : > { %5702 = vmatmul.mubr.msk.f32.gmra.mrb[26].mxu1 %vm445_vm2, %v428_v17  ;;  %v439_v17 = vrot.slane %v7038_v59, 1 }
  0x4f   : > { %5955 = vmatmul.mubr.msk.f32.gmra.mrb[8].mxu0 %vm445_vm2, %v7006_v22  ;;  %5704 = vmatprep.mubr.msk.f32.mxu1 %vm445_vm2, %v430_v26  ;;  %v438_v26 = vsel %vm371_vm1, %v435_v47, %v437_v58  ;;  %v443_v47 = vrot.slane %v7067_v48, 1 }
  0x50   : > { %5957 = vmatprep.mubr.msk.f32.mxu0 %vm445_vm2, %v7015_v36  ;;  %v440_v34 = vsel %vm371_vm1, %v437_v58, %v439_v17 }
  0x52   : > { %5705 = vmatmul.mubr.msk.f32.gmra.mrb[28].mxu1 %vm445_vm2, %v432_v45  ;;  %v441_v45 = vrot.slane %v7045_v3, 1 }
  0x53   : > { %5958 = vmatmul.mubr.msk.f32.gmra.mrb[10].mxu0 %vm445_vm2, %v7032_v49  ;;  %5707 = vmatprep.mubr.msk.f32.mxu1 %vm445_vm2, %v434_v50  ;;  %v7070_v50 = vsel %vm518_vm0, %v2272_v56, %v2274_v2 }
  0x54   : > { %5960 = vmatprep.mubr.msk.f32.mxu0 %vm445_vm2, %v7041_v61  ;;  %v442_v56 = vsel %vm371_vm1, %v439_v17, %v441_v45  ;;  %v2280_v61 = vrot.slane %v6859_v40, 4  ;;  %v444_v58 = vsel %vm371_vm1, %v441_v45, %v443_v47  ;;  %v2284_v17 = vrot.slane %v6890_v0, 4  ;;  %v7125_v47 = vld [vmem:[%s9375_s2 + $0xc] sm:$0xf] }
  0x55   : > { %9447 = vst [vmem:[#allocation7_spill] sm:$0xff] %v7125_v47 }
  0x56   : > { %5708 = vmatmul.mubr.msk.f32.gmra.mrb[30].mxu1 %vm445_vm2, %v436_v11  ;;  %v7087_v11 = vsel %vm518_vm0, %v2276_v30, %v2278_v33  ;;  %v7098_v2 = vsel %vm518_vm0, %v2278_v33, %v2280_v61  ;;  %v2286_v30 = vrot.slane %v6895_v7, 4  ;;  %v2288_v33 = vrot.slane %v6908_v20, 4 }
  0x57   : > { %5961 = vmatmul.mubr.msk.f32.gmra.mrb[12].mxu0 %vm445_vm2, %v7061_v19  ;;  %5710 = vmatprep.mubr.msk.f32.mxu1 %vm445_vm2, %v438_v26  ;;  %v2282_v19 = vrot.slane %v6875_v55, 4 }
  0x58   : > { %5963 = vmatprep.mubr.msk.f32.mxu0 %vm445_vm2, %v7070_v50 }
  0x59   : > { %v7102_v26 = vsel %vm518_vm0, %v2280_v61, %v2282_v19  ;;  %v7113_v45 = vsel %vm518_vm0, %v2282_v19, %v2284_v17  ;;  %v7117_v61 = vsel %vm518_vm0, %v2284_v17, %v2286_v30  ;;  %v7136_v19 = vsel %vm518_vm0, %v2286_v30, %v2288_v33 }
  0x5a   : > { %5711 = vmatmul.mubr.msk.f32.gmra.mrb[32].mxu1 %vm445_vm2, %v440_v34  ;;  %v2290_v34 = vrot.slane %v6915_v24, 4  ;;  %9448 = vst [vmem:[#allocation8_spill] sm:$0xff] %v7136_v19  ;;  %v2294_v17 = vrot.slane %v6945_v39, 4  ;;  %v2296_v30 = vrot.slane %v6964_v51, 4 }
  0x5b   : > { %5964 = vmatmul.mubr.msk.f32.gmra.mrb[14].mxu0 %vm445_vm2, %v7082_v1  ;;  %5713 = vmatprep.mubr.msk.f32.mxu1 %vm445_vm2, %v442_v56  ;;  %v2292_v56 = vrot.slane %v6938_v37, 4 }
  0x5c   : > { %5966 = vmatprep.mubr.msk.f32.mxu0 %vm445_vm2, %v7087_v11 }
  0x5e   : > { %5714 = vmatmul.mubr.msk.f32.gmra.mrb[34].mxu1 %vm445_vm2, %v444_v58  ;;  %v7140_v58 = vsel %vm518_vm0, %v2288_v33, %v2290_v34  ;;  %v7158_v33 = vsel %vm518_vm0, %v2292_v56, %v2294_v17 }
  0x5f   : > { %5967 = vmatmul.mubr.msk.f32.gmra.mrb[16].mxu0 %vm445_vm2, %v7098_v2  ;;  %5718 = vmatprep.mubr.msk.f32.mxu1 %vm445_vm2, %v6691_v4  ;;  %9449 = vst [vmem:[#allocation9_spill] sm:$0xff] %v7140_v58  ;;  %9451 = vst [vmem:[#allocation11_spill] sm:$0xff] %v7158_v33 }
  0x60   : > { %5969 = vmatprep.mubr.msk.f32.mxu0 %vm445_vm2, %v7102_v26 }
  0x62   : > { %5719 = vmatmul.mubr.msk.f32.vlgmr.msra.gmra.mrb[0].mxu1 %vm445_vm2, %v6694_v5 }
  0x63   : > { %5773 = vmatpush3.msk.msra.mxu1 %vm518_vm0, %v6765_v42  ;;  %5970 = vmatmul.mubr.msk.f32.gmra.mrb[18].mxu0 %vm445_vm2, %v7113_v45  ;;  %v7154_v42 = vsel %vm518_vm0, %v2290_v34, %v2292_v56  ;;  %v7170_v34 = vsel %vm518_vm0, %v2294_v17, %v2296_v30  ;;  %v2300_v56 = vrot.slane %v6988_v8, 4 }
  0x64   : > { %5721 = vmatprep.mubr.msk.f32.mxu1 %vm445_vm2, %v6697_v6  ;;  %5972 = vmatprep.mubr.msk.f32.mxu0 %vm445_vm2, %v7117_v61  ;;  %9450 = vst [vmem:[#allocation10_spill] sm:$0xff] %v7154_v42  ;;  %9452 = vst [vmem:[#allocation12_spill] sm:$0xff] %v7170_v34 }
  0x65   : > { %5828 = vmatprep.subr.msk.mxu1 %vm518_vm0, %v7125_v47  ;;  %v2298_v47 = vrot.slane %v6971_v57, 4 }
  0x66   : > { %5722 = vmatmul.mubr.msk.f32.gmra.mrb[2].mxu1 %vm445_vm2, %v6702_v9 }
  0x67   : > { %5973 = vmatmul.mubr.msk.f32.gmra.mrb[20].mxu0 %vm445_vm2, %v7136_v19  ;;  %5724 = vmatprep.mubr.msk.f32.mxu1 %vm445_vm2, %v6707_v12  ;;  %v2302_v19 = vrot.slane %v6995_v13, 4  ;;  %v7186_v17 = vsel %vm518_vm0, %v2298_v47, %v2300_v56 }
  0x68   : > { %5975 = vmatprep.mubr.msk.f32.mxu0 %vm445_vm2, %v7140_v58  ;;  %v7174_v58 = vsel %vm518_vm0, %v2296_v30, %v2298_v47  ;;  %9454 = vst [vmem:[#allocation14_spill] sm:$0xff] %v7186_v17  ;;  %v2304_v30 = vrot.slane %v7012_v35, 4 }
  0x69   : > { %9453 = vst [vmem:[#allocation13_spill] sm:$0xff] %v7174_v58 }
  0x6a   : > { %5725 = vmatmul.mubr.msk.f32.gmra.mrb[4].mxu1 %vm445_vm2, %v6713_v16  ;;  %v7202_v47 = vsel %vm518_vm0, %v2302_v19, %v2304_v30 }
  0x6b   : > { %5976 = vmatmul.mubr.msk.f32.gmra.mrb[22].mxu0 %vm445_vm2, %v7154_v42  ;;  %5727 = vmatprep.mubr.msk.f32.mxu1 %vm445_vm2, %v6717_v18  ;;  %v2306_v42 = vrot.slane %v7019_v44, 4 }
  0x6c   : > { %5978 = vmatprep.mubr.msk.f32.mxu0 %vm445_vm2, %v7158_v33  ;;  %v7190_v33 = vsel %vm518_vm0, %v2300_v56, %v2302_v19  ;;  %v2308_v56 = vrot.slane %v7038_v59, 4 }
  0x6d   : > { %9455 = vst [vmem:[#allocation15_spill] sm:$0xff] %v7190_v33 }
  0x6e   : > { %5728 = vmatmul.mubr.msk.f32.gmra.mrb[6].mxu1 %vm445_vm2, %v6724_v23  ;;  %v7221_v19 = vsel %vm518_vm0, %v2306_v42, %v2308_v56 }
  0x6f   : > { %5979 = vmatmul.mubr.msk.f32.gmra.mrb[24].mxu0 %vm445_vm2, %v7170_v34  ;;  %5730 = vmatprep.mubr.msk.f32.mxu1 %vm445_vm2, %v6731_v27  ;;  %v2310_v34 = vrot.slane %v7045_v3, 4 }
  0x70   : > { %5981 = vmatprep.mubr.msk.f32.mxu0 %vm445_vm2, %v7174_v58  ;;  %v7206_v58 = vsel %vm518_vm0, %v2304_v30, %v2306_v42  ;;  %v2312_v30 = vrot.slane %v7067_v48, 4 }
  0x72   : > { %5731 = vmatmul.mubr.msk.f32.gmra.mrb[8].mxu1 %vm445_vm2, %v6739_v31  ;;  %v7240_v42 = vsel %vm518_vm0, %v2310_v34, %v2312_v30 }
  0x73   : > { %5982 = vmatmul.mubr.msk.f32.gmra.mrb[26].mxu0 %vm445_vm2, %v7186_v17  ;;  %5733 = vmatprep.mubr.msk.f32.mxu1 %vm445_vm2, %v6760_v41  ;;  %v7212_v17 = vld [vmem:[%s7050_s19 + $0x8] sm:$0xff]  ;;  %v7229_v41 = vld [vmem:[%s7050_s19 + $0x10] sm:$0xff] }
  0x74   : > { %5984 = vmatprep.mubr.msk.f32.mxu0 %vm445_vm2, %v7190_v33  ;;  %9456 = vst [vmem:[#allocation16_spill] sm:$0xff] %v7212_v17  ;;  %v7225_v33 = vsel %vm518_vm0, %v2308_v56, %v2310_v34  ;;  %v2316_v56 = vrot.slane %v7229_v41, 4 }
  0x76   : > { %5734 = vmatmul.mubr.msk.f32.gmra.mrb[10].mxu1 %vm445_vm2, %v6769_v43  ;;  %v2314_v43 = vrot.slane %v7212_v17, 4 }
  0x77   : > { %5985 = vmatmul.mubr.msk.f32.gmra.mrb[28].mxu0 %vm445_vm2, %v7202_v47  ;;  %5736 = vmatprep.mubr.msk.f32.mxu1 %vm445_vm2, %v6787_v52 }
  0x78   : > { %5987 = vmatprep.mubr.msk.f32.mxu0 %vm445_vm2, %v7206_v58  ;;  %v7244_v17 = vsel %vm518_vm0, %v2312_v30, %v2314_v43  ;;  %v7257_v34 = vsel %vm518_vm0, %v2314_v43, %v2316_v56  ;;  %v7272_v43 = vld [vmem:[%s9375_s2 + $0x20] sm:$0xf]  ;;  %v9464_v30 = vld [vmem:[#allocation11_spill] sm:$0xff] }
  0x7a   : > { %5737 = vmatmul.mubr.msk.f32.gmra.mrb[12].mxu1 %vm445_vm2, %v6791_v53 }
  0x7b   : > { %5988 = vmatmul.mubr.msk.f32.gmra.mrb[30].mxu0 %vm445_vm2, %v7221_v19  ;;  %5739 = vmatprep.mubr.msk.f32.mxu1 %vm445_vm2, %v6805_v62 }
  0x7c   : > { %5990 = vmatprep.mubr.msk.f32.mxu0 %vm445_vm2, %v7225_v33 }
  0x7e   : > { %5740 = vmatmul.mubr.msk.f32.gmra.mrb[14].mxu1 %vm445_vm2, %v6809_v63 }
  0x7f   : > { %5991 = vmatmul.mubr.msk.f32.gmra.mrb[32].mxu0 %vm445_vm2, %v7240_v42  ;;  %5742 = vmatprep.mubr.msk.f32.mxu1 %vm445_vm2, %v6823_v14 }
  0x80   : > { %5993 = vmatprep.mubr.msk.f32.mxu0 %vm445_vm2, %v7244_v17 }
  0x82   : > { %5743 = vmatmul.mubr.msk.f32.gmra.mrb[16].mxu1 %vm445_vm2, %v6827_v15 }
  0x83   : > { %5994 = vmatmul.mubr.msk.f32.gmra.mrb[34].mxu0 %vm445_vm2, %v7257_v34  ;;  %5745 = vmatprep.mubr.msk.f32.mxu1 %vm445_vm2, %v6841_v28 }
  0x84   : > { %5998 = vmatprep.mubr.msk.f32.mxu0 %vm445_vm2, %v6911_v21  ;;  %v9457_v21 = vld [vmem:[#allocation5_spill] sm:$0xff] }
  0x86   : > { %5746 = vmatmul.mubr.msk.f32.gmra.mrb[18].mxu1 %vm445_vm2, %v6845_v29 }
  0x87   : > { %5999 = vmatmul.mubr.msk.f32.vlgmr.msra.gmra.mrb[0].mxu0 %vm445_vm2, %v6932_v32  ;;  %5748 = vmatprep.mubr.msk.f32.mxu1 %vm445_vm2, %v6859_v40  ;;  %v1089_v32 = vrot.slane %v6691_v4, 2  ;;  %v1094_v4 = vrot.slane %v6702_v9, 2  ;;  %v9459_v9 = vld [vmem:[#allocation7_spill] sm:$0xff] }
  0x88   : > { %6053 = vmatpush3.msk.msra.mxu0 %vm518_vm0, %v6921_v25  ;;  %6001 = vmatprep.mubr.msk.f32.mxu0 %vm445_vm2, %v6941_v38  ;;  %v9458_v25 = vld [vmem:[#allocation6_spill] sm:$0xff]  ;;  %v1090_v38 = vrot.slane %v6694_v5, 2 }
  0x89   : > { %6108 = vmatprep.subr.msk.mxu0 %vm518_vm0, %v7272_v43 }
  0x8a   : > { %5749 = vmatmul.mubr.msk.f32.gmra.mrb[20].mxu1 %vm445_vm2, %v6875_v55 }
  0x8b   : > { %6002 = vmatmul.mubr.msk.f32.gmra.mrb[2].mxu0 %vm445_vm2, %v6958_v46  ;;  %5751 = vmatprep.mubr.msk.f32.mxu1 %vm445_vm2, %v6890_v0  ;;  %v1091_v46 = vsel %vm1088_vm4, %v1089_v32, %v1090_v38  ;;  %v9465_v32 = vld [vmem:[#allocation12_spill] sm:$0xff] }
  0x8c   : > { %6004 = vmatprep.mubr.msk.f32.mxu0 %vm445_vm2, %v6967_v54  ;;  %v1096_v54 = vrot.slane %v6707_v12, 2 }
  0x8e   : > { %5752 = vmatmul.mubr.msk.f32.gmra.mrb[22].mxu1 %vm445_vm2, %v6895_v7 }
  0x8f   : > { %6005 = vmatmul.mubr.msk.f32.gmra.mrb[4].mxu0 %vm445_vm2, %v6982_v60  ;;  %5754 = vmatprep.mubr.msk.f32.mxu1 %vm445_vm2, %v6908_v20 }
  0x90   : > { %6007 = vmatprep.mubr.msk.f32.mxu0 %vm445_vm2, %v6991_v10  ;;  %v9460_v10 = vld [vmem:[#allocation8_spill] sm:$0xff] }
  0x92   : > { %5755 = vmatmul.mubr.msk.f32.gmra.mrb[24].mxu1 %vm445_vm2, %v6915_v24 }
  0x93   : > { %6008 = vmatmul.mubr.msk.f32.gmra.mrb[6].mxu0 %vm445_vm2, %v7006_v22  ;;  %5757 = vmatprep.mubr.msk.f32.mxu1 %vm445_vm2, %v6938_v37  ;;  %v7364_v22 = vsel %vm1088_vm4, %v1094_v4, %v1096_v54 }
  0x94   : > { %6010 = vmatprep.mubr.msk.f32.mxu0 %vm445_vm2, %v7015_v36  ;;  %v1100_v36 = vrot.slane %v6717_v18, 2 }
  0x96   : > { %5758 = vmatmul.mubr.msk.f32.gmra.mrb[26].mxu1 %vm445_vm2, %v6945_v39 }
  0x97   : > { %6011 = vmatmul.mubr.msk.f32.gmra.mrb[8].mxu0 %vm445_vm2, %v7032_v49  ;;  %5760 = vmatprep.mubr.msk.f32.mxu1 %vm445_vm2, %v6964_v51  ;;  %v9461_v49 = vld [vmem:[#allocation9_spill] sm:$0xff] }
  0x98   : > { %6013 = vmatprep.mubr.msk.f32.mxu0 %vm445_vm2, %v9457_v21 }
  0x9a   : > { %5761 = vmatmul.mubr.msk.f32.gmra.mrb[28].mxu1 %vm445_vm2, %v6971_v57 }
  0x9b   : > { %6014 = vmatmul.mubr.msk.f32.gmra.mrb[10].mxu0 %vm445_vm2, %v9458_v25  ;;  %5763 = vmatprep.mubr.msk.f32.mxu1 %vm445_vm2, %v6988_v8  ;;  %v1106_v25 = vrot.slane %v6739_v31, 2 }
  0x9c   : > { %6016 = vmatprep.mubr.msk.f32.mxu0 %vm445_vm2, %v7070_v50 }
  0x9e   : > { %5764 = vmatmul.mubr.msk.f32.gmra.mrb[30].mxu1 %vm445_vm2, %v6995_v13 }
  0x9f   : > { %6017 = vmatmul.mubr.msk.f32.gmra.mrb[12].mxu0 %vm445_vm2, %v7082_v1  ;;  %5766 = vmatprep.mubr.msk.f32.mxu1 %vm445_vm2, %v7012_v35  ;;  %v1092_v1 = vrot.slane %v6697_v6, 2  ;;  %v1098_v6 = vrot.slane %v6713_v16, 2 }
  0xa0   : > { %6019 = vmatprep.mubr.msk.f32.mxu0 %vm445_vm2, %v7087_v11  ;;  %v1102_v11 = vrot.slane %v6724_v23, 2 }
  0xa1   : > { %v1093_v5 = vsel %vm1088_vm4, %v1090_v38, %v1092_v1  ;;  %v7356_v60 = vsel %vm1088_vm4, %v1092_v1, %v1094_v4  ;;  %v7372_v50 = vsel %vm1088_vm4, %v1096_v54, %v1098_v6  ;;  %v9466_v1 = vld [vmem:[#allocation3_spill] sm:$0xff]  ;;  %v9467_v4 = vld [vmem:[#allocation13_spill] sm:$0xff]  ;;  %v9468_v54 = vld [vmem:[#allocation4_spill] sm:$0xff] }
  0xa2   : > { %5767 = vmatmul.mubr.msk.f32.gmra.mrb[32].mxu1 %vm445_vm2, %v7019_v44  ;;  %v7390_v21 = vsel %vm1088_vm4, %v1100_v36, %v1102_v11 }
  0xa3   : > { %6020 = vmatmul.mubr.msk.f32.gmra.mrb[14].mxu0 %vm445_vm2, %v7098_v2  ;;  %5769 = vmatprep.mubr.msk.f32.mxu1 %vm445_vm2, %v7038_v59  ;;  %v9462_v2 = vld [vmem:[#allocation2_spill] sm:$0xff] }
  0xa4   : > { %6022 = vmatprep.mubr.msk.f32.mxu0 %vm445_vm2, %v7102_v26  ;;  %v9463_v26 = vld [vmem:[#allocation10_spill] sm:$0xff] }
  0xa6   : > { %5770 = vmatmul.mubr.msk.f32.gmra.mrb[34].mxu1 %vm445_vm2, %v7045_v3 }
  0xa7   : > { %6023 = vmatmul.mubr.msk.f32.gmra.mrb[16].mxu0 %vm445_vm2, %v7113_v45  ;;  %5774 = vmatprep.mubr.msk.f32.mxu1 %vm445_vm2, %v1091_v46  ;;  %v7384_v45 = vsel %vm1088_vm4, %v1098_v6, %v1100_v36  ;;  %v1108_v46 = vrot.slane %v9466_v1, 2  ;;  %v1110_v6 = vrot.slane %v9468_v54, 2  ;;  %v1112_v36 = vrot.slane %v6787_v52, 2 }
  0xa8   : > { %6025 = vmatprep.mubr.msk.f32.mxu0 %vm445_vm2, %v7117_v61  ;;  %v1104_v61 = vrot.slane %v6731_v27, 2 }
  0xaa   : > { %5775 = vmatmul.mubr.msk.f32.vlgmr.msra.gmra.mrb[0].mxu1 %vm445_vm2, %v1093_v5  ;;  %v7400_v38 = vsel %vm1088_vm4, %v1102_v11, %v1104_v61  ;;  %v7406_v5 = vsel %vm1088_vm4, %v1104_v61, %v1106_v25  ;;  %v7422_v11 = vsel %vm1088_vm4, %v1108_v46, %v1110_v6  ;;  %v1116_v61 = vrot.slane %v6805_v62, 2 }
  0xab   : > { %5829 = vmatpush3.msk.msra.mxu1 %vm518_vm0, %v9459_v9  ;;  %6026 = vmatmul.mubr.msk.f32.gmra.mrb[18].mxu0 %vm445_vm2, %v9460_v10  ;;  %v9469_v9 = vld [vmem:[#allocation14_spill] sm:$0xff]  ;;  %v7416_v10 = vsel %vm1088_vm4, %v1106_v25, %v1108_v46  ;;  %v1118_v25 = vrot.slane %v6809_v63, 2 }
  0xac   : > { %5777 = vmatprep.mubr.msk.f32.mxu1 %vm445_vm2, %v7356_v60  ;;  %6028 = vmatprep.mubr.msk.f32.mxu0 %vm445_vm2, %v9461_v49  ;;  %v9470_v49 = vld [vmem:[#allocation15_spill] sm:$0xff] }
  0xad   : > { %6164 = vmatprep.subr.msk.mxu1 %vm518_vm0, %v9462_v2  ;;  %v1114_v2 = vrot.slane %v6791_v53, 2  ;;  %v7457_v46 = vsel %vm1088_vm4, %v1116_v61, %v1118_v25 }
  0xae   : > { %5778 = vmatmul.mubr.msk.f32.gmra.mrb[2].mxu1 %vm445_vm2, %v7364_v22 }
  0xaf   : > { %6029 = vmatmul.mubr.msk.f32.gmra.mrb[20].mxu0 %vm445_vm2, %v9463_v26  ;;  %5780 = vmatprep.mubr.msk.f32.mxu1 %vm445_vm2, %v7372_v50  ;;  %v7432_v26 = vsel %vm1088_vm4, %v1110_v6, %v1112_v36 }
  0xb0   : > { %6031 = vmatprep.mubr.msk.f32.mxu0 %vm445_vm2, %v9464_v30  ;;  %v7438_v30 = vsel %vm1088_vm4, %v1112_v36, %v1114_v2 }
  0xb2   : > { %5781 = vmatmul.mubr.msk.f32.gmra.mrb[4].mxu1 %vm445_vm2, %v7384_v45 }
  0xb3   : > { %6032 = vmatmul.mubr.msk.f32.gmra.mrb[22].mxu0 %vm445_vm2, %v9465_v32  ;;  %5783 = vmatprep.mubr.msk.f32.mxu1 %vm445_vm2, %v7390_v21  ;;  %v7451_v32 = vsel %vm1088_vm4, %v1114_v2, %v1116_v61  ;;  %v1126_v2 = vrot.slane %v6845_v29, 2  ;;  %v2971_v61 = vrot.slane %v6707_v12, 5 }
  0xb4   : > { %6034 = vmatprep.mubr.msk.f32.mxu0 %vm445_vm2, %v9467_v4  ;;  %v1122_v4 = vrot.slane %v6827_v15, 2 }
  0xb6   : > { %5784 = vmatmul.mubr.msk.f32.gmra.mrb[6].mxu1 %vm445_vm2, %v7400_v38 }
  0xb7   : > { %6035 = vmatmul.mubr.msk.f32.gmra.mrb[24].mxu0 %vm445_vm2, %v9469_v9  ;;  %5786 = vmatprep.mubr.msk.f32.mxu1 %vm445_vm2, %v7406_v5  ;;  %v7462_v9 = vld [vmem:[%s7050_s19 + $0x20] sm:$0xff] }
  0xb8   : > { %6037 = vmatprep.mubr.msk.f32.mxu0 %vm445_vm2, %v9470_v49  ;;  %9471 = vst [vmem:[#allocation5_spill] sm:$0xff] %v7462_v9  ;;  %v2679_v49 = vrot.slane %v7462_v9, 4  ;;  %v1130_v9 = vrot.slane %v6875_v55, 2 }
  0xba   : > { %5787 = vmatmul.mubr.msk.f32.gmra.mrb[8].mxu1 %vm445_vm2, %v7416_v10 }
  0xbb   : > { %6038 = vmatmul.mubr.msk.f32.gmra.mrb[26].mxu0 %vm445_vm2, %v7202_v47  ;;  %5789 = vmatprep.mubr.msk.f32.mxu1 %vm445_vm2, %v7422_v11  ;;  %v7444_v47 = vld [vmem:[%s7050_s19 + $0x18] sm:$0xff] }
  0xbc   : > { %6040 = vmatprep.mubr.msk.f32.mxu0 %vm445_vm2, %v7206_v58  ;;  %v1120_v58 = vrot.slane %v6823_v14, 2  ;;  %v2677_v6 = vrot.slane %v7444_v47, 4 }
  0xbe   : > { %5790 = vmatmul.mubr.msk.f32.gmra.mrb[10].mxu1 %vm445_vm2, %v7432_v26  ;;  %v7477_v36 = vsel %vm1088_vm4, %v1120_v58, %v1122_v4  ;;  %v2680_v12 = vsel %vm518_vm0, %v2677_v6, %v2679_v49  ;;  %v1134_v49 = vrot.slane %v6895_v7, 2 }
  0xbf   : > { %6041 = vmatmul.mubr.msk.f32.gmra.mrb[28].mxu0 %vm445_vm2, %v7221_v19  ;;  %5792 = vmatprep.mubr.msk.f32.mxu1 %vm445_vm2, %v7438_v30  ;;  %v1124_v19 = vrot.slane %v6841_v28, 2  ;;  %9472 = vst [vmem:[#allocation6_spill] sm:$0xff] %v7477_v36 }
  0xc0   : > { %6043 = vmatprep.mubr.msk.f32.mxu0 %vm445_vm2, %v7225_v33  ;;  %v7471_v33 = vsel %vm1088_vm4, %v1118_v25, %v1120_v58  ;;  %v2972_v25 = vrot.slane %v6713_v16, 5  ;;  %v1128_v58 = vrot.slane %v6859_v40, 2 }
  0xc1   : > { %v7499_v16 = vsel %vm1088_vm4, %v1124_v19, %v1126_v2 }
  0xc2   : > { %5793 = vmatmul.mubr.msk.f32.gmra.mrb[12].mxu1 %vm445_vm2, %v7451_v32 }
  0xc3   : > { %6044 = vmatmul.mubr.msk.f32.gmra.mrb[30].mxu0 %vm445_vm2, %v7240_v42  ;;  %5795 = vmatprep.mubr.msk.f32.mxu1 %vm445_vm2, %v7457_v46  ;;  %v2678_v42 = vsel %vm518_vm0, %v2316_v56, %v2677_v6  ;;  %v2974_v56 = vrot.slane %v6717_v18, 5  ;;  %v1132_v6 = vrot.slane %v6890_v0, 2 }
  0xc4   : > { %6046 = vmatprep.mubr.msk.f32.mxu0 %vm445_vm2, %v7244_v17  ;;  %v7493_v17 = vsel %vm1088_vm4, %v1122_v4, %v1124_v19  ;;  %v7511_v4 = vsel %vm1088_vm4, %v1126_v2, %v1128_v58  ;;  %v7517_v19 = vsel %vm1088_vm4, %v1128_v58, %v1130_v9  ;;  %v2982_v58 = vrot.slane %v9466_v1, 5 }
  0xc5   : > { %v2975_v18 = vsel %vm2970_vm5, %v2972_v25, %v2974_v56  ;;  %v7529_v2 = vsel %vm1088_vm4, %v1130_v9, %v1132_v6  ;;  %v2984_v9 = vrot.slane %v9468_v54, 5  ;;  %v2986_v54 = vrot.slane %v6787_v52, 5 }
  0xc6   : > { %5796 = vmatmul.mubr.msk.f32.gmra.mrb[14].mxu1 %vm445_vm2, %v7471_v33 }
  0xc7   : > { %6047 = vmatmul.mubr.msk.f32.gmra.mrb[32].mxu0 %vm445_vm2, %v7257_v34  ;;  %5798 = vmatprep.mubr.msk.f32.mxu1 %vm445_vm2, %v7477_v36  ;;  %v2973_v34 = vsel %vm2970_vm5, %v2971_v61, %v2972_v25  ;;  %v2976_v36 = vrot.slane %v6724_v23, 5  ;;  %v2978_v23 = vrot.slane %v6731_v27, 5  ;;  %v2980_v61 = vrot.slane %v6739_v31, 5 }
  0xc8   : > { %6049 = vmatprep.mubr.msk.f32.mxu0 %vm445_vm2, %v2678_v42  ;;  %v1136_v25 = vrot.slane %v6908_v20, 2  ;;  %v7537_v31 = vsel %vm1088_vm4, %v1132_v6, %v1134_v49  ;;  %v1142_v6 = vrot.slane %v6945_v39, 2  ;;  %v2987_v52 = vsel %vm2970_vm5, %v2984_v9, %v2986_v54 }
  0xc9   : > { %v2977_v42 = vsel %vm2970_vm5, %v2974_v56, %v2976_v36  ;;  %v2979_v27 = vsel %vm2970_vm5, %v2976_v36, %v2978_v23  ;;  %v2981_v56 = vsel %vm2970_vm5, %v2978_v23, %v2980_v61  ;;  %v1140_v36 = vrot.slane %v6938_v37, 2 }
  0xca   : > { %5799 = vmatmul.mubr.msk.f32.gmra.mrb[16].mxu1 %vm445_vm2, %v7493_v17  ;;  %v2983_v1 = vsel %vm2970_vm5, %v2980_v61, %v2982_v58  ;;  %v2988_v23 = vrot.slane %v6791_v53, 5  ;;  %v2990_v53 = vrot.slane %v6805_v62, 5 }
  0xcb   : > { %6050 = vmatmul.mubr.msk.f32.gmra.mrb[34].mxu0 %vm445_vm2, %v2680_v12  ;;  %5801 = vmatprep.mubr.msk.f32.mxu1 %vm445_vm2, %v7499_v16  ;;  %v1138_v12 = vrot.slane %v6915_v24, 2  ;;  %v7573_v61 = vsel %vm1088_vm4, %v1140_v36, %v1142_v6 }
  0xcc   : > { %6054 = vmatprep.mubr.msk.f32.mxu0 %vm445_vm2, %v2973_v34  ;;  %v2991_v62 = vsel %vm2970_vm5, %v2988_v23, %v2990_v53 }
  0xcd   : > { %v7555_v34 = vsel %vm1088_vm4, %v1136_v25, %v1138_v12 }
  0xce   : > { %5802 = vmatmul.mubr.msk.f32.gmra.mrb[18].mxu1 %vm445_vm2, %v7511_v4 }
  0xcf   : > { %6055 = vmatmul.mubr.msk.f32.vlgmr.msra.gmra.mrb[0].mxu0 %vm445_vm2, %v2975_v18  ;;  %5804 = vmatprep.mubr.msk.f32.mxu1 %vm445_vm2, %v7517_v19  ;;  %v2985_v18 = vsel %vm2970_vm5, %v2982_v58, %v2984_v9  ;;  %v2992_v58 = vrot.slane %v6809_v63, 5  ;;  %v2994_v63 = vrot.slane %v6823_v14, 5 }
  0xd0   : > { %6109 = vmatpush3.msk.msra.mxu0 %vm518_vm0, %v7272_v43  ;;  %6057 = vmatprep.mubr.msk.f32.mxu0 %vm445_vm2, %v2977_v42  ;;  %v7549_v43 = vsel %vm1088_vm4, %v1134_v49, %v1136_v25  ;;  %v7567_v49 = vsel %vm1088_vm4, %v1138_v12, %v1140_v36  ;;  %v1144_v42 = vrot.slane %v6964_v51, 2  ;;  %v1146_v25 = vrot.slane %v6971_v57, 2 }
  0xd1   : > { %v1150_v36 = vrot.slane %v6995_v13, 2  ;;  %v2995_v14 = vsel %vm2970_vm5, %v2992_v58, %v2994_v63 }
  0xd2   : > { %5805 = vmatmul.mubr.msk.f32.gmra.mrb[20].mxu1 %vm445_vm2, %v7529_v2  ;;  %v7585_v12 = vsel %vm1088_vm4, %v1142_v6, %v1144_v42  ;;  %v7591_v9 = vsel %vm1088_vm4, %v1144_v42, %v1146_v25  ;;  %v1154_v42 = vrot.slane %v7019_v44, 2 }
  0xd3   : > { %6058 = vmatmul.mubr.msk.f32.gmra.mrb[2].mxu0 %vm445_vm2, %v2979_v27  ;;  %5807 = vmatprep.mubr.msk.f32.mxu1 %vm445_vm2, %v7537_v31  ;;  %v2989_v27 = vsel %vm2970_vm5, %v2986_v54, %v2988_v23  ;;  %v2996_v54 = vrot.slane %v6827_v15, 5  ;;  %v2998_v15 = vrot.slane %v6841_v28, 5 }
  0xd4   : > { %6060 = vmatprep.mubr.msk.f32.mxu0 %vm445_vm2, %v2981_v56  ;;  %v1148_v56 = vrot.slane %v6988_v8, 2 }
  0xd5   : > { %v2999_v28 = vsel %vm2970_vm5, %v2996_v54, %v2998_v15 }
  0xd6   : > { %5808 = vmatmul.mubr.msk.f32.gmra.mrb[22].mxu1 %vm445_vm2, %v7549_v43  ;;  %v7603_v6 = vsel %vm1088_vm4, %v1146_v25, %v1148_v56  ;;  %v7609_v23 = vsel %vm1088_vm4, %v1148_v56, %v1150_v36  ;;  %v1158_v56 = vrot.slane %v7045_v3, 2 }
  0xd7   : > { %6061 = vmatmul.mubr.msk.f32.gmra.mrb[4].mxu0 %vm445_vm2, %v2983_v1  ;;  %5810 = vmatprep.mubr.msk.f32.mxu1 %vm445_vm2, %v7555_v34  ;;  %v2993_v1 = vsel %vm2970_vm5, %v2990_v53, %v2992_v58  ;;  %v3000_v53 = vrot.slane %v6845_v29, 5  ;;  %v3002_v29 = vrot.slane %v6859_v40, 5 }
  0xd8   : > { %6063 = vmatprep.mubr.msk.f32.mxu0 %vm445_vm2, %v2985_v18  ;;  %v1152_v18 = vrot.slane %v7012_v35, 2 }
  0xda   : > { %5811 = vmatmul.mubr.msk.f32.gmra.mrb[24].mxu1 %vm445_vm2, %v7567_v49  ;;  %v7621_v25 = vsel %vm1088_vm4, %v1150_v36, %v1152_v18  ;;  %v7627_v58 = vsel %vm1088_vm4, %v1152_v18, %v1154_v42 }
  0xdb   : > { %6064 = vmatmul.mubr.msk.f32.gmra.mrb[6].mxu0 %vm445_vm2, %v2987_v52  ;;  %5813 = vmatprep.mubr.msk.f32.mxu1 %vm445_vm2, %v7573_v61  ;;  %v2997_v52 = vsel %vm2970_vm5, %v2994_v63, %v2996_v54  ;;  %v3004_v63 = vrot.slane %v6875_v55, 5  ;;  %v3003_v54 = vsel %vm2970_vm5, %v3000_v53, %v3002_v29  ;;  %v3006_v55 = vrot.slane %v6890_v0, 5 }
  0xdc   : > { %6066 = vmatprep.mubr.msk.f32.mxu0 %vm445_vm2, %v2989_v27  ;;  %v1156_v27 = vrot.slane %v7038_v59, 2 }
  0xdd   : > { %v3007_v0 = vsel %vm2970_vm5, %v3004_v63, %v3006_v55 }
  0xde   : > { %5814 = vmatmul.mubr.msk.f32.gmra.mrb[26].mxu1 %vm445_vm2, %v7585_v12  ;;  %v7639_v36 = vsel %vm1088_vm4, %v1154_v42, %v1156_v27  ;;  %v7645_v18 = vsel %vm1088_vm4, %v1156_v27, %v1158_v56 }
  0xdf   : > { %6067 = vmatmul.mubr.msk.f32.gmra.mrb[8].mxu0 %vm445_vm2, %v2991_v62  ;;  %5816 = vmatprep.mubr.msk.f32.mxu1 %vm445_vm2, %v7591_v9  ;;  %v3001_v62 = vsel %vm2970_vm5, %v2998_v15, %v3000_v53  ;;  %v3008_v15 = vrot.slane %v6895_v7, 5  ;;  %v3012_v53 = vrot.slane %v6915_v24, 5  ;;  %v6553_v24 = vld [vmem:[%s9375_s2 + $0x10] sm:$0xf] }
  0xe0   : > { %6069 = vmatprep.mubr.msk.f32.mxu0 %vm445_vm2, %v2993_v1  ;;  %v1160_v1 = vrot.slane %v7067_v48, 2 }
  0xe1   : > { %v3009_v7 = vsel %vm2970_vm5, %v3006_v55, %v3008_v15  ;;  %v9475_v55 = vld [vmem:[#allocation5_spill] sm:$0xff] }
  0xe2   : > { %5817 = vmatmul.mubr.msk.f32.gmra.mrb[28].mxu1 %vm445_vm2, %v7603_v6  ;;  %v7658_v42 = vsel %vm1088_vm4, %v1158_v56, %v1160_v1  ;;  %v3022_v56 = vrot.slane %v6988_v8, 5 }
  0xe3   : > { %6070 = vmatmul.mubr.msk.f32.gmra.mrb[10].mxu0 %vm445_vm2, %v2995_v14  ;;  %5819 = vmatprep.mubr.msk.f32.mxu1 %vm445_vm2, %v7609_v23  ;;  %v3005_v14 = vsel %vm2970_vm5, %v3002_v29, %v3004_v63  ;;  %v3016_v29 = vrot.slane %v6945_v39, 5  ;;  %v3018_v39 = vrot.slane %v6964_v51, 5 }
  0xe4   : > { %6072 = vmatprep.mubr.msk.f32.mxu0 %vm445_vm2, %v2997_v52  ;;  %v3010_v52 = vrot.slane %v6908_v20, 5 }
  0xe6   : > { %5820 = vmatmul.mubr.msk.f32.gmra.mrb[30].mxu1 %vm445_vm2, %v7621_v25  ;;  %v3011_v27 = vsel %vm2970_vm5, %v3008_v15, %v3010_v52  ;;  %v3013_v20 = vsel %vm2970_vm5, %v3010_v52, %v3012_v53 }
  0xe7   : > { %6073 = vmatmul.mubr.msk.f32.gmra.mrb[12].mxu0 %vm445_vm2, %v2999_v28  ;;  %5822 = vmatprep.mubr.msk.f32.mxu1 %vm445_vm2, %v7627_v58  ;;  %v3014_v28 = vrot.slane %v6938_v37, 5 }
  0xe8   : > { %6075 = vmatprep.mubr.msk.f32.mxu0 %vm445_vm2, %v3001_v62  ;;  %v3024_v62 = vrot.slane %v6995_v13, 5 }
  0xe9   : > { %v3015_v37 = vsel %vm2970_vm5, %v3012_v53, %v3014_v28 }
  0xea   : > { %5823 = vmatmul.mubr.msk.f32.gmra.mrb[32].mxu1 %vm445_vm2, %v7639_v36  ;;  %v3025_v8 = vsel %vm2970_vm5, %v3022_v56, %v3024_v62 }
  0xeb   : > { %6076 = vmatmul.mubr.msk.f32.gmra.mrb[14].mxu0 %vm445_vm2, %v3003_v54  ;;  %5825 = vmatprep.mubr.msk.f32.mxu1 %vm445_vm2, %v7645_v18  ;;  %v3040_v54 = vrot.slane %v7444_v47, 5 }
  0xec   : > { %6078 = vmatprep.mubr.msk.f32.mxu0 %vm445_vm2, %v3005_v14  ;;  %v3042_v14 = vrot.slane %v9475_v55, 5 }
  0xee   : > { %5826 = vmatmul.mubr.msk.f32.gmra.mrb[34].mxu1 %vm445_vm2, %v7658_v42 }
  0xef   : > { %6079 = vmatmul.mubr.msk.f32.gmra.mrb[16].mxu0 %vm445_vm2, %v3007_v0  ;;  %5830 = vmatprep.mubr.msk.f32.mxu1 %vm445_vm2, %v7356_v60  ;;  %v3017_v60 = vsel %vm2970_vm5, %v3014_v28, %v3016_v29  ;;  %v6554_v0 = vld [vmem:[%s6688_s5 + $0x20] sm:$0xff] }
  0xf0   : > { %6081 = vmatprep.mubr.msk.f32.mxu0 %vm445_vm2, %v3009_v7  ;;  %v3402_v52 = vrot.slane %v6554_v0, 6  ;;  %v6555_v7 = vld [vmem:[%s6688_s5 + $0x28] sm:$0xff] }
  0xf1   : > { %v3403_v53 = vrot.slane %v6555_v7, 6  ;;  %v6572_v7 = vld [vmem:[%s6688_s5 + $0xb0] sm:$0xff] }
  0xf2   : > { %5831 = vmatmul.mubr.msk.f32.vlgmr.msra.gmra.mrb[0].mxu1 %vm445_vm2, %v7364_v22  ;;  %v3020_v22 = vrot.slane %v6971_v57, 5 }
  0xf3   : > { %6165 = vmatpush3.msk.msra.mxu1 %vm518_vm0, %v6553_v24  ;;  %6082 = vmatmul.mubr.msk.f32.gmra.mrb[18].mxu0 %vm445_vm2, %v3011_v27  ;;  %v6556_v27 = vld [vmem:[%s6688_s5 + $0x30] sm:$0xff] }
  0xf4   : > { %5833 = vmatprep.mubr.msk.f32.mxu1 %vm445_vm2, %v7372_v50  ;;  %6084 = vmatprep.mubr.msk.f32.mxu0 %vm445_vm2, %v3013_v20  ;;  %v3019_v50 = vsel %vm2970_vm5, %v3016_v29, %v3018_v39  ;;  %v3021_v51 = vsel %vm2970_vm5, %v3018_v39, %v3020_v22  ;;  %v3023_v57 = vsel %vm2970_vm5, %v3020_v22, %v3022_v56  ;;  %v3405_v28 = vrot.slane %v6556_v27, 6  ;;  %v6557_v29 = vld [vmem:[%s6688_s5 + $0x38] sm:$0xff] }
  0xf5   : > { %v3404_v20 = vsel %vm3401_vm6, %v3402_v52, %v3403_v53  ;;  %v3407_v24 = vrot.slane %v6557_v29, 6  ;;  %v6573_v27 = vld [vmem:[%s6688_s5 + $0xb8] sm:$0xff] }
  0xf6   : > { %5834 = vmatmul.mubr.msk.f32.gmra.mrb[2].mxu1 %vm445_vm2, %v7384_v45  ;;  %v3026_v45 = vrot.slane %v7012_v35, 5 }
  0xf7   : > { %6085 = vmatmul.mubr.msk.f32.gmra.mrb[20].mxu0 %vm445_vm2, %v3015_v37  ;;  %5836 = vmatprep.mubr.msk.f32.mxu1 %vm445_vm2, %v7390_v21  ;;  %v3028_v21 = vrot.slane %v7019_v44, 5  ;;  %v3408_v39 = vsel %vm3401_vm6, %v3405_v28, %v3407_v24 }
  0xf8   : > { %6087 = vmatprep.mubr.msk.f32.mxu0 %vm445_vm2, %v3017_v60  ;;  %v3027_v13 = vsel %vm2970_vm5, %v3024_v62, %v3026_v45  ;;  %v6559_v60 = vld [vmem:[%s6688_s5 + $0x48] sm:$0xff] }
  0xf9   : > { %v3029_v35 = vsel %vm2970_vm5, %v3026_v45, %v3028_v21  ;;  %v3411_v22 = vrot.slane %v6559_v60, 6 }
  0xfa   : > { %5837 = vmatmul.mubr.msk.f32.gmra.mrb[4].mxu1 %vm445_vm2, %v7400_v38  ;;  %v3030_v38 = vrot.slane %v7038_v59, 5 }
  0xfb   : > { %6088 = vmatmul.mubr.msk.f32.gmra.mrb[22].mxu0 %vm445_vm2, %v3019_v50  ;;  %5839 = vmatprep.mubr.msk.f32.mxu1 %vm445_vm2, %v7406_v5  ;;  %v3032_v5 = vrot.slane %v7045_v3, 5 }
  0xfc   : > { %6090 = vmatprep.mubr.msk.f32.mxu0 %vm445_vm2, %v3021_v51  ;;  %v3031_v44 = vsel %vm2970_vm5, %v3028_v21, %v3030_v38  ;;  %v6561_v51 = vld [vmem:[%s6688_s5 + $0x58] sm:$0xff] }
  0xfd   : > { %v3033_v59 = vsel %vm2970_vm5, %v3030_v38, %v3032_v5  ;;  %v3415_v62 = vrot.slane %v6561_v51, 6 }
  0xfe   : > { %5840 = vmatmul.mubr.msk.f32.gmra.mrb[6].mxu1 %vm445_vm2, %v7416_v10  ;;  %v3034_v10 = vrot.slane %v7067_v48, 5 }
  0xff   : > { %6091 = vmatmul.mubr.msk.f32.gmra.mrb[24].mxu0 %vm445_vm2, %v3023_v57  ;;  %5842 = vmatprep.mubr.msk.f32.mxu1 %vm445_vm2, %v7422_v11  ;;  %v9473_v11 = vld [vmem:[#allocation16_spill] sm:$0xff] }
 0x100   : > { %6093 = vmatprep.mubr.msk.f32.mxu0 %vm445_vm2, %v3025_v8  ;;  %v3036_v63 = vrot.slane %v9473_v11, 5  ;;  %v3035_v3 = vsel %vm2970_vm5, %v3032_v5, %v3034_v10  ;;  %v6563_v8 = vld [vmem:[%s6688_s5 + $0x68] sm:$0xff] }
 0x101   : > { %v3419_v21 = vrot.slane %v6563_v8, 6 }
 0x102   : > { %5843 = vmatmul.mubr.msk.f32.gmra.mrb[8].mxu1 %vm445_vm2, %v7432_v26  ;;  %v3038_v26 = vrot.slane %v7229_v41, 5 }
 0x103   : > { %6094 = vmatmul.mubr.msk.f32.gmra.mrb[26].mxu0 %vm445_vm2, %v3027_v13  ;;  %5845 = vmatprep.mubr.msk.f32.mxu1 %vm445_vm2, %v7438_v30  ;;  %v3037_v30 = vsel %vm2970_vm5, %v3034_v10, %v3036_v63 }
 0x104   : > { %6096 = vmatprep.mubr.msk.f32.mxu0 %vm445_vm2, %v3029_v35  ;;  %v3041_v15 = vsel %vm2970_vm5, %v3038_v26, %v3040_v54  ;;  %v6565_v35 = vld [vmem:[%s6688_s5 + $0x78] sm:$0xff] }
 0x105   : > { %v3423_v5 = vrot.slane %v6565_v35, 6 }
 0x106   : > { %5846 = vmatmul.mubr.msk.f32.gmra.mrb[10].mxu1 %vm445_vm2, %v7451_v32  ;;  %v9474_v32 = vld [vmem:[#allocation6_spill] sm:$0xff] }
 0x107   : > { %6097 = vmatmul.mubr.msk.f32.gmra.mrb[28].mxu0 %vm445_vm2, %v3031_v44  ;;  %5848 = vmatprep.mubr.msk.f32.mxu1 %vm445_vm2, %v7457_v46  ;;  %v3039_v46 = vsel %vm2970_vm5, %v3036_v63, %v3038_v26 }
 0x108   : > { %6099 = vmatprep.mubr.msk.f32.mxu0 %vm445_vm2, %v3033_v59  ;;  %v6567_v59 = vld [vmem:[%s6688_s5 + $0x88] sm:$0xff] }
 0x109   : > { %v3427_v63 = vrot.slane %v6567_v59, 6 }
 0x10a   : > { %5849 = vmatmul.mubr.msk.f32.gmra.mrb[12].mxu1 %vm445_vm2, %v7471_v33  ;;  %v3043_v33 = vsel %vm2970_vm5, %v3040_v54, %v3042_v14 }
 0x10b   : > { %6100 = vmatmul.mubr.msk.f32.gmra.mrb[30].mxu0 %vm445_vm2, %v3035_v3  ;;  %5851 = vmatprep.mubr.msk.f32.mxu1 %vm445_vm2, %v9474_v32 }
 0x10c   : > { %6102 = vmatprep.mubr.msk.f32.mxu0 %vm445_vm2, %v3037_v30  ;;  %v6569_v30 = vld [vmem:[%s6688_s5 + $0x98] sm:$0xff] }
 0x10d   : > { %v3431_v54 = vrot.slane %v6569_v30, 6 }
 0x10e   : > { %5852 = vmatmul.mubr.msk.f32.gmra.mrb[14].mxu1 %vm445_vm2, %v7493_v17  ;;  %v3406_v17 = vsel %vm3401_vm6, %v3403_v53, %v3405_v28  ;;  %v3437_v53 = vrot.slane %v6572_v7, 6  ;;  %v3439_v28 = vrot.slane %v6573_v27, 6 }
 0x10f   : > { %6103 = vmatmul.mubr.msk.f32.gmra.mrb[32].mxu0 %vm445_vm2, %v3039_v46  ;;  %5854 = vmatprep.mubr.msk.f32.mxu1 %vm445_vm2, %v7499_v16  ;;  %v6558_v16 = vld [vmem:[%s6688_s5 + $0x40] sm:$0xff]  ;;  %v1521_v46 = vrot.slane %v9473_v11, 2 }
 0x110   : > { %6105 = vmatprep.mubr.msk.f32.mxu0 %vm445_vm2, %v3041_v15  ;;  %v3409_v37 = vrot.slane %v6558_v16, 6  ;;  %v6571_v15 = vld [vmem:[%s6688_s5 + $0xa8] sm:$0xff]  ;;  %v1856_v16 = vrot.slane %v6573_v27, 3 }
 0x111   : > { %v3435_v0 = vrot.slane %v6571_v15, 6  ;;  %v1522_v52 = vsel %vm1088_vm4, %v1160_v1, %v1521_v46 }
 0x112   : > { %5855 = vmatmul.mubr.msk.f32.gmra.mrb[16].mxu1 %vm445_vm2, %v7511_v4  ;;  %v3410_v4 = vsel %vm3401_vm6, %v3407_v24, %v3409_v37  ;;  %v3412_v56 = vsel %vm3401_vm6, %v3409_v37, %v3411_v22  ;;  %v6574_v24 = vld [vmem:[%s6688_s5 + $0xc0] sm:$0xff]  ;;  %v6575_v37 = vld [vmem:[%s6688_s5 + $0xc8] sm:$0xff] }
 0x113   : > { %6106 = vmatmul.mubr.msk.f32.gmra.mrb[34].mxu0 %vm445_vm2, %v3043_v33  ;;  %5857 = vmatprep.mubr.msk.f32.mxu1 %vm445_vm2, %v7517_v19  ;;  %v6560_v19 = vld [vmem:[%s6688_s5 + $0x50] sm:$0xff]  ;;  %v1852_v33 = vrot.slane %v6571_v15, 3  ;;  %v3438_v1 = vsel %vm3401_vm6, %v3435_v0, %v3437_v53  ;;  %v6583_v15 = vld [vmem:[%s6688_s5 + $0x108] sm:$0xff] }
 0x114   : > { %6110 = vmatprep.mubr.msk.f32.mxu0 %vm445_vm2, %v3404_v20  ;;  %v3413_v50 = vrot.slane %v6560_v19, 6  ;;  %v9476_v20 = vrot.slane %v6859_v40, 3  ;;  %v1858_v40 = vrot.slane %v6574_v24, 3  ;;  %v6576_v19 = vld [vmem:[%s6688_s5 + $0xd0] sm:$0xff] }
 0x116   : > { %5858 = vmatmul.mubr.msk.f32.gmra.mrb[18].mxu1 %vm445_vm2, %v7529_v2  ;;  %v3414_v2 = vsel %vm3401_vm6, %v3411_v22, %v3413_v50  ;;  %v3416_v45 = vsel %vm3401_vm6, %v3413_v50, %v3415_v62  ;;  %v1853_v29 = vsel %vm1814_vm3, %v9476_v20, %v1852_v33  ;;  %v3445_v50 = vrot.slane %v6576_v19, 6 }
 0x117   : > { %6111 = vmatmul.mubr.msk.f32.vlgmr.msra.gmra.mrb[0].mxu0 %vm445_vm2, %v3406_v17  ;;  %5860 = vmatprep.mubr.msk.f32.mxu1 %vm445_vm2, %v7537_v31  ;;  %v6562_v31 = vld [vmem:[%s6688_s5 + $0x60] sm:$0xff]  ;;  %v3441_v17 = vrot.slane %v6574_v24, 6 }
 0x118   : > { %6113 = vmatprep.mubr.msk.f32.mxu0 %vm445_vm2, %v3408_v39  ;;  %v3417_v57 = vrot.slane %v6562_v31, 6  ;;  %v3443_v39 = vrot.slane %v6575_v37, 6  ;;  %v1859_v31 = vsel %vm1814_vm3, %v1856_v16, %v1858_v40  ;;  %v6586_v24 = vld [vmem:[%s7050_s19] sm:$0xff] }
 0x119   : > { %v3442_v22 = vsel %vm3401_vm6, %v3439_v28, %v3441_v17 }
 0x11a   : > { %5861 = vmatmul.mubr.msk.f32.gmra.mrb[20].mxu1 %vm445_vm2, %v7549_v43  ;;  %v3418_v43 = vsel %vm3401_vm6, %v3415_v62, %v3417_v57  ;;  %v3420_v38 = vsel %vm3401_vm6, %v3417_v57, %v3419_v21  ;;  %v3444_v51 = vsel %vm3401_vm6, %v3441_v17, %v3443_v39  ;;  %v6577_v62 = vld [vmem:[%s6688_s5 + $0xd8] sm:$0xff]  ;;  %v1862_v57 = vrot.slane %v6576_v19, 3 }
 0x11b   : > { %6114 = vmatmul.mubr.msk.f32.gmra.mrb[2].mxu0 %vm445_vm2, %v3410_v4  ;;  %5863 = vmatprep.mubr.msk.f32.mxu1 %vm445_vm2, %v7555_v34  ;;  %v6564_v34 = vld [vmem:[%s6688_s5 + $0x70] sm:$0xff]  ;;  %v3465_v17 = vrot.slane %v6586_v24, 6  ;;  %v1884_v19 = vrot.slane %v9473_v11, 3 }
 0x11c   : > { %6116 = vmatprep.mubr.msk.f32.mxu0 %vm445_vm2, %v3412_v56  ;;  %v3421_v13 = vrot.slane %v6564_v34, 6  ;;  %v1860_v56 = vrot.slane %v6575_v37, 3  ;;  %v1864_v34 = vrot.slane %v6577_v62, 3  ;;  %v3467_v37 = vrot.slane %v9473_v11, 6 }
 0x11e   : > { %5864 = vmatmul.mubr.msk.f32.gmra.mrb[22].mxu1 %vm445_vm2, %v7567_v49  ;;  %v3422_v49 = vsel %vm3401_vm6, %v3419_v21, %v3421_v13  ;;  %v3424_v10 = vsel %vm3401_vm6, %v3421_v13, %v3423_v5  ;;  %v1861_v8 = vsel %vm1814_vm3, %v1858_v40, %v1860_v56  ;;  %v6578_v21 = vld [vmem:[%s6688_s5 + $0xe0] sm:$0xff] }
 0x11f   : > { %6117 = vmatmul.mubr.msk.f32.gmra.mrb[4].mxu0 %vm445_vm2, %v3414_v2  ;;  %5866 = vmatprep.mubr.msk.f32.mxu1 %vm445_vm2, %v7573_v61  ;;  %v6566_v61 = vld [vmem:[%s6688_s5 + $0x80] sm:$0xff]  ;;  %v3447_v2 = vrot.slane %v6577_v62, 6  ;;  %v1886_v62 = vrot.slane %v7229_v41, 3 }
 0x120   : > { %6119 = vmatprep.mubr.msk.f32.mxu0 %vm445_vm2, %v3416_v45  ;;  %v3425_v44 = vrot.slane %v6566_v61, 6  ;;  %v3446_v45 = vsel %vm3401_vm6, %v3443_v39, %v3445_v50 }
 0x121   : > { %v3448_v13 = vsel %vm3401_vm6, %v3445_v50, %v3447_v2  ;;  %v3468_v50 = vsel %vm3401_vm6, %v3465_v17, %v3467_v37 }
 0x122   : > { %5867 = vmatmul.mubr.msk.f32.gmra.mrb[24].mxu1 %vm445_vm2, %v7585_v12  ;;  %v3426_v12 = vsel %vm3401_vm6, %v3423_v5, %v3425_v44  ;;  %v3428_v26 = vsel %vm3401_vm6, %v3425_v44, %v3427_v63  ;;  %v1863_v5 = vsel %vm1814_vm3, %v1860_v56, %v1862_v57  ;;  %v1865_v44 = vsel %vm1814_vm3, %v1862_v57, %v1864_v34 }
 0x123   : > { %6120 = vmatmul.mubr.msk.f32.gmra.mrb[6].mxu0 %vm445_vm2, %v3418_v43  ;;  %5869 = vmatprep.mubr.msk.f32.mxu1 %vm445_vm2, %v7591_v9  ;;  %v6568_v9 = vld [vmem:[%s6688_s5 + $0x90] sm:$0xff]  ;;  %v3449_v43 = vrot.slane %v6578_v21, 6  ;;  %v3471_v56 = vrot.slane %v7444_v47, 6  ;;  %v1887_v57 = vsel %vm1814_vm3, %v1884_v19, %v1886_v62 }
 0x124   : > { %6122 = vmatprep.mubr.msk.f32.mxu0 %vm445_vm2, %v3420_v38  ;;  %v3429_v3 = vrot.slane %v6568_v9, 6  ;;  %v6579_v38 = vld [vmem:[%s6688_s5 + $0xe8] sm:$0xff]  ;;  %v6581_v9 = vld [vmem:[%s6688_s5 + $0xf8] sm:$0xff] }
 0x125   : > { %v3451_v35 = vrot.slane %v6579_v38, 6  ;;  %v3450_v61 = vsel %vm3401_vm6, %v3447_v2, %v3449_v43 }
 0x126   : > { %5870 = vmatmul.mubr.msk.f32.gmra.mrb[26].mxu1 %vm445_vm2, %v7603_v6  ;;  %v3430_v6 = vsel %vm3401_vm6, %v3427_v63, %v3429_v3  ;;  %v3432_v14 = vsel %vm3401_vm6, %v3429_v3, %v3431_v54  ;;  %v1868_v63 = vrot.slane %v6579_v38, 3  ;;  %v3455_v3 = vrot.slane %v6581_v9, 6 }
 0x127   : > { %6123 = vmatmul.mubr.msk.f32.gmra.mrb[8].mxu0 %vm445_vm2, %v3422_v49  ;;  %5872 = vmatprep.mubr.msk.f32.mxu1 %vm445_vm2, %v7609_v23  ;;  %v6570_v23 = vld [vmem:[%s6688_s5 + $0xa0] sm:$0xff]  ;;  %v1866_v49 = vrot.slane %v6578_v21, 3 }
 0x128   : > { %6125 = vmatprep.mubr.msk.f32.mxu0 %vm445_vm2, %v3424_v10  ;;  %v3433_v32 = vrot.slane %v6570_v23, 6  ;;  %v6580_v10 = vld [vmem:[%s6688_s5 + $0xf0] sm:$0xff]  ;;  %v6582_v23 = vld [vmem:[%s6688_s5 + $0x100] sm:$0xff] }
 0x129   : > { %v3453_v59 = vrot.slane %v6580_v10, 6  ;;  %v1870_v30 = vrot.slane %v6580_v10, 3 }
 0x12a   : > { %5873 = vmatmul.mubr.msk.f32.gmra.mrb[28].mxu1 %vm445_vm2, %v7621_v25  ;;  %v1523_v25 = vrot.slane %v7229_v41, 2 }
 0x12b   : > { %6126 = vmatmul.mubr.msk.f32.gmra.mrb[10].mxu0 %vm445_vm2, %v3426_v12  ;;  %5875 = vmatprep.mubr.msk.f32.mxu1 %vm445_vm2, %v7627_v58  ;;  %v3434_v58 = vsel %vm3401_vm6, %v3431_v54, %v3433_v32  ;;  %v3452_v12 = vsel %vm3401_vm6, %v3449_v43, %v3451_v35  ;;  %v3454_v54 = vsel %vm3401_vm6, %v3451_v35, %v3453_v59 }
 0x12c   : > { %6128 = vmatprep.mubr.msk.f32.mxu0 %vm445_vm2, %v3428_v26  ;;  %v1524_v48 = vsel %vm1088_vm4, %v1521_v46, %v1523_v25  ;;  %v1867_v26 = vsel %vm1814_vm3, %v1864_v34, %v1866_v49  ;;  %v1872_v46 = vrot.slane %v6581_v9, 3  ;;  %v1871_v25 = vsel %vm1814_vm3, %v1868_v63, %v1870_v30 }
 0x12e   : > { %5876 = vmatmul.mubr.msk.f32.gmra.mrb[30].mxu1 %vm445_vm2, %v7639_v36  ;;  %v3436_v36 = vsel %vm3401_vm6, %v3433_v32, %v3435_v0  ;;  %v3457_v32 = vrot.slane %v6582_v23, 6  ;;  %v3459_v0 = vrot.slane %v6583_v15, 6 }
 0x12f   : > { %6129 = vmatmul.mubr.msk.f32.gmra.mrb[12].mxu0 %vm445_vm2, %v3430_v6  ;;  %5878 = vmatprep.mubr.msk.f32.mxu1 %vm445_vm2, %v7645_v18  ;;  %v1854_v18 = vrot.slane %v6572_v7, 3  ;;  %v1869_v6 = vsel %vm1814_vm3, %v1866_v49, %v1868_v63  ;;  %v1873_v7 = vsel %vm1814_vm3, %v1870_v30, %v1872_v46 }
 0x130   : > { %6131 = vmatprep.mubr.msk.f32.mxu0 %vm445_vm2, %v3432_v14  ;;  %v3456_v14 = vsel %vm3401_vm6, %v3453_v59, %v3455_v3  ;;  %v3460_v27 = vsel %vm3401_vm6, %v3457_v32, %v3459_v0 }
 0x131   : > { %v1855_v60 = vsel %vm1814_vm3, %v1852_v33, %v1854_v18  ;;  %v1857_v4 = vsel %vm1814_vm3, %v1854_v18, %v1856_v16 }
 0x132   : > { %5879 = vmatmul.mubr.msk.f32.gmra.mrb[32].mxu1 %vm445_vm2, %v7658_v42  ;;  %v3440_v42 = vsel %vm3401_vm6, %v3437_v53, %v3439_v28  ;;  %v6584_v53 = vld [vmem:[%s6688_s5 + $0x110] sm:$0xff]  ;;  %v6585_v28 = vld [vmem:[%s6688_s5 + $0x118] sm:$0xff]  ;;  %s8671_s5 = scalar_lea.vmem %s9376_s3, %s4988_s15 }
 0x133   : > { %6132 = vmatmul.mubr.msk.f32.gmra.mrb[14].mxu0 %vm445_vm2, %v3434_v58  ;;  %5881 = vmatprep.mubr.msk.f32.mxu1 %vm445_vm2, %v1522_v52  ;;  %v1874_v58 = vrot.slane %v6582_v23, 3  ;;  %v3458_v52 = vsel %vm3401_vm6, %v3455_v3, %v3457_v32  ;;  %v3461_v33 = vrot.slane %v6584_v53, 6  ;;  %v1880_v16 = vrot.slane %v6585_v28, 3 }
 0x134   : > { %6134 = vmatprep.mubr.msk.f32.mxu0 %vm445_vm2, %v3436_v36  ;;  %v1876_v36 = vrot.slane %v6583_v15, 3 }
 0x135   : > { %v1875_v18 = vsel %vm1814_vm3, %v1872_v46, %v1874_v58  ;;  %v3462_v20 = vsel %vm3401_vm6, %v3459_v0, %v3461_v33 }
 0x136   : > { %5882 = vmatmul.mubr.msk.f32.gmra.mrb[34].mxu1 %vm445_vm2, %v1524_v48  ;;  %v3463_v48 = vrot.slane %v6585_v28, 6 }
 0x137   : > { %6135 = vmatmul.mubr.msk.f32.gmra.mrb[16].mxu0 %vm445_vm2, %v3438_v1  ;;  %5913 = vmatprep.mubr.msk.f32.mxu1 %vm445_vm2, %v1853_v29  ;;  %v1878_v1 = vrot.slane %v6584_v53, 3  ;;  %v1877_v29 = vsel %vm1814_vm3, %v1874_v58, %v1876_v36 }
 0x138   : > { %6137 = vmatprep.mubr.msk.f32.mxu0 %vm445_vm2, %v3440_v42  ;;  %v3464_v42 = vsel %vm3401_vm6, %v3461_v33, %v3463_v48  ;;  %v3466_v40 = vsel %vm3401_vm6, %v3463_v48, %v3465_v17 }
 0x139   : > { %v1879_v39 = vsel %vm1814_vm3, %v1876_v36, %v1878_v1 }
 0x13a   : > { %5914 = vmatmul.mubr.msk.f32.vlgmr.msra.gmra.mrb[18].mxu1 %vm445_vm2, %v1855_v60  ;;  %v1882_v60 = vrot.slane %v6586_v24, 3 }
 0x13b   : > { %6138 = vmatmul.mubr.msk.f32.gmra.mrb[18].mxu0 %vm445_vm2, %v3442_v22  ;;  %5916 = vmatprep.mubr.msk.f32.mxu1 %vm445_vm2, %v1857_v4  ;;  %v1881_v22 = vsel %vm1814_vm3, %v1878_v1, %v1880_v16  ;;  %v3469_v4 = vrot.slane %v7229_v41, 6 }
 0x13c   : > { %6140 = vmatprep.mubr.msk.f32.mxu0 %vm445_vm2, %v3444_v51  ;;  %v1883_v51 = vsel %vm1814_vm3, %v1880_v16, %v1882_v60  ;;  %v1885_v11 = vsel %vm1814_vm3, %v1882_v60, %v1884_v19 }
 0x13d   : > { %v3470_v2 = vsel %vm3401_vm6, %v3467_v37, %v3469_v4  ;;  %v3472_v47 = vsel %vm3401_vm6, %v3469_v4, %v3471_v56 }
 0x13e   : > { %5917 = vmatmul.mubr.msk.f32.gmra.mrb[20].mxu1 %vm445_vm2, %v1859_v31  ;;  %v3473_v31 = vrot.slane %v9475_v55, 6 }
 0x13f   : > { %6141 = vmatmul.mubr.msk.f32.gmra.mrb[20].mxu0 %vm445_vm2, %v3446_v45  ;;  %5919 = vmatprep.mubr.msk.f32.mxu1 %vm445_vm2, %v1861_v8  ;;  %v3832_v45 = vlaneseq }
 0x140   : > { %6143 = vmatprep.mubr.msk.f32.mxu0 %vm445_vm2, %v3448_v13  ;;  %v3474_v41 = vsel %vm3401_vm6, %v3471_v56, %v3473_v31 }
 0x141   : > { %v7947_v55 = vshrl.u32 %v3832_v45, 7 }
 0x142   : > { %5920 = vmatmul.mubr.msk.f32.gmra.mrb[22].mxu1 %vm445_vm2, %v1863_v5 }
 0x143   : > { %6144 = vmatmul.mubr.msk.f32.gmra.mrb[22].mxu0 %vm445_vm2, %v3450_v61  ;;  %5922 = vmatprep.mubr.msk.f32.mxu1 %vm445_vm2, %v1865_v44  ;;  %v3834_v8 = vadd.s32 8, %v7947_v55  ;;  %v3836_v34 = vadd.s32 24, %v7947_v55  ;;  %v3835_v13 = vadd.s32 16, %v7947_v55  ;;  %v3838_v10 = vadd.s32 40, %v7947_v55 }
 0x144   : > { %6146 = vmatprep.mubr.msk.f32.mxu0 %vm445_vm2, %v3452_v12  ;;  %v7956_v38 = vmul.u32.u64.low 3817748708, %v7947_v55  ;;  %v7957_v35 = vmul.u32.u64.high 3817748708, %v7947_v55, %v7956_v38  ;;  %v3837_v59 = vadd.s32 32, %v7947_v55  ;;  %v3840_v63 = vadd.s32 56, %v7947_v55 }
 0x145   : > { %v7950_v21 = vmul.u32.u64.low 3817748708, %v3834_v8  ;;  %v7951_v43 = vmul.u32.u64.high 3817748708, %v3834_v8, %v7950_v21  ;;  %v7959_v5 = vmul.u32.u64.low 3817748708, %v3836_v34  ;;  %v7960_v49 = vmul.u32.u64.high 3817748708, %v3836_v34, %v7959_v5 }
 0x146   : > { %5923 = vmatmul.mubr.msk.f32.gmra.mrb[24].mxu1 %vm445_vm2, %v1867_v26  ;;  %v7962_v61 = vmul.u32.u64.low 3817748708, %v3835_v13  ;;  %v7963_v44 = vmul.u32.u64.high 3817748708, %v3835_v13, %v7962_v61  ;;  %v3839_v9 = vadd.s32 48, %v7947_v55  ;;  %v3912_v46 = vshrl.u32 %v7957_v35, 4 }
 0x147   : > { %6147 = vmatmul.mubr.msk.f32.gmra.mrb[24].mxu0 %vm445_vm2, %v3454_v54  ;;  %5925 = vmatprep.mubr.msk.f32.mxu1 %vm445_vm2, %v1869_v6  ;;  %v3923_v12 = vshrl.u32 %v7951_v43, 4  ;;  %v7970_v3 = vmul.u32.u64.low 3817748708, %v3838_v10  ;;  %v7971_v26 = vmul.u32.u64.high 3817748708, %v3838_v10, %v7970_v3  ;;  %v3945_v0 = vshrl.u32 %v7960_v49, 4 }
 0x148   : > { %6149 = vmatprep.mubr.msk.f32.mxu0 %vm445_vm2, %v3456_v14  ;;  %v7973_v30 = vmul.u32.u64.low 3817748708, %v3837_v59  ;;  %v7974_v54 = vmul.u32.u64.high 3817748708, %v3837_v59, %v7973_v30  ;;  %v7976_v6 = vmul.u32.u64.low 3817748708, %v3840_v63  ;;  %v7977_v23 = vmul.u32.u64.high 3817748708, %v3840_v63, %v7976_v6 }
 0x149   : > { %v3924_v32 = vmul.u32 18, %v3923_v12  ;;  %v7980_v14 = vmul.u32.u64.low 3817748708, %v3839_v9  ;;  %v7981_v15 = vmul.u32.u64.high 3817748708, %v3839_v9, %v7980_v14  ;;  %v7986_v58 = vadd.s32 72, %v7947_v55 }
 0x14a   : > { %5926 = vmatmul.mubr.msk.f32.gmra.mrb[26].mxu1 %vm445_vm2, %v1871_v25  ;;  %v3934_v25 = vshrl.u32 %v7963_v44, 4  ;;  %v3946_v53 = vmul.u32 18, %v3945_v0  ;;  %v3967_v36 = vshrl.u32 %v7971_v26, 4  ;;  %v3989_v1 = vshrl.u32 %v7977_v23, 4 }
 0x14b   : > { %6150 = vmatmul.mubr.msk.f32.gmra.mrb[26].mxu0 %vm445_vm2, %v3458_v52  ;;  %5928 = vmatprep.mubr.msk.f32.mxu1 %vm445_vm2, %v1873_v7  ;;  %v7988_v52 = vsub.s32 %v3834_v8, %v3924_v32  ;;  %v3913_v7 = vmul.u32 18, %v3912_v46  ;;  %v7993_v28 = vmul.u32.u64.low 3817748708, %v7986_v58  ;;  %v7994_v48 = vmul.u32.u64.high 3817748708, %v7986_v58, %v7993_v28 }
 0x14c   : > { %6152 = vmatprep.mubr.msk.f32.mxu0 %vm445_vm2, %v3460_v27  ;;  %v3935_v33 = vmul.u32 18, %v3934_v25  ;;  %v3956_v27 = vshrl.u32 %v7974_v54, 4  ;;  %v3978_v24 = vshrl.u32 %v7981_v15, 4  ;;  %v8012_v16 = vsub.s32 %v3836_v34, %v3946_v53 }
 0x14d   : > { %vm4303_vm7 = vcmp.ne.s32.totalorder %v7988_v52, 0  ;;  %vm4339_vm8 = vcmp.lt.s32.totalorder %v7988_v52, 0  ;;  %v8010_v17 = vadd.s32 18, %v7988_v52  ;;  %v8136_v6 = vadd.s32 120, %v7947_v55 }
 0x14e   : > { %5929 = vmatmul.mubr.msk.f32.gmra.mrb[28].mxu1 %vm445_vm2, %v1875_v18  ;;  %v7997_v18 = vadd.s32 64, %v7947_v55  ;;  %v8014_v37 = vsub.s32 %v3835_v13, %v3935_v33  ;;  %v3979_v56 = vmul.u32 18, %v3978_v24  ;;  %vm4305_vm11 = vcmp.ne.s32.totalorder %v8012_v16, 0  ;;  %vm8059_vm14 = vmand %vm4339_vm8, %vm4303_vm7 }
 0x14f   : > { %6153 = vmatmul.mubr.msk.f32.gmra.mrb[28].mxu0 %vm445_vm2, %v3462_v20  ;;  %5931 = vmatprep.mubr.msk.f32.mxu1 %vm445_vm2, %v1877_v29  ;;  %v8001_v20 = vadd.s32 88, %v7947_v55  ;;  %v8005_v29 = vsub.s32 %v7947_v55, %v3913_v7  ;;  %vm4341_vm12 = vcmp.lt.s32.totalorder %v8012_v16, 0  ;;  %v8043_v31 = vadd.s32 18, %v8012_v16 }
 0x150   : > { %6155 = vmatprep.mubr.msk.f32.mxu0 %vm445_vm2, %v3464_v42  ;;  %v3968_v42 = vmul.u32 18, %v3967_v36  ;;  %vm4304_vm13 = vcmp.ne.s32.totalorder %v8014_v37, 0  ;;  %vm4340_vm15 = vcmp.lt.s32.totalorder %v8014_v37, 0  ;;  %v8064_v43 = vsub.s32 %v3839_v9, %v3979_v56  ;;  %vm8088_vm3 = vmand %vm4341_vm12, %vm4305_vm11 }
 0x151   : > { %v8021_v4 = vmul.u32.u64.low 3817748708, %v8001_v20  ;;  %v8022_v19 = vmul.u32.u64.high 3817748708, %v8001_v20, %v8021_v4  ;;  %vm4302_vm9 = vcmp.ne.s32.totalorder %v8005_v29, 0  ;;  %vm4338_vm10 = vcmp.lt.s32.totalorder %v8005_v29, 0  ;;  %vm8097_vm6 = vmand %vm4340_vm15, %vm4304_vm13 }
 0x152   : > { %5932 = vmatmul.mubr.msk.f32.gmra.mrb[30].mxu1 %vm445_vm2, %v1879_v39  ;;  %v3957_v39 = vmul.u32 18, %v3956_v27  ;;  %v8033_v62 = vadd.s32 18, %v8005_v29  ;;  %9481 = vst [vmem:[#allocation9_spill] sm:$0xff] %v8064_v43  ;;  %vm8074_vm0 = vmand %vm4338_vm10, %vm4302_vm9  ;;  %vm4308_vm10 = vcmp.ne.s32.totalorder %v8064_v43, 0  ;;  %vm4344_vm11 = vcmp.lt.s32.totalorder %v8064_v43, 0 }
 0x153   : > { %6156 = vmatmul.mubr.msk.f32.gmra.mrb[30].mxu0 %vm445_vm2, %v3466_v40  ;;  %5934 = vmatprep.mubr.msk.f32.mxu1 %vm445_vm2, %v1881_v22  ;;  %v8017_v60 = vmul.u32.u64.low 3817748708, %v7997_v18  ;;  %v8018_v40 = vmul.u32.u64.high 3817748708, %v7997_v18, %v8017_v60  ;;  %v3990_v22 = vmul.u32 18, %v3989_v1  ;;  %v9492_v23 = vmov 0  ;;  %vm8157_vm15 = vmand %vm4344_vm11, %vm4308_vm10 }
 0x154   : > { %6158 = vmatprep.mubr.msk.f32.mxu0 %vm445_vm2, %v3468_v50  ;;  %v8025_v50 = vadd.s32 80, %v7947_v55  ;;  %v8148_v46 = vadd.s32 18, %v8064_v43  ;;  %v9498_v25 = vmov 0  ;;  %v8163_v33 = vadd.s32 112, %v7947_v55 }
 0x155   : > { %v4000_v44 = vshrl.u32 %v8018_v40, 4  ;;  %v9499_v25 = vsel %vm8157_vm15, 4294967295, %v9498_v25  ;;  %v9510_v0 = vmov 0  ;;  %v8341_v43 = vadd.s32 200, %v7947_v55 }
 0x156   : > { %5935 = vmatmul.mubr.msk.f32.gmra.mrb[32].mxu1 %vm445_vm2, %v1883_v51  ;;  %v8030_v51 = vadd.s32 104, %v7947_v55  ;;  %v8052_v45 = vmul.u32.u64.low 3817748708, %v8025_v50  ;;  %v8053_v8 = vmul.u32.u64.high 3817748708, %v8025_v50, %v8052_v45  ;;  %9496 = vst [vmem:[#allocation11_spill] sm:$0xff] %v8148_v46  ;;  %9500 = vst [vmem:[#allocation3_spill] sm:$0xff] %v9499_v25  ;;  %v9522_v46 = vmov 0 }
 0x157   : > { %6159 = vmatmul.mubr.msk.f32.gmra.mrb[32].mxu0 %vm445_vm2, %v3470_v2  ;;  %5937 = vmatprep.mubr.msk.f32.mxu1 %vm445_vm2, %v1885_v11  ;;  %v8036_v2 = vsub.s32 %v3838_v10, %v3968_v42  ;;  %v8039_v11 = vadd.s32 96, %v7947_v55  ;;  %v4001_v15 = vmul.u32 18, %v4000_v44  ;;  %v9561_v21 = vmov 0 }
 0x158   : > { %6161 = vmatprep.mubr.msk.f32.mxu0 %vm445_vm2, %v3472_v47  ;;  %v8045_v47 = vsub.s32 %v3837_v59, %v3957_v39  ;;  %v8067_v34 = vmul.u32.u64.low 3817748708, %v8030_v51  ;;  %v8068_v13 = vmul.u32.u64.high 3817748708, %v8030_v51, %v8067_v34  ;;  %v8102_v59 = vadd.s32 18, %v8014_v37 }
 0x159   : > { %vm4307_vm1 = vcmp.ne.s32.totalorder %v8036_v2, 0  ;;  %v8081_v35 = vmul.u32.u64.low 3817748708, %v8039_v11  ;;  %v8082_v5 = vmul.u32.u64.high 3817748708, %v8039_v11, %v8081_v35  ;;  %v8112_v9 = vadd.s32 18, %v8036_v2 }
 0x15a   : > { %5938 = vmatmul.mubr.msk.f32.gmra.mrb[34].mxu1 %vm445_vm2, %v1887_v57  ;;  %9477 = vst [vmem:[#allocation7_spill] sm:$0xff] %v8045_v47  ;;  %v4011_v57 = vshrl.u32 %v7994_v48, 4  ;;  %vm4306_vm4 = vcmp.ne.s32.totalorder %v8045_v47, 0  ;;  %vm4342_vm5 = vcmp.lt.s32.totalorder %v8045_v47, 0  ;;  %v8115_v3 = vadd.s32 18, %v8045_v47 }
 0x15b   : > { %6162 = vmatmul.mubr.msk.f32.gmra.mrb[34].mxu0 %vm445_vm2, %v3474_v41  ;;  %v8049_v41 = vsub.s32 %v3840_v63, %v3990_v22  ;;  %vm4343_vm2 = vcmp.lt.s32.totalorder %v8036_v2, 0  ;;  %v4033_v63 = vshrl.u32 %v8022_v19, 4  ;;  %vm8131_vm12 = vmand %vm4342_vm5, %vm4306_vm4  ;;  %v4022_v53 = vshrl.u32 %v8053_v8, 4 }
 0x15c   : > { %v4012_v61 = vmul.u32 18, %v4011_v57  ;;  %vm8107_vm9 = vmand %vm4343_vm2, %vm4307_vm1  ;;  %v4055_v28 = vshrl.u32 %v8068_v13, 4  ;;  %v4044_v1 = vshrl.u32 %v8082_v5, 4  ;;  %v8186_v39 = vadd.s32 136, %v7947_v55 }
 0x15d   : > { %9478 = vst [vmem:[#allocation8_spill] sm:$0xff] %v8049_v41  ;;  %vm4309_vm7 = vcmp.ne.s32.totalorder %v8049_v41, 0  ;;  %vm4345_vm8 = vcmp.lt.s32.totalorder %v8049_v41, 0  ;;  %v8145_v32 = vadd.s32 18, %v8049_v41  ;;  %v4034_v7 = vmul.u32 18, %v4033_v63 }
 0x15e   : > { %vm8140_vm13 = vmand %vm4345_vm8, %vm4309_vm7  ;;  %v8151_v14 = vsub.s32 %v7986_v58, %v4012_v61  ;;  %v8182_v24 = vmul.u32.u64.low 3817748708, %v8136_v6  ;;  %v8183_v42 = vmul.u32.u64.high 3817748708, %v8136_v6, %v8182_v24  ;;  %v8200_v4 = vsub.s32 %v7997_v18, %v4001_v15 }
 0x15f   : > { %v9493_v23 = vsel %vm8140_vm13, 4294967295, %v9492_v23  ;;  %9495 = vst [vmem:[#allocation10_spill] sm:$0xff] %v8145_v32  ;;  %v8203_v19 = vsub.s32 %v8001_v20, %v4034_v7  ;;  %v4023_v56 = vmul.u32 18, %v4022_v53  ;;  %v4056_v34 = vmul.u32 18, %v4055_v28 }
 0x160   : > { %9494 = vst [vmem:[#allocation2_spill] sm:$0xff] %v9493_v23  ;;  %9497 = vst [vmem:[#allocation12_spill] sm:$0xff] %v8151_v14  ;;  %vm4311_vm1 = vcmp.ne.s32.totalorder %v8151_v14, 0  ;;  %v8206_v57 = vmul.u32.u64.low 3817748708, %v8163_v33  ;;  %v8207_v45 = vmul.u32.u64.high 3817748708, %v8163_v33, %v8206_v57  ;;  %vm4347_vm2 = vcmp.lt.s32.totalorder %v8151_v14, 0 }
 0x161   : > { %v8211_v8 = vadd.s32 18, %v8151_v14  ;;  %v8214_v13 = vadd.s32 128, %v7947_v55  ;;  %v4045_v18 = vmul.u32 18, %v4044_v1  ;;  %v8223_v61 = vadd.s32 152, %v7947_v55  ;;  %vm8285_vm11 = vmand %vm4347_vm2, %vm4311_vm1 }
 0x162   : > { %v8219_v20 = vmul.u32.u64.low 3817748708, %v8186_v39  ;;  %v8220_v5 = vmul.u32.u64.high 3817748708, %v8186_v39, %v8219_v20  ;;  %vm4310_vm4 = vcmp.ne.s32.totalorder %v8200_v4, 0  ;;  %vm4346_vm5 = vcmp.lt.s32.totalorder %v8200_v4, 0 }
 0x163   : > { %v8230_v63 = vadd.s32 144, %v7947_v55  ;;  %v8233_v15 = vadd.s32 168, %v7947_v55  ;;  %v8236_v7 = vadd.s32 18, %v8200_v4  ;;  %vm4313_vm7 = vcmp.ne.s32.totalorder %v8203_v19, 0  ;;  %vm8303_vm10 = vmand %vm4346_vm5, %vm4310_vm4 }
 0x164   : > { %v8241_v53 = vsub.s32 %v8025_v50, %v4023_v56  ;;  %v8244_v28 = vsub.s32 %v8030_v51, %v4056_v34  ;;  %v8247_v1 = vmul.u32.u64.low 3817748708, %v8214_v13  ;;  %v8248_v24 = vmul.u32.u64.high 3817748708, %v8214_v13, %v8247_v1 }
 0x165   : > { %v8251_v57 = vadd.s32 160, %v7947_v55  ;;  %v8256_v22 = vsub.s32 %v8039_v11, %v4045_v18  ;;  %v4077_v40 = vshrl.u32 %v8183_v42, 4  ;;  %v8274_v58 = vadd.s32 18, %v8203_v19 }
 0x166   : > { %v8260_v50 = vmul.u32.u64.low 3817748708, %v8223_v61  ;;  %v8261_v56 = vmul.u32.u64.high 3817748708, %v8223_v61, %v8260_v50  ;;  %v8266_v34 = vmul.u32.u64.low 3817748708, %v8230_v63  ;;  %v8267_v27 = vmul.u32.u64.high 3817748708, %v8230_v63, %v8266_v34 }
 0x167   : > { %9505 = vst [vmem:[#allocation16_spill] sm:$0xff] %v8256_v22  ;;  %v8270_v1 = vmul.u32.u64.low 3817748708, %v8233_v15  ;;  %v8271_v36 = vmul.u32.u64.high 3817748708, %v8233_v15, %v8270_v1  ;;  %v4066_v11 = vshrl.u32 %v8207_v45, 4  ;;  %v8279_v42 = vadd.s32 184, %v7947_v55 }
 0x168   : > { %v9507_v18 = vmov 0  ;;  %v8291_v50 = vmul.u32.u64.low 3817748708, %v8251_v57  ;;  %v8292_v34 = vmul.u32.u64.high 3817748708, %v8251_v57, %v8291_v50  ;;  %v8295_v1 = vadd.s32 176, %v7947_v55 }
 0x169   : > { %v9508_v18 = vsel %vm8285_vm11, 4294967295, %v9507_v18  ;;  %v9511_v0 = vsel %vm8303_vm10, 4294967295, %v9510_v0  ;;  %v4078_v30 = vmul.u32 18, %v4077_v40  ;;  %v4099_v50 = vshrl.u32 %v8220_v5, 4 }
 0x16a   : > { %vm9513_vm8 = vcmp.lt.s32.totalorder %v8203_v19, 0  ;;  %vm4350_vm5 = vcmp.lt.s32.totalorder %v8256_v22, 0  ;;  %vm9516_vm2 = vcmp.ne.s32.totalorder %v8241_v53, 0  ;;  %vm9517_vm1 = vcmp.lt.s32.totalorder %v8241_v53, 0 }
 0x16b   : > { %vm8316_vm15 = vmand %vm9513_vm8, %vm4313_vm7  ;;  %v9518_v40 = vmov 0  ;;  %v4067_v5 = vmul.u32 18, %v4066_v11  ;;  %vm9520_vm7 = vcmp.ne.s32.totalorder %v8244_v28, 0  ;;  %vm9521_vm8 = vcmp.lt.s32.totalorder %v8244_v28, 0 }
 0x16c   : > { %vm8332_vm13 = vmand %vm9517_vm1, %vm9516_vm2  ;;  %v8352_v25 = vadd.s32 18, %v8256_v22  ;;  %v4088_v11 = vshrl.u32 %v8248_v24, 4  ;;  %v8356_v41 = vmul.u32.u64.low 3817748708, %v8295_v1  ;;  %v8357_v32 = vmul.u32.u64.high 3817748708, %v8295_v1, %v8356_v41 }
 0x16d   : > { %v9519_v40 = vsel %vm8332_vm13, 4294967295, %v9518_v40  ;;  %vm8347_vm4 = vmand %vm9521_vm8, %vm9520_vm7  ;;  %vm9526_vm1 = vcmp.ne.s32.totalorder %v8256_v22, 0  ;;  %v4100_v24 = vmul.u32 18, %v4099_v50  ;;  %v4121_v47 = vshrl.u32 %v8261_v56, 4 }
 0x16e   : > { %v9523_v46 = vsel %vm8347_vm4, 4294967295, %v9522_v46  ;;  %9524 = vst [vmem:[#allocation18_spill] sm:$0xff] %v8352_v25  ;;  %vm8367_vm2 = vmand %vm4350_vm5, %vm9526_vm1  ;;  %v4110_v14 = vshrl.u32 %v8267_v27, 4  ;;  %v8392_v56 = vsub.s32 %v8163_v33, %v4067_v5  ;;  %v4089_v23 = vmul.u32 18, %v4088_v11 }
 0x16f   : > { %v8411_v5 = vsub.s32 %v8186_v39, %v4100_v24  ;;  %v8427_v39 = vadd.s32 216, %v7947_v55  ;;  %v9591_v49 = vmov 0  ;;  %v8655_v10 = vadd.s32 232, %v7947_v55 }
 0x170   : > { %v4111_v11 = vmul.u32 18, %v4110_v14  ;;  %v8430_v24 = vadd.s32 18, %v8392_v56  ;;  %v4154_v14 = vshrl.u32 %v8357_v32, 4  ;;  %vm9544_vm4 = vcmp.ne.s32.totalorder %v8392_v56, 0 }
 0x171   : > { %vm9545_vm13 = vcmp.lt.s32.totalorder %v8392_v56, 0  ;;  %vm9553_vm8 = vcmp.lt.s32.totalorder %v8411_v5, 0 }
 0x1c5   : > { %v8178_v48 = vpop.f32.mrb[0].mxu1 }
 0x1c6   : > { %v8188_v60 = vpop.f32.mrb[1].mxu1 }
 0x1c7   : > { %9501 = vst [vmem:[#allocation13_spill] sm:$0xff] %v8188_v60  ;;  %v8372_v60 = vsub.s32 %v8136_v6, %v4078_v30  ;;  %v4143_v30 = vshrl.u32 %v8271_v36, 4  ;;  %v4132_v6 = vshrl.u32 %v8292_v34, 4 }
 0x1c9   : > { %v8216_v35 = vpop.f32.mrb[2].mxu1  ;;  %9530 = vst [vmem:[#allocation21_spill] sm:$0xff] %v8372_v60  ;;  %vm4317_vm5 = vcmp.ne.s32.totalorder %v8372_v60, 0  ;;  %vm4353_vm7 = vcmp.lt.s32.totalorder %v8372_v60, 0  ;;  %v8420_v36 = vadd.s32 18, %v8372_v60  ;;  %v4144_v34 = vmul.u32 18, %v4143_v30 }
 0x1ca   : > { %9502 = vst [vmem:[#allocation4_spill] sm:$0xff] %v8216_v35  ;;  %v8225_v44 = vpop.f32.mrb[3].mxu1  ;;  %v9527_v35 = vmov 0  ;;  %vm8473_vm1 = vmand %vm4353_vm7, %vm4317_vm5  ;;  %v9586_v60 = vsel %vm8097_vm6, %v8102_v59, %v8014_v37 }
 0x1cb   : > { %9503 = vst [vmem:[#allocation14_spill] sm:$0xff] %v8225_v44  ;;  %v9528_v35 = vsel %vm8367_vm2, 4294967295, %v9527_v35  ;;  %v8453_v32 = vsub.s32 %v8233_v15, %v4144_v34  ;;  %vm8488_vm5 = vmand %vm9545_vm13, %vm9544_vm4  ;;  %v9546_v34 = vmov 0  ;;  %vm9552_vm4 = vcmp.ne.s32.totalorder %v8411_v5, 0 }
 0x1cc   : > { %9529 = vst [vmem:[#allocation20_spill] sm:$0xff] %v9528_v35  ;;  %v9547_v34 = vsel %vm8488_vm5, 4294967295, %v9546_v34 }
 0x1cd   : > { %v8253_v20 = vpop.f32.mrb[4].mxu1  ;;  %9538 = vst [vmem:[#allocation29_spill] sm:$0xff] %v8453_v32 }
 0x1ce   : > { %9504 = vst [vmem:[#allocation15_spill] sm:$0xff] %v8253_v20  ;;  %v8263_v51 = vpop.f32.mrb[5].mxu1  ;;  %v8324_v20 = vadd.s32 18, %v8244_v28 }
 0x1cf   : > { %9506 = vst [vmem:[#allocation6_spill] sm:$0xff] %v8263_v51  ;;  %v8321_v51 = vadd.s32 18, %v8241_v53 }
 0x1d1   : > { %v8297_v45 = vpop.f32.mrb[6].mxu1 }
 0x1d2   : > { %9509 = vst [vmem:[#allocation5_spill] sm:$0xff] %v8297_v45  ;;  %v8310_v26 = vpop.f32.mrb[7].mxu1  ;;  %v9514_v45 = vmov 0 }
 0x1d3   : > { %9512 = vst [vmem:[#allocation17_spill] sm:$0xff] %v8310_v26  ;;  %v9515_v45 = vsel %vm8316_vm15, 4294967295, %v9514_v45  ;;  %v8337_v26 = vmul.u32.u64.low 3817748708, %v8279_v42  ;;  %v8338_v44 = vmul.u32.u64.high 3817748708, %v8279_v42, %v8337_v26  ;;  %vm8515_vm15 = vmand %vm9553_vm8, %vm9552_vm4 }
 0x1d5   : > { %v8359_v26 = vpop.f32.mrb[8].mxu1 }
 0x1d6   : > { %9525 = vst [vmem:[#allocation19_spill] sm:$0xff] %v8359_v26  ;;  %v8375_v41 = vpop.f32.mrb[9].mxu1  ;;  %v8395_v50 = vmul.u32.u64.low 3817748708, %v8341_v43  ;;  %v8396_v26 = vmul.u32.u64.high 3817748708, %v8341_v43, %v8395_v50 }
 0x1d7   : > { %9531 = vst [vmem:[#allocation22_spill] sm:$0xff] %v8375_v41  ;;  %v4122_v50 = vmul.u32 18, %v4121_v47  ;;  %v8414_v41 = vadd.s32 192, %v7947_v55  ;;  %v4165_v47 = vshrl.u32 %v8338_v44, 4 }
 0x1d9   : > { %v8407_v33 = vpop.f32.mrb[10].mxu1  ;;  %v8440_v22 = vsub.s32 %v8223_v61, %v4122_v50  ;;  %v8443_v44 = vmul.u32.u64.low 3817748708, %v8414_v41  ;;  %v8444_v25 = vmul.u32.u64.high 3817748708, %v8414_v41, %v8443_v44  ;;  %v4166_v61 = vmul.u32 18, %v4165_v47 }
 0x1da   : > { %9532 = vst [vmem:[#allocation23_spill] sm:$0xff] %v8407_v33  ;;  %v8416_v27 = vpop.f32.mrb[11].mxu1  ;;  %v4133_v33 = vmul.u32 18, %v4132_v6  ;;  %v4187_v6 = vshrl.u32 %v8396_v26, 4  ;;  %v8466_v50 = vmul.u32.u64.low 3817748708, %v8427_v39  ;;  %v8467_v44 = vmul.u32.u64.high 3817748708, %v8427_v39, %v8466_v50 }
 0x1db   : > { %9533 = vst [vmem:[#allocation24_spill] sm:$0xff] %v8416_v27  ;;  %v8433_v27 = vsub.s32 %v8214_v13, %v4089_v23  ;;  %v8450_v23 = vsub.s32 %v8230_v63, %v4111_v11  ;;  %v8456_v13 = vadd.s32 208, %v7947_v55  ;;  %v4155_v26 = vmul.u32 18, %v4154_v14  ;;  %v9613_v14 = vld [vmem:[#allocation2_spill] sm:$0xff] }
 0x1dc   : > { %v8480_v15 = vsub.s32 %v8251_v57, %v4133_v33  ;;  %v8493_v47 = vadd.s32 18, %v8411_v5  ;;  %v9549_v33 = vsel %vm8059_vm14, %v8010_v17, %v7988_v52  ;;  %v9556_v52 = vsel %vm8074_vm0, %v8033_v62, %v8005_v29 }
 0x1dd   : > { %9534 = vst [vmem:[#allocation25_spill] sm:$0xff] %v8433_v27  ;;  %v8436_v30 = vpop.f32.mrb[12].mxu1  ;;  %9537 = vst [vmem:[#allocation28_spill] sm:$0xff] %v8450_v23  ;;  %v8496_v50 = vadd.s32 18, %v8433_v27  ;;  %vm8507_vm13 = vcmp.lt.s32.totalorder %v9549_v33, 16  ;;  %vm8534_vm8 = vcmp.lt.s32.totalorder %v9556_v52, 16  ;;  %v8547_v33 = vsub.s32 %v8279_v42, %v4166_v61 }
 0x1de   : > { %9535 = vst [vmem:[#allocation26_spill] sm:$0xff] %v8436_v30  ;;  %v8446_v35 = vpop.f32.mrb[13].mxu1  ;;  %9542 = vst [vmem:[#allocation30_spill] sm:$0xff] %v8480_v15  ;;  %vm9559_vm4 = vcmp.ne.s32.totalorder %v8433_v27, 0  ;;  %vm9560_vm7 = vcmp.lt.s32.totalorder %v8433_v27, 0  ;;  %vm9564_vm0 = vcmp.ne.s32.totalorder %v8440_v22, 0  ;;  %v8567_v42 = vsub.s32 %v8295_v1, %v4155_v26 }
 0x1df   : > { %9536 = vst [vmem:[#allocation27_spill] sm:$0xff] %v8446_v35  ;;  %vm8542_vm10 = vmand %vm9560_vm7, %vm9559_vm4  ;;  %v8550_v38 = vmul.u32.u64.low 3817748708, %v8456_v13  ;;  %v8551_v35 = vmul.u32.u64.high 3817748708, %v8456_v13, %v8550_v38  ;;  %vm9565_vm14 = vcmp.lt.s32.totalorder %v8440_v22, 0  ;;  %v8562_v62 = vadd.s32 18, %v8440_v22 }
 0x1e0   : > { %v9562_v21 = vsel %vm8542_vm10, 4294967295, %v9561_v21  ;;  %9563 = vst [vmem:[#allocation33_spill] sm:$0xff] %v8547_v33  ;;  %vm8557_vm2 = vmand %vm9565_vm14, %vm9564_vm0  ;;  %vm9570_vm14 = vcmp.ne.s32.totalorder %v8450_v23, 0  ;;  %vm9571_vm0 = vcmp.lt.s32.totalorder %v8450_v23, 0  ;;  %v8584_v38 = vadd.s32 18, %v8450_v23  ;;  %v9623_v23 = vld [vmem:[#allocation9_spill] sm:$0xff] }
 0x1e1   : > { %v8482_v11 = vpop.f32.mrb[14].mxu1  ;;  %9568 = vst [vmem:[#allocation34_spill] sm:$0xff] %v8567_v42  ;;  %vm8579_vm11 = vmand %vm9571_vm0, %vm9570_vm14  ;;  %v8587_v1 = vadd.s32 18, %v8453_v32  ;;  %v4176_v26 = vshrl.u32 %v8444_v25, 4  ;;  %vm9577_vm14 = vcmp.ne.s32.totalorder %v8453_v32, 0  ;;  %vm9578_vm0 = vcmp.lt.s32.totalorder %v8453_v32, 0 }
 0x1e2   : > { %9543 = vst [vmem:[#allocation31_spill] sm:$0xff] %v8482_v11  ;;  %v8500_v57 = vpop.f32.mrb[15].mxu1  ;;  %v9554_v11 = vmov 0  ;;  %9574 = vst [vmem:[#allocation36_spill] sm:$0xff] %v8584_v38  ;;  %v9579_v25 = vmov 0  ;;  %v9583_v30 = vsel %vm8088_vm3, %v8043_v31, %v8012_v16  ;;  %vm9590_vm10 = vcmp.lt.s32.totalorder %v8480_v15, 0 }
 0x1e3   : > { %9548 = vst [vmem:[#allocation32_spill] sm:$0xff] %v8500_v57  ;;  %v9555_v11 = vsel %vm8515_vm15, 4294967295, %v9554_v11  ;;  %v4188_v57 = vmul.u32 18, %v4187_v6  ;;  %9575 = vst [vmem:[#allocation37_spill] sm:$0xff] %v8587_v1  ;;  %v8613_v6 = vadd.s32 18, %v8480_v15  ;;  %vm8621_vm7 = vcmp.lt.s32.totalorder %v9583_v30, 16 }
 0x1e4   : > { %vm8608_vm4 = vmand %vm9578_vm0, %vm9577_vm14  ;;  %vm8630_vm14 = vcmp.lt.s32.totalorder %v9586_v60, 16  ;;  %vm9589_vm0 = vcmp.ne.s32.totalorder %v8480_v15, 0  ;;  %vm4325_vm3 = vcmp.ne.s32.totalorder %v8547_v33, 0  ;;  %vm4361_vm5 = vcmp.lt.s32.totalorder %v8547_v33, 0  ;;  %v9602_v32 = vld [vmem:[#allocation7_spill] sm:$0xff] }
 0x1e5   : > { %v8569_v61 = vpop.f32.mrb[16].mxu1  ;;  %v9580_v25 = vsel %vm8608_vm4, 4294967295, %v9579_v25  ;;  %9582 = vst [vmem:[#allocation40_spill] sm:$0xff] %v8613_v6  ;;  %vm8638_vm15 = vmand %vm9590_vm10, %vm9589_vm0  ;;  %v8645_v16 = vsub.s32 %v8341_v43, %v4188_v57  ;;  %v4209_v37 = vshrl.u32 %v8467_v44, 4  ;;  %vm4324_vm6 = vcmp.ne.s32.totalorder %v8567_v42, 0 }
 0x1e6   : > { %9569 = vst [vmem:[#allocation35_spill] sm:$0xff] %v8569_v61  ;;  %v8590_v61 = vpop.f32.mrb[17].mxu1  ;;  %9581 = vst [vmem:[#allocation39_spill] sm:$0xff] %v9580_v25  ;;  %v9592_v49 = vsel %vm8638_vm15, 4294967295, %v9591_v49  ;;  %vm4360_vm10 = vcmp.lt.s32.totalorder %v8567_v42, 0  ;;  %v4177_v60 = vmul.u32 18, %v4176_v26  ;;  %v9599_v6 = vsel %vm8107_vm9, %v8112_v9, %v8036_v2 }
 0x1e7   : > { %9576 = vst [vmem:[#allocation38_spill] sm:$0xff] %v8590_v61  ;;  %9593 = vst [vmem:[#allocation41_spill] sm:$0xff] %v9592_v49  ;;  %v8666_v30 = vadd.s32 224, %v7947_v55  ;;  %v9594_v26 = vmov 0  ;;  %v8686_v59 = vadd.s32 18, %v8547_v33  ;;  %v8689_v43 = vadd.s32 18, %v8567_v42 }
 0x1e8   : > { %vm8681_vm0 = vmand %vm4361_vm5, %vm4325_vm3  ;;  %v8692_v31 = vadd.s32 248, %v7947_v55  ;;  %vm8700_vm5 = vcmp.lt.s32.totalorder %v9599_v6, 16  ;;  %v9603_v1 = vsel %vm8131_vm12, %v8115_v3, %v9602_v32  ;;  %v9606_v2 = vmov 0  ;;  %v9609_v9 = vld [vmem:[#allocation13_spill] sm:$0xff]  ;;  %v9615_v33 = vld [vmem:[#allocation10_spill] sm:$0xff] }
 0x1e9   : > { %v9595_v26 = vsel %vm8681_vm0, 4294967295, %v9594_v26  ;;  %9597 = vst [vmem:[#allocation43_spill] sm:$0xff] %v8686_v59  ;;  %9598 = vst [vmem:[#allocation44_spill] sm:$0xff] %v8689_v43  ;;  %vm8709_vm3 = vcmp.lt.s32.totalorder %v9603_v1, 16  ;;  %vm4327_vm9 = vcmp.ne.s32.totalorder %v8645_v16, 0  ;;  %vm4363_vm4 = vcmp.lt.s32.totalorder %v8645_v16, 0 }
 0x1ea   : > { %v6112_v44 = vpop.f32.mrb[0].mxu0  ;;  %9596 = vst [vmem:[#allocation42_spill] sm:$0xff] %v9595_v26  ;;  %vm8717_vm15 = vmand %vm4360_vm10, %vm4324_vm6  ;;  %v4210_v12 = vmul.u32 18, %v4209_v37  ;;  %v4198_v54 = vshrl.u32 %v8551_v35, 4  ;;  %v8733_v1 = vadd.s32 18, %v8645_v16  ;;  %v8739_v37 = vadd.s32 240, %v7947_v55 }
 0x1eb   : > { %v6166_v57 = vadd.f32 %v6112_v44, %v8178_v48  ;;  %v3616_v15 = vpop.f32.mrb[1].mxu0  ;;  %v9607_v2 = vsel %vm8717_vm15, 4294967295, %v9606_v2  ;;  %v8726_v48 = vmul.u32.u64.low 3817748708, %v8655_v10  ;;  %v8727_v32 = vmul.u32.u64.high 3817748708, %v8655_v10, %v8726_v48  ;;  %vm8756_vm12 = vmand %vm4363_vm4, %vm4327_vm9  ;;  %v9616_v59 = vld [vmem:[#allocation8_spill] sm:$0xff]  ;;  %v9620_v42 = vld [vmem:[#allocation3_spill] sm:$0xff] }
 0x1ec   : > { %9608 = vst [vmem:[#allocation7_spill] sm:$0xff] %v9607_v2  ;;  %v6167_v3 = vadd.f32 %v3616_v15, %v9609_v9  ;;  %v8736_v44 = vsub.s32 %v8414_v41, %v4177_v60  ;;  %vm9621_vm4 = vnez %v9620_v42  ;;  %v9622_v43 = vld [vmem:[#allocation11_spill] sm:$0xff]  ;;  %v8794_v42 = vadd.s32 264, %v7947_v55  ;;  %v9630_v61 = vld [vmem:[#allocation12_spill] sm:$0xff] }
 0x1ed   : > { %v4663_v6 = vsel %vm8507_vm13, %v6166_v57, 0.0  ;;  %4820 = vst [vmem:[%s8671_s5 + $0x8] sm:$0xff] %v6166_v57  ;;  %vm9614_vm13 = vnez %v9613_v14  ;;  %v9624_v38 = vsel %vm9621_vm4, %v9622_v43, %v9623_v23  ;;  %v4471_v23 = vsel %vm8756_vm12, %v8733_v1, %v8645_v16 }
 0x1ee   : > { %v4740_v15 = vmul.f32 %v4663_v6, %v4663_v6  ;;  %v4662_v35 = vsel %vm8534_vm8, %v6167_v3, 0.0  ;;  %4819 = vst [vmem:[%s8671_s5] sm:$0xff] %v6167_v3  ;;  %v6115_v9 = vpop.f32.mrb[2].mxu0  ;;  %v9612_v3 = vld [vmem:[#allocation4_spill] sm:$0xff]  ;;  %v9617_v2 = vsel %vm9614_vm13, %v9615_v33, %v9616_v59  ;;  %vm8775_vm6 = vcmp.lt.s32.totalorder %v9624_v38, 16 }
 0x1ef   : > { %v4698_v60 = vadd.f32 %v4663_v6, %v4662_v35  ;;  %v4739_v57 = vmul.f32 %v4662_v35, %v4662_v35  ;;  %v6168_v48 = vadd.f32 %v6115_v9, %v9612_v3  ;;  %v3626_v26 = vpop.f32.mrb[3].mxu0  ;;  %vm8766_vm8 = vcmp.lt.s32.totalorder %v9617_v2, 16  ;;  %v9627_v9 = vld [vmem:[#allocation14_spill] sm:$0xff]  ;;  %v9653_v6 = vld [vmem:[#allocation19_spill] sm:$0xff] }
 0x1f0   : > { %v8780_v35 = vsub.s32 %v8427_v39, %v4210_v12  ;;  %v6169_v14 = vadd.f32 %v3626_v26, %v9627_v9  ;;  %v4199_v3 = vmul.u32 18, %v4198_v54  ;;  %v8803_v26 = vadd.s32 18, %v8736_v44 }
 0x1f1   : > { %v8784_v33 = vmul.u32.u64.low 3817748708, %v8666_v30  ;;  %v8785_v59 = vmul.u32.u64.high 3817748708, %v8666_v30, %v8784_v33  ;;  %v4775_v2 = vadd.f32 %v4740_v15, %v4739_v57  ;;  %4822 = vst [vmem:[%s8671_s5 + $0x18] sm:$0xff] %v6168_v48  ;;  %v4665_v39 = vsel %vm8621_vm7, %v6168_v48, 0.0  ;;  %v9628_v15 = vld [vmem:[#allocation15_spill] sm:$0xff] }
 0x1f2   : > { %v4664_v38 = vsel %vm8630_vm14, %v6169_v14, 0.0  ;;  %4821 = vst [vmem:[%s8671_s5 + $0x10] sm:$0xff] %v6169_v14  ;;  %v6118_v43 = vpop.f32.mrb[4].mxu0  ;;  %vm9629_vm13 = vnez %v9508_v18  ;;  %vm9634_vm14 = vnez %v9511_v0  ;;  %v9638_v33 = vld [vmem:[#allocation6_spill] sm:$0xff]  ;;  %v4742_v0 = vmul.f32 %v4665_v39, %v4665_v39 }
 0x1f3   : > { %v4699_v12 = vadd.f32 %v4698_v60, %v4664_v38  ;;  %v4741_v54 = vmul.f32 %v4664_v38, %v4664_v38  ;;  %v6170_v57 = vadd.f32 %v6118_v43, %v9628_v15  ;;  %v3636_v9 = vpop.f32.mrb[5].mxu0  ;;  %v9631_v27 = vsel %vm9629_vm13, %v8211_v8, %v9630_v61  ;;  %v9675_v60 = vld [vmem:[#allocation21_spill] sm:$0xff] }
 0x1f4   : > { %vm8811_vm7 = vcmp.lt.s32.totalorder %v9631_v27, 16  ;;  %v9635_v14 = vsel %vm9634_vm14, %v8236_v7, %v8200_v4  ;;  %v6171_v18 = vadd.f32 %v3636_v9, %v9638_v33  ;;  %v8828_v8 = vadd.s32 18, %v8780_v35  ;;  %v9648_v33 = vld [vmem:[#allocation17_spill] sm:$0xff] }
 0x1f5   : > { %vm8820_vm4 = vcmp.lt.s32.totalorder %v9635_v14, 16  ;;  %v8831_v38 = vsub.s32 %v8456_v13, %v4199_v3  ;;  %v4776_v43 = vadd.f32 %v4775_v2, %v4741_v54  ;;  %4824 = vst [vmem:[%s8671_s5 + $0x28] sm:$0xff] %v6170_v57  ;;  %v4700_v4 = vadd.f32 %v4699_v12, %v4665_v39  ;;  %v9639_v54 = vld [vmem:[#allocation5_spill] sm:$0xff] }
 0x1f6   : > { %v4231_v7 = vshrl.u32 %v8727_v32, 4  ;;  %v4667_v15 = vsel %vm8700_vm5, %v6170_v57, 0.0  ;;  %v4666_v9 = vsel %vm8709_vm3, %v6171_v18, 0.0  ;;  %4823 = vst [vmem:[%s8671_s5 + $0x20] sm:$0xff] %v6171_v18  ;;  %v6121_v61 = vpop.f32.mrb[6].mxu0  ;;  %vm9640_vm13 = vnez %v9515_v45  ;;  %v9726_v57 = vld [vmem:[#allocation43_spill] sm:$0xff] }
 0x1f7   : > { %v8841_v27 = vmul.u32.u64.low 3817748708, %v8692_v31  ;;  %v8842_v14 = vmul.u32.u64.high 3817748708, %v8692_v31, %v8841_v27  ;;  %v4701_v13 = vadd.f32 %v4700_v4, %v4666_v9  ;;  %v4743_v3 = vmul.f32 %v4666_v9, %v4666_v9  ;;  %v3646_v32 = vpop.f32.mrb[7].mxu0 }
 0x1f8   : > { %v4777_v2 = vadd.f32 %v4776_v43, %v4742_v0  ;;  %v6172_v39 = vadd.f32 %v6121_v61, %v9639_v54  ;;  %v9641_v25 = vsel %vm9640_vm13, %v8274_v58, %v8203_v19  ;;  %vm9644_vm3 = vnez %v9519_v40  ;;  %v9658_v54 = vld [vmem:[#allocation20_spill] sm:$0xff] }
 0x1f9   : > { %vm8850_vm5 = vcmp.lt.s32.totalorder %v9641_v25, 16  ;;  %v9645_v12 = vsel %vm9644_vm3, %v8321_v51, %v8241_v53  ;;  %v6173_v18 = vadd.f32 %v3646_v32, %v9648_v33  ;;  %v8867_v58 = vadd.s32 18, %v8831_v38  ;;  %v9661_v32 = vld [vmem:[#allocation16_spill] sm:$0xff] }
 0x1fa   : > { %vm8859_vm14 = vcmp.lt.s32.totalorder %v9645_v12, 16  ;;  %v4744_v19 = vmul.f32 %v4667_v15, %v4667_v15  ;;  %v4778_v45 = vadd.f32 %v4777_v2, %v4743_v3  ;;  %4826 = vst [vmem:[%s8671_s5 + $0x38] sm:$0xff] %v6172_v39  ;;  %v4702_v40 = vadd.f32 %v4701_v13, %v4667_v15  ;;  %v6124_v43 = vpop.f32.mrb[8].mxu0 }
 0x1fb   : > { %v4232_v0 = vmul.u32 18, %v4231_v7  ;;  %v4669_v53 = vsel %vm8766_vm8, %v6172_v39, 0.0  ;;  %v4668_v51 = vsel %vm8775_vm6, %v6173_v18, 0.0  ;;  %4825 = vst [vmem:[%s8671_s5 + $0x30] sm:$0xff] %v6173_v18  ;;  %vm9649_vm13 = vcmp.ne.s32.totalorder %v8736_v44, 0  ;;  %v3656_v13 = vpop.f32.mrb[9].mxu0 }
 0x1fc   : > { %vm9650_vm3 = vcmp.lt.s32.totalorder %v8736_v44, 0  ;;  %v8884_v15 = vmul.u32.u64.low 3817748708, %v8739_v37  ;;  %v8885_v7 = vmul.u32.u64.high 3817748708, %v8739_v37, %v8884_v15  ;;  %v4703_v41 = vadd.f32 %v4702_v40, %v4668_v51  ;;  %v9660_v39 = vld [vmem:[#allocation18_spill] sm:$0xff] }
 0x1fd   : > { %vm8879_vm9 = vmand %vm9650_vm3, %vm9649_vm13  ;;  %v4745_v9 = vmul.f32 %v4668_v51, %v4668_v51  ;;  %v4779_v61 = vadd.f32 %v4778_v45, %v4744_v19  ;;  %v6174_v27 = vadd.f32 %v6124_v43, %v9653_v6  ;;  %vm9654_vm8 = vnez %v9523_v46 }
 0x1fe   : > { %v9655_v3 = vsel %vm9654_vm8, %v8324_v20, %v8244_v28  ;;  %vm9659_vm13 = vnez %v9658_v54  ;;  %vm9665_vm10 = vcmp.ne.s32.totalorder %v8780_v35, 0  ;;  %vm9666_vm12 = vcmp.lt.s32.totalorder %v8780_v35, 0  ;;  %v9669_v28 = vld [vmem:[#allocation22_spill] sm:$0xff]  ;;  %v9674_v54 = vld [vmem:[#allocation23_spill] sm:$0xff] }
 0x1ff   : > { %vm8893_vm6 = vcmp.lt.s32.totalorder %v9655_v3, 16  ;;  %v9662_v25 = vsel %vm9659_vm13, %v9660_v39, %v9661_v32  ;;  %vm8910_vm15 = vmand %vm9666_vm12, %vm9665_vm10  ;;  %v6175_v20 = vadd.f32 %v3656_v13, %v9669_v28  ;;  %v4220_v33 = vshrl.u32 %v8785_v59, 4  ;;  %4828 = vst [vmem:[%s8671_s5 + $0x48] sm:$0xff] %v6174_v27 }
 0x200   : > { %vm8902_vm3 = vcmp.lt.s32.totalorder %v9662_v25, 16  ;;  %v8917_v18 = vmul.u32.u64.low 3817748708, %v8794_v42  ;;  %v8918_v19 = vmul.u32.u64.high 3817748708, %v8794_v42, %v8917_v18  ;;  %v4746_v45 = vmul.f32 %v4669_v53, %v4669_v53  ;;  %v9683_v25 = vld [vmem:[#allocation24_spill] sm:$0xff] }
 0x201   : > { %v4780_v40 = vadd.f32 %v4779_v61, %v4745_v9  ;;  %v4704_v51 = vadd.f32 %v4703_v41, %v4669_v53  ;;  %v4470_v43 = vsel %vm8879_vm9, %v8803_v26, %v8736_v44  ;;  %vm9670_vm12 = vcmp.ne.s32.totalorder %v8831_v38, 0  ;;  %4827 = vst [vmem:[%s8671_s5 + $0x40] sm:$0xff] %v6175_v20  ;;  %v6127_v53 = vpop.f32.mrb[10].mxu0 }
 0x202   : > { %vm9671_vm10 = vcmp.lt.s32.totalorder %v8831_v38, 0  ;;  %v4671_v59 = vsel %vm8811_vm7, %v6174_v27, 0.0  ;;  %v4670_v9 = vsel %vm8820_vm4, %v6175_v20, 0.0  ;;  %v4473_v41 = vsel %vm8910_vm15, %v8828_v8, %v8780_v35  ;;  %v3666_v27 = vpop.f32.mrb[11].mxu0 }
 0x203   : > { %vm8929_vm8 = vmand %vm9671_vm10, %vm9670_vm12  ;;  %v8943_v61 = vsub.s32 %v8655_v10, %v4232_v0  ;;  %v4705_v6 = vadd.f32 %v4704_v51, %v4670_v9  ;;  %v4747_v13 = vmul.f32 %v4670_v9, %v4670_v9  ;;  %v4781_v3 = vadd.f32 %v4780_v40, %v4746_v45  ;;  %v6130_v51 = vpop.f32.mrb[12].mxu0  ;;  %v9710_v0 = vld [vmem:[#allocation37_spill] sm:$0xff] }
 0x204   : > { %v6176_v48 = vadd.f32 %v6127_v53, %v9674_v54  ;;  %v9676_v39 = vsel %vm8473_vm1, %v8420_v36, %v9675_v60  ;;  %vm9679_vm4 = vnez %v9547_v34  ;;  %v6177_v28 = vadd.f32 %v3666_v27, %v9683_v25 }
 0x205   : > { %vm8951_vm7 = vcmp.lt.s32.totalorder %v9676_v39, 16  ;;  %v9680_v10 = vsel %vm9679_vm4, %v8430_v24, %v8392_v56  ;;  %v4472_v36 = vsel %vm8929_vm8, %v8867_v58, %v8831_v38  ;;  %v4221_v63 = vmul.u32 18, %v4220_v33 }
 0x206   : > { %vm8960_vm13 = vcmp.lt.s32.totalorder %v9680_v10, 16  ;;  %v4253_v20 = vshrl.u32 %v8842_v14, 4  ;;  %v4748_v18 = vmul.f32 %v4671_v59, %v4671_v59  ;;  %v4782_v45 = vadd.f32 %v4781_v3, %v4747_v13  ;;  %4830 = vst [vmem:[%s8671_s5 + $0x58] sm:$0xff] %v6176_v48  ;;  %4829 = vst [vmem:[%s8671_s5 + $0x50] sm:$0xff] %v6177_v28  ;;  %v9690_v13 = vld [vmem:[#allocation25_spill] sm:$0xff] }
 0x207   : > { %v4706_v34 = vadd.f32 %v4705_v6, %v4671_v59  ;;  %v8972_v56 = vadd.s32 256, %v7947_v55  ;;  %v4673_v24 = vsel %vm8850_vm5, %v6176_v48, 0.0  ;;  %v4672_v40 = vsel %vm8859_vm14, %v6177_v28, 0.0  ;;  %v9684_v59 = vld [vmem:[#allocation26_spill] sm:$0xff]  ;;  %v3676_v6 = vpop.f32.mrb[13].mxu0  ;;  %v9694_v48 = vld [vmem:[#allocation27_spill] sm:$0xff] }
 0x208   : > { %vm4331_vm1 = vcmp.ne.s32.totalorder %v8943_v61, 0  ;;  %vm4367_vm12 = vcmp.lt.s32.totalorder %v8943_v61, 0  ;;  %v4749_v33 = vmul.f32 %v4672_v40, %v4672_v40  ;;  %v4783_v9 = vadd.f32 %v4782_v45, %v4748_v18  ;;  %v6133_v28 = vpop.f32.mrb[14].mxu0 }
 0x209   : > { %v4707_v14 = vadd.f32 %v4706_v34, %v4672_v40  ;;  %v6178_v53 = vadd.f32 %v6130_v51, %v9684_v59  ;;  %vm9685_vm10 = vnez %v9555_v11  ;;  %vm9689_vm14 = vnez %v9562_v21  ;;  %v9697_v40 = vld [vmem:[#allocation31_spill] sm:$0xff] }
 0x20a   : > { %v9686_v49 = vsel %vm9685_vm10, %v8493_v47, %v8411_v5  ;;  %v9691_v3 = vsel %vm9689_vm14, %v8496_v50, %v9690_v13  ;;  %v6179_v27 = vadd.f32 %v3676_v6, %v9694_v48  ;;  %v9002_v11 = vadd.s32 18, %v8943_v61  ;;  %vm9015_vm10 = vmand %vm4367_vm12, %vm4331_vm1 }
 0x20b   : > { %vm8987_vm5 = vcmp.lt.s32.totalorder %v9686_v49, 16  ;;  %vm8996_vm4 = vcmp.lt.s32.totalorder %v9691_v3, 16  ;;  %v9005_v5 = vsub.s32 %v8666_v30, %v4221_v63  ;;  %v9008_v47 = vadd.s32 280, %v7947_v55  ;;  %4832 = vst [vmem:[%s8671_s5 + $0x68] sm:$0xff] %v6178_v53 }
 0x20c   : > { %v4750_v60 = vmul.f32 %v4673_v24, %v4673_v24  ;;  %v4784_v21 = vadd.f32 %v4783_v9, %v4749_v33  ;;  %v4708_v39 = vadd.f32 %v4707_v14, %v4673_v24  ;;  %v9020_v10 = vadd.s32 272, %v7947_v55  ;;  %4831 = vst [vmem:[%s8671_s5 + $0x60] sm:$0xff] %v6179_v27  ;;  %v3686_v55 = vpop.f32.mrb[15].mxu0  ;;  %v9706_v9 = vld [vmem:[#allocation32_spill] sm:$0xff] }
 0x20d   : > { %v4675_v30 = vsel %vm8893_vm6, %v6178_v53, 0.0  ;;  %v4674_v25 = vsel %vm8902_vm3, %v6179_v27, 0.0  ;;  %v4254_v63 = vmul.u32 18, %v4253_v20  ;;  %v4242_v18 = vshrl.u32 %v8885_v7, 4  ;;  %v9701_v20 = vld [vmem:[#allocation36_spill] sm:$0xff]  ;;  %v6136_v13 = vpop.f32.mrb[16].mxu0 }
 0x20e   : > { %v4709_v45 = vadd.f32 %v4708_v39, %v4674_v25  ;;  %v4751_v34 = vmul.f32 %v4674_v25, %v4674_v25  ;;  %v4785_v24 = vadd.f32 %v4784_v21, %v4750_v60  ;;  %v6180_v51 = vadd.f32 %v6133_v28, %v9697_v40  ;;  %v9702_v7 = vld [vmem:[#allocation28_spill] sm:$0xff]  ;;  %v9707_v21 = vld [vmem:[#allocation35_spill] sm:$0xff]  ;;  %v3696_v32 = vpop.f32.mrb[17].mxu0  ;;  %v9711_v25 = vld [vmem:[#allocation29_spill] sm:$0xff] }
 0x20f   : > { %v9698_v2 = vsel %vm8557_vm2, %v8562_v62, %v8440_v22  ;;  %v9703_v14 = vsel %vm8579_vm11, %v9701_v20, %v9702_v7  ;;  %v6181_v59 = vadd.f32 %v3686_v55, %v9706_v9  ;;  %v4475_v22 = vsel %vm9015_vm10, %v9002_v11, %v8943_v61 }
 0x210   : > { %vm9034_vm6 = vcmp.lt.s32.totalorder %v9698_v2, 16  ;;  %vm9043_vm3 = vcmp.lt.s32.totalorder %v9703_v14, 16  ;;  %vm4330_vm2 = vcmp.ne.s32.totalorder %v9005_v5, 0  ;;  %v4275_v29 = vshrl.u32 %v8918_v19, 4  ;;  %4834 = vst [vmem:[%s8671_s5 + $0x78] sm:$0xff] %v6180_v51 }
 0x211   : > { %v4752_v62 = vmul.f32 %v4675_v30, %v4675_v30  ;;  %v4786_v52 = vadd.f32 %v4785_v24, %v4751_v34  ;;  %v4710_v53 = vadd.f32 %v4709_v45, %v4675_v30  ;;  %vm4366_vm11 = vcmp.lt.s32.totalorder %v9005_v5, 0  ;;  %4833 = vst [vmem:[%s8671_s5 + $0x70] sm:$0xff] %v6181_v59  ;;  %v9708_v30 = vld [vmem:[#allocation39_spill] sm:$0xff]  ;;  %v9715_v34 = vld [vmem:[#allocation41_spill] sm:$0xff] }
 0x212   : > { %v4677_v6 = vsel %vm8951_vm7, %v6180_v51, 0.0  ;;  %v4676_v49 = vsel %vm8960_vm13, %v6181_v59, 0.0  ;;  %v9062_v3 = vadd.s32 18, %v9005_v5  ;;  %v9065_v19 = vsub.s32 %v8692_v31, %v4254_v63  ;;  %v9717_v31 = vld [vmem:[#allocation40_spill] sm:$0xff]  ;;  %v9718_v63 = vld [vmem:[#allocation30_spill] sm:$0xff]  ;;  %vm9096_vm14 = vmand %vm4366_vm11, %vm4330_vm2 }
 0x213   : > { %v4711_v48 = vadd.f32 %v4710_v53, %v4676_v49  ;;  %v4753_v27 = vmul.f32 %v4676_v49, %v4676_v49  ;;  %v4787_v60 = vadd.f32 %v4786_v52, %v4752_v62  ;;  %v6182_v39 = vadd.f32 %v6136_v13, %v9707_v21  ;;  %v9722_v51 = vld [vmem:[#allocation38_spill] sm:$0xff]  ;;  %v5915_v62 = vpop.f32.mrb[18].mxu1  ;;  %v6139_v13 = vpop.f32.mrb[18].mxu0 }
 0x214   : > { %vm9709_vm7 = vnez %v9708_v30  ;;  %vm9716_vm1 = vnez %v9715_v34  ;;  %v6183_v55 = vadd.f32 %v3696_v32, %v9722_v51  ;;  %v4243_v2 = vmul.u32 18, %v4242_v18  ;;  %v9733_v34 = vld [vmem:[#allocation44_spill] sm:$0xff] }
 0x215   : > { %v9712_v28 = vsel %vm9709_vm7, %v9710_v0, %v9711_v25  ;;  %v9719_v24 = vsel %vm9716_vm1, %v9717_v31, %v9718_v63  ;;  %v9088_v20 = vmul.u32.u64.low 3817748708, %v8972_v56  ;;  %v9089_v7 = vmul.u32.u64.high 3817748708, %v8972_v56, %v9088_v20  ;;  %4836 = vst [vmem:[%s8671_s5 + $0x88] sm:$0xff] %v6182_v39  ;;  %v9734_v31 = vld [vmem:[#allocation34_spill] sm:$0xff] }
 0x216   : > { %vm9073_vm13 = vcmp.lt.s32.totalorder %v9712_v28, 16  ;;  %vm9082_vm12 = vcmp.lt.s32.totalorder %v9719_v24, 16  ;;  %v4754_v14 = vmul.f32 %v4677_v6, %v4677_v6  ;;  %v4788_v9 = vadd.f32 %v4787_v60, %v4753_v27  ;;  %4835 = vst [vmem:[%s8671_s5 + $0x80] sm:$0xff] %v6183_v55  ;;  %v9731_v28 = vld [vmem:[#allocation7_spill] sm:$0xff] }
 0x217   : > { %v4712_v59 = vadd.f32 %v4711_v48, %v4677_v6  ;;  %v4276_v53 = vmul.u32 18, %v4275_v29  ;;  %v4679_v18 = vsel %vm8987_vm5, %v6182_v39, 0.0  ;;  %v4678_v49 = vsel %vm8996_vm4, %v6183_v55, 0.0  ;;  %v2119_v6 = vpop.f32.mrb[19].mxu1  ;;  %v3706_v29 = vpop.f32.mrb[19].mxu0  ;;  %v9727_v39 = vld [vmem:[#allocation33_spill] sm:$0xff] }
 0x218   : > { %v9106_v48 = vmul.u32.u64.low 3817748708, %v9008_v47  ;;  %v9107_v27 = vmul.u32.u64.high 3817748708, %v9008_v47, %v9106_v48  ;;  %v4755_v21 = vmul.f32 %v4678_v49, %v4678_v49  ;;  %v4789_v32 = vadd.f32 %v4788_v9, %v4754_v14 }
 0x219   : > { %v4713_v60 = vadd.f32 %v4712_v59, %v4678_v49  ;;  %v6184_v30 = vadd.f32 %v6139_v13, %v5915_v62  ;;  %v9728_v54 = vsel %vm8681_vm0, %v9726_v57, %v9727_v39  ;;  %vm9732_vm4 = vnez %v9731_v28  ;;  %v5918_v49 = vpop.f32.mrb[20].mxu1 }
 0x21a   : > { %vm9114_vm5 = vcmp.lt.s32.totalorder %v9728_v54, 16  ;;  %v9735_v63 = vsel %vm9732_vm4, %v9733_v34, %v9734_v31  ;;  %v6185_v51 = vadd.f32 %v3706_v29, %v2119_v6  ;;  %v4474_v55 = vsel %vm9096_vm14, %v9062_v3, %v9005_v5  ;;  %v6142_v29 = vpop.f32.mrb[20].mxu0  ;;  %v2129_v0 = vpop.f32.mrb[21].mxu1 }
 0x21b   : > { %vm9123_vm2 = vcmp.lt.s32.totalorder %v9735_v63, 16  ;;  %v9132_v20 = vmul.u32.u64.low 3817748708, %v9020_v10  ;;  %v9133_v14 = vmul.u32.u64.high 3817748708, %v9020_v10, %v9132_v20  ;;  %v4756_v9 = vmul.f32 %v4679_v18, %v4679_v18  ;;  %4838 = vst [vmem:[%s8671_s5 + $0x98] sm:$0xff] %v6184_v30  ;;  %v5921_v57 = vpop.f32.mrb[22].mxu1 }
 0x21c   : > { %v4790_v59 = vadd.f32 %v4789_v32, %v4755_v21  ;;  %v4714_v62 = vadd.f32 %v4713_v60, %v4679_v18  ;;  %v9137_v13 = vsub.s32 %v8739_v37, %v4243_v2  ;;  %v4681_v6 = vsel %vm9034_vm6, %v6184_v30, 0.0  ;;  %4837 = vst [vmem:[%s8671_s5 + $0x90] sm:$0xff] %v6185_v51  ;;  %v3716_v37 = vpop.f32.mrb[21].mxu0  ;;  %v2139_v39 = vpop.f32.mrb[23].mxu1 }
 0x21d   : > { %v4680_v48 = vsel %vm9043_vm3, %v6185_v51, 0.0  ;;  %vm4333_vm0 = vcmp.ne.s32.totalorder %v9065_v19, 0  ;;  %vm4369_vm11 = vcmp.lt.s32.totalorder %v9065_v19, 0  ;;  %v6186_v32 = vadd.f32 %v6142_v29, %v5918_v49  ;;  %v5924_v20 = vpop.f32.mrb[24].mxu1 }
 0x21e   : > { %v4715_v21 = vadd.f32 %v4714_v62, %v4680_v48  ;;  %v4757_v18 = vmul.f32 %v4680_v48, %v4680_v48  ;;  %v4791_v60 = vadd.f32 %v4790_v59, %v4756_v9  ;;  %vm9151_vm6 = vcmp.lt.s32.totalorder %v4471_v23, 16  ;;  %vm9182_vm1 = vmand %vm4369_vm11, %vm4333_vm0  ;;  %v2149_v9 = vpop.f32.mrb[25].mxu1 }
 0x21f   : > { %vm9160_vm3 = vcmp.lt.s32.totalorder %v4470_v43, 16  ;;  %v6187_v2 = vadd.f32 %v3716_v37, %v2129_v0  ;;  %v9165_v30 = vadd.s32 18, %v9065_v19  ;;  %v9168_v17 = vsub.s32 %v8794_v42, %v4276_v53  ;;  %4840 = vst [vmem:[%s8671_s5 + $0xa8] sm:$0xff] %v6186_v32  ;;  %v6145_v43 = vpop.f32.mrb[22].mxu0 }
 0x220   : > { %v4264_v16 = vshrl.u32 %v9089_v7, 4  ;;  %v4758_v1 = vmul.f32 %v4681_v6, %v4681_v6  ;;  %v4792_v23 = vadd.f32 %v4791_v60, %v4757_v18  ;;  %v4716_v4 = vadd.f32 %v4715_v21, %v4681_v6  ;;  %v3726_v28 = vpop.f32.mrb[23].mxu0  ;;  %v5927_v21 = vpop.f32.mrb[26].mxu1 }
 0x221   : > { %vm4332_vm9 = vcmp.ne.s32.totalorder %v9137_v13, 0  ;;  %v4683_v44 = vsel %vm9073_vm13, %v6186_v32, 0.0  ;;  %v4682_v26 = vsel %vm9082_vm12, %v6187_v2, 0.0  ;;  %4839 = vst [vmem:[%s8671_s5 + $0xa0] sm:$0xff] %v6187_v2  ;;  %vm4368_vm4 = vcmp.lt.s32.totalorder %v9137_v13, 0 }
 0x222   : > { %v4297_v45 = vshrl.u32 %v9107_v27, 4  ;;  %v4717_v7 = vadd.f32 %v4716_v4, %v4682_v26  ;;  %v4759_v53 = vmul.f32 %v4682_v26, %v4682_v26  ;;  %v4793_v40 = vadd.f32 %v4792_v23, %v4758_v1  ;;  %vm9217_vm15 = vmand %vm4368_vm4, %vm4332_vm9 }
 0x223   : > { %v6188_v54 = vadd.f32 %v6145_v43, %v5921_v57  ;;  %vm9193_vm13 = vcmp.lt.s32.totalorder %v4473_v41, 16  ;;  %vm9202_vm12 = vcmp.lt.s32.totalorder %v4472_v36, 16  ;;  %v6189_v31 = vadd.f32 %v3726_v28, %v2139_v39 }
 0x224   : > { %v4440_v46 = vadd.s32 18, %v9137_v13  ;;  %v4265_v63 = vmul.u32 18, %v4264_v16  ;;  %v4286_v35 = vshrl.u32 %v9133_v14, 4  ;;  %v4760_v8 = vmul.f32 %v4683_v44, %v4683_v44  ;;  %v6148_v14 = vpop.f32.mrb[24].mxu0 }
 0x225   : > { %v4794_v41 = vadd.f32 %v4793_v40, %v4759_v53  ;;  %4842 = vst [vmem:[%s8671_s5 + $0xb8] sm:$0xff] %v6188_v54  ;;  %v4718_v51 = vadd.f32 %v4717_v7, %v4683_v44  ;;  %v4477_v38 = vsel %vm9182_vm1, %v9165_v30, %v9065_v19  ;;  %v4685_v15 = vsel %vm9114_vm5, %v6188_v54, 0.0  ;;  %4841 = vst [vmem:[%s8671_s5 + $0xb0] sm:$0xff] %v6189_v31  ;;  %v3736_v48 = vpop.f32.mrb[25].mxu0 }
 0x226   : > { %v4684_v36 = vsel %vm9123_vm2, %v6189_v31, 0.0  ;;  %vm4335_vm8 = vcmp.ne.s32.totalorder %v9168_v17, 0  ;;  %v4298_v19 = vmul.u32 18, %v4297_v45  ;;  %v6190_v6 = vadd.f32 %v6148_v14, %v5924_v20 }
 0x227   : > { %v4719_v59 = vadd.f32 %v4718_v51, %v4684_v36  ;;  %v4761_v62 = vmul.f32 %v4684_v36, %v4684_v36  ;;  %v4795_v49 = vadd.f32 %v4794_v41, %v4760_v8  ;;  %vm9232_vm5 = vcmp.lt.s32.totalorder %v4475_v22, 16 }
 0x228   : > { %vm9241_vm2 = vcmp.lt.s32.totalorder %v4474_v55, 16  ;;  %v6191_v29 = vadd.f32 %v3736_v48, %v2149_v9  ;;  %v4476_v50 = vsel %vm9217_vm15, %v4440_v46, %v9137_v13  ;;  %v9249_v61 = vsub.s32 %v8972_v56, %v4265_v63  ;;  %4844 = vst [vmem:[%s8671_s5 + $0xc8] sm:$0xff] %v6190_v6  ;;  %v6151_v55 = vpop.f32.mrb[26].mxu0  ;;  %v2159_v13 = vpop.f32.mrb[27].mxu1 }
 0x229   : > { %v4287_v11 = vmul.u32 18, %v4286_v35  ;;  %v4762_v22 = vmul.f32 %v4685_v15, %v4685_v15  ;;  %v4796_v0 = vadd.f32 %v4795_v49, %v4761_v62  ;;  %v4720_v52 = vadd.f32 %v4719_v59, %v4685_v15  ;;  %v3746_v30 = vpop.f32.mrb[27].mxu0  ;;  %v5930_v57 = vpop.f32.mrb[28].mxu1 }
 0x22a   : > { %vm4371_vm10 = vcmp.lt.s32.totalorder %v9168_v17, 0  ;;  %v4687_v5 = vsel %vm9151_vm6, %v6190_v6, 0.0  ;;  %v4686_v3 = vsel %vm9160_vm3, %v6191_v29, 0.0  ;;  %4843 = vst [vmem:[%s8671_s5 + $0xc0] sm:$0xff] %v6191_v29  ;;  %v4443_v56 = vadd.s32 18, %v9168_v17  ;;  %v6154_v39 = vpop.f32.mrb[28].mxu0 }
 0x22b   : > { %v9260_v18 = vsub.s32 %v9008_v47, %v4298_v19  ;;  %v4721_v60 = vadd.f32 %v4720_v52, %v4686_v3  ;;  %v4763_v32 = vmul.f32 %v4686_v3, %v4686_v3  ;;  %v4797_v37 = vadd.f32 %v4796_v0, %v4762_v22  ;;  %vm9280_vm6 = vmand %vm4371_vm10, %vm4335_vm8  ;;  %v2169_v42 = vpop.f32.mrb[29].mxu1  ;;  %v3756_v54 = vpop.f32.mrb[29].mxu0 }
 0x22c   : > { %v6192_v2 = vadd.f32 %v6151_v55, %v5927_v21  ;;  %vm9262_vm14 = vcmp.lt.s32.totalorder %v4477_v38, 16  ;;  %vm9266_vm0 = vcmp.lt.s32.totalorder %v4476_v50, 16  ;;  %v6193_v16 = vadd.f32 %v3746_v30, %v2159_v13  ;;  %v5933_v35 = vpop.f32.mrb[30].mxu1 }
 0x22d   : > { %vm4334_vm11 = vcmp.ne.s32.totalorder %v9249_v61, 0  ;;  %vm4370_vm7 = vcmp.lt.s32.totalorder %v9249_v61, 0  ;;  %v9273_v47 = vsub.s32 %v9020_v10, %v4287_v11  ;;  %v4764_v1 = vmul.f32 %v4687_v5, %v4687_v5  ;;  %v2179_v20 = vpop.f32.mrb[31].mxu1 }
 0x22e   : > { %v4798_v23 = vadd.f32 %v4797_v37, %v4763_v32  ;;  %4846 = vst [vmem:[%s8671_s5 + $0xd8] sm:$0xff] %v6192_v2  ;;  %v4722_v4 = vadd.f32 %v4721_v60, %v4687_v5  ;;  %v4442_v26 = vadd.s32 18, %v9249_v61  ;;  %v4689_v43 = vsel %vm9193_vm13, %v6192_v2, 0.0  ;;  %4845 = vst [vmem:[%s8671_s5 + $0xd0] sm:$0xff] %v6193_v16  ;;  %v5936_v29 = vpop.f32.mrb[32].mxu1 }
 0x22f   : > { %v4688_v10 = vsel %vm9202_vm12, %v6193_v16, 0.0  ;;  %vm4337_vm3 = vcmp.ne.s32.totalorder %v9260_v18, 0  ;;  %vm4373_vm9 = vcmp.lt.s32.totalorder %v9260_v18, 0  ;;  %v6194_v40 = vadd.f32 %v6154_v39, %v5930_v57  ;;  %vm9296_vm1 = vmand %vm4370_vm7, %vm4334_vm11  ;;  %v2189_v0 = vpop.f32.mrb[33].mxu1 }
 0x230   : > { %v4723_v45 = vadd.f32 %v4722_v4, %v4688_v10  ;;  %v4765_v7 = vmul.f32 %v4688_v10, %v4688_v10  ;;  %v4799_v53 = vadd.f32 %v4798_v23, %v4764_v1  ;;  %v6195_v34 = vadd.f32 %v3756_v54, %v2169_v42  ;;  %vm9319_vm12 = vmand %vm4373_vm9, %vm4337_vm3  ;;  %v5939_v30 = vpop.f32.mrb[34].mxu1 }
 0x231   : > { %v4479_v27 = vsel %vm9280_vm6, %v4443_v56, %v9168_v17  ;;  %vm4336_vm4 = vcmp.ne.s32.totalorder %v9273_v47, 0  ;;  %vm4372_vm13 = vcmp.lt.s32.totalorder %v9273_v47, 0  ;;  %v4766_v31 = vmul.f32 %v4689_v43, %v4689_v43  ;;  %4848 = vst [vmem:[%s8671_s5 + $0xe8] sm:$0xff] %v6194_v40  ;;  %v6157_v17 = vpop.f32.mrb[30].mxu0  ;;  %v2199_v16 = vpop.f32.mrb[35].mxu1 }
 0x232   : > { %v4800_v46 = vadd.f32 %v4799_v53, %v4765_v7  ;;  %v4724_v63 = vadd.f32 %v4723_v45, %v4689_v43  ;;  %v4445_v8 = vadd.s32 18, %v9260_v18  ;;  %v4691_v41 = vsel %vm9232_vm5, %v6194_v40, 0.0  ;;  %4847 = vst [vmem:[%s8671_s5 + $0xe0] sm:$0xff] %v6195_v34  ;;  %v3766_v59 = vpop.f32.mrb[31].mxu0  ;;  %vm9328_vm15 = vmand %vm4372_vm13, %vm4336_vm4 }
 0x233   : > { %v4690_v51 = vsel %vm9241_vm2, %v6195_v34, 0.0  ;;  %v4478_v38 = vsel %vm9296_vm1, %v4442_v26, %v9249_v61  ;;  %v4444_v15 = vadd.s32 18, %v9273_v47  ;;  %v6196_v19 = vadd.f32 %v6157_v17, %v5933_v35  ;;  %v6160_v22 = vpop.f32.mrb[32].mxu0 }
 0x234   : > { %v4725_v36 = vadd.f32 %v4724_v63, %v4690_v51  ;;  %v4767_v14 = vmul.f32 %v4690_v51, %v4690_v51  ;;  %v4801_v9 = vadd.f32 %v4800_v46, %v4766_v31  ;;  %v6197_v49 = vadd.f32 %v3766_v59, %v2179_v20  ;;  %v3776_v56 = vpop.f32.mrb[33].mxu0 }
 0x235   : > { %vm9332_vm8 = vcmp.lt.s32.totalorder %v4479_v27, 16  ;;  %v4768_v48 = vmul.f32 %v4691_v41, %v4691_v41  ;;  %4850 = vst [vmem:[%s8671_s5 + $0xf8] sm:$0xff] %v6196_v19  ;;  %vm9337_vm5 = vcmp.lt.s32.totalorder %v4478_v38, 16  ;;  %v4693_v61 = vsel %vm9262_vm14, %v6196_v19, 0.0  ;;  %v6163_v33 = vpop.f32.mrb[34].mxu0 }
 0x236   : > { %v4802_v25 = vadd.f32 %v4801_v9, %v4767_v14  ;;  %v4726_v24 = vadd.f32 %v4725_v36, %v4691_v41  ;;  %v4692_v11 = vsel %vm9266_vm0, %v6197_v49, 0.0  ;;  %4849 = vst [vmem:[%s8671_s5 + $0xf0] sm:$0xff] %v6197_v49  ;;  %v4481_v52 = vsel %vm9319_vm12, %v4445_v8, %v9260_v18  ;;  %v3786_v57 = vpop.f32.mrb[35].mxu0 }
 0x237   : > { %v4480_v21 = vsel %vm9328_vm15, %v4444_v15, %v9273_v47  ;;  %v4769_v3 = vmul.f32 %v4692_v11, %v4692_v11  ;;  %v6198_v13 = vadd.f32 %v6160_v22, %v5936_v29  ;;  %v6199_v60 = vadd.f32 %v3776_v56, %v2189_v0 }
 0x238   : > { %v4727_v5 = vadd.f32 %v4726_v24, %v4692_v11  ;;  %v4803_v55 = vadd.f32 %v4802_v25, %v4768_v48  ;;  %v4770_v32 = vmul.f32 %v4693_v61, %v4693_v61  ;;  %vm4517_vm2 = vcmp.lt.s32.totalorder %v4481_v52, 16 }
 0x239   : > { %4852 = vst [vmem:[%s8671_s5 + $0x108] sm:$0xff] %v6198_v13  ;;  %v4695_v12 = vsel %vm9332_vm8, %v6198_v13, 0.0  ;;  %v4694_v18 = vsel %vm9337_vm5, %v6199_v60, 0.0  ;;  %4851 = vst [vmem:[%s8671_s5 + $0x100] sm:$0xff] %v6199_v60  ;;  %vm4516_vm10 = vcmp.lt.s32.totalorder %v4480_v21, 16  ;;  %v6200_v4 = vadd.f32 %v6163_v33, %v5939_v30 }
 0x23a   : > { %v4804_v37 = vadd.f32 %v4803_v55, %v4769_v3  ;;  %v4728_v2 = vadd.f32 %v4727_v5, %v4693_v61  ;;  %v4771_v1 = vmul.f32 %v4694_v18, %v4694_v18  ;;  %v6201_v44 = vadd.f32 %v3786_v57, %v2199_v16 }
 0x23b   : > { %v4772_v26 = vmul.f32 %v4695_v12, %v4695_v12  ;;  %4854 = vst [vmem:[%s8671_s5 + $0x118] sm:$0xff] %v6200_v4  ;;  %v4697_v39 = vsel %vm4517_vm2, %v6200_v4, 0.0  ;;  %vm4816_vm14 = vcmask 1040384  }
 0x23c   : > { %v4729_v47 = vadd.f32 %v4728_v2, %v4694_v18  ;;  %v4805_v23 = vadd.f32 %v4804_v37, %v4770_v32  ;;  %v4696_v42 = vsel %vm4516_vm10, %v6201_v44, 0.0  ;;  %4853 = vst [vmem:[%s8671_s5 + $0x110] sm:$0xff] %v6201_v44  ;;  %v4774_v40 = vmul.f32 %v4697_v39, %v4697_v39 }
 0x23d   : > { %v4773_v7 = vmul.f32 %v4696_v42, %v4696_v42 }
 0x23e   : > { %v4806_v43 = vadd.f32 %v4805_v23, %v4771_v1  ;;  %v4730_v10 = vadd.f32 %v4729_v47, %v4695_v12 }
 0x240   : > { %v4731_v45 = vadd.f32 %v4730_v10, %v4696_v42  ;;  %v4807_v53 = vadd.f32 %v4806_v43, %v4772_v26 }
 0x242   : > { %v4732_v54 = vadd.f32 %v4731_v45, %v4697_v39  ;;  %v4808_v28 = vadd.f32 %v4807_v53, %v4773_v7 }
 0x244   : > { %v4733_v34 = vrot.slane %v4732_v54, 4  ;;  %v4809_v27 = vadd.f32 %v4808_v28, %v4774_v40 }
 0x246   : > { %v4734_v31 = vadd.f32 %v4733_v34, %v4732_v54  ;;  %v4810_v46 = vrot.slane %v4809_v27, 4 }
 0x248   : > { %v4735_v63 = vrot.slane %v4734_v31, 2  ;;  %v4811_v35 = vadd.f32 %v4810_v46, %v4809_v27 }
 0x24a   : > { %v4736_v8 = vadd.f32 %v4735_v63, %v4734_v31  ;;  %v4812_v41 = vrot.slane %v4811_v35, 2 }
 0x24c   : > { %v4737_v51 = vrot.slane %v4736_v8, 1  ;;  %v4813_v17 = vadd.f32 %v4812_v41, %v4811_v35 }
 0x24e   : > { %v4814_v20 = vrot.slane %v4813_v17, 1  ;;  %v4738_v38 = vadd.f32 %v4737_v51, %v4736_v8 }
 0x250   : > { %v4815_v58 = vadd.f32 %v4814_v20, %v4813_v17 }
 0x252   : > { %v4817_v15 = vsel %vm4816_vm14, %v4738_v38, %v4815_v58 }
 0x253   : > { %4818 = vst [vmem:[%s289_s9] sm:$0x3] %v4817_v15 }
 0x254 PF: > { %s15_s17 = sadd.s32 1, %s6609_s17   ;;  %s9771_s15 = smov %s6605_s16 }
 0x255   : > { %p12_p6 = scmp.ge.s32.totalorder %s15_s17, 4   ;;  %s9772_s16 = smov %s9774_s18 }
 0x257   :  { %14 = sbr.rel (!%p12_p6) target bundleno = 2 (0x2), region = 77 }

</bundles_post_ra>
